<compile_context>
chip_gen: v5e
topology: v5e:2x2
jax: 0.10.0
libtpu: 0.0.40
codegen_flags: <defaults>
</compile_context>

<pallas_src>
import functools

import jax
import jax.numpy as jnp
from jax.experimental import pallas as pl
from jax.experimental.pallas import tpu as pltpu


_LANE = 128       # TPU lane width: keep the feature axis lane-dense
_SUBLANE = 8      # f32 sublane granularity
_NEG_INF = -1e30  # finite sentinel (a true -inf would give NaN for padded rows)


def _round_up(v, m):
    return (v + m - 1) // m * m


def attention_kernel(x_ref, wt_ref, b_ref, o_ref):
    """One batch tile: scores = softmax(x @ W^T + b, axis=-1); out = x * scores."""
    x = x_ref[...]                                            # (tb, Fp) f32
    scores = jnp.dot(x.astype(wt_ref.dtype), wt_ref[...],
                     preferred_element_type=jnp.float32)      # MXU, f32 accum
    scores = scores + b_ref[...]                              # padded lanes -> -1e30
    m = jnp.max(scores, axis=-1, keepdims=True)
    e = jnp.exp(scores - m)                                   # padded lanes -> 0
    denom = jnp.sum(e, axis=-1, keepdims=True)
    probs = e / denom                # exact divide: kernel is HBM-bound, VPU/EUP slack
    # Gate with the original (un-quantized) f32 x.
    o_ref[...] = (x * probs).astype(o_ref.dtype)


def prepare_attention_params(weight, bias, *, matmul_dtype=jnp.bfloat16):
    """One-time parameter prep (hoisted out of the per-call path).

    weight: (out_features, in_features) PyTorch layout; bias: (out_features,).
    Returns (W^T padded to (Fp, Fp) in `matmul_dtype`, bias padded to (1, Fp)
    f32 with -1e30 in padded lanes so they vanish in the softmax).
    matmul_dtype=jnp.float32 is the high-accuracy path; bf16 halves weight
    traffic and feeds the MXU at full rate.
    """
    out_f, in_f = weight.shape
    assert out_f == in_f, "x * scores broadcast requires out_features == in_features"
    F = in_f
    Fp = _round_up(max(F, _LANE), _LANE)
    wt = jnp.zeros((Fp, Fp), dtype=matmul_dtype)
    wt = wt.at[:F, :F].set(weight.T.astype(matmul_dtype))
    b2 = jnp.full((1, Fp), _NEG_INF, dtype=jnp.float32)
    b2 = b2.at[0, :F].set(bias.astype(jnp.float32))
    return wt, b2


def _vmem_capacity_bytes():
    try:
        return int(pltpu.get_tpu_info().vmem_capacity_bytes)
    except Exception:
        return 64 << 20            # conservative (v7x-sized) fallback


def _vmem_budget_bytes():
    # Leave headroom below physical VMEM for Mosaic internal scratch:
    # ~48 MiB usable on v7x (64 MiB phys), ~112 MiB on v5e/v6e (128 MiB phys).
    return max(_vmem_capacity_bytes() - (16 << 20), 32 << 20)


def _pick_batch_tile(B, Fp, const_vmem_bytes, vmem_budget):
    """Largest batch tile whose double-buffered x/out tiles fit the VMEM budget,
    capped at 2048 rows; shrunk only far enough to keep >=2 (moderate B) or
    >=4 (large B) grid steps for pipelining / 2-TensorCore sharding."""
    if B <= _SUBLANE:
        return max(B, 1)                          # single full-extent block
    per_row = 2 * 2 * Fp * 4                      # x & out tiles, double-buffered f32
    avail = max(vmem_budget - const_vmem_bytes - (4 << 20), per_row * _SUBLANE)
    tb = int(min(avail // per_row, 2048))
    if B >= 4 * 256:      # >=4 grid steps (2 TCs x >=2 steps), tiles stay >=256 rows
        tb = min(tb, max(256, _round_up(pl.cdiv(B, 4), _SUBLANE)))
    elif B >= 2 * 256:    # >=2 grid steps so the pipeline overlaps DMA with compute
        tb = min(tb, max(256, _round_up(pl.cdiv(B, 2), _SUBLANE)))
    tb = min(tb, (B // _SUBLANE) * _SUBLANE)      # overhang only on ragged last step
    return max(_round_up(tb, _SUBLANE), _SUBLANE)


@functools.partial(jax.jit, static_argnames=("tb", "single_buffer_consts"))
def _attention_forward_impl(x, wt, b2, *, tb, single_buffer_consts):
    B, F = x.shape
    Fp = wt.shape[1]
    w_bytes = Fp * Fp * wt.dtype.itemsize

    # Feature padding only when F isn't already lane-aligned; the batch axis is
    # never padded (Pallas masks the ragged last block's OOB rows on store).
    if F != Fp:
        x_in = jnp.zeros((B, Fp), x.dtype).at[:, :F].set(x)
    else:
        x_in = x

    grid = (pl.cdiv(B, tb),)

    const_kwargs = (
        dict(pipeline_mode=pl.Buffered(1)) if single_buffer_consts else {}
    )
    in_specs = [
        pl.BlockSpec((tb, Fp), lambda i: (i, 0)),                  # x tile (pipelined)
        pl.BlockSpec((Fp, Fp), lambda i: (0, 0), **const_kwargs),  # W^T, resident
        pl.BlockSpec((1, Fp), lambda i: (0, 0), **const_kwargs),   # bias, resident
    ]

    # Advisory cost hint so XLA schedules/overlaps the custom call sensibly.
    cost = pl.CostEstimate(
        flops=2 * B * Fp * Fp + 6 * B * Fp,
        transcendentals=B * Fp,
        bytes_accessed=2 * B * Fp * 4 + w_bytes + Fp * 4,
    )

    nbuf = 1 if single_buffer_consts else 2
    need = 2 * (2 * tb * Fp * 4) + nbuf * (w_bytes + Fp * 4) + (4 << 20)
    vmem_limit = int(min(max(need, 16 << 20), _vmem_capacity_bytes() - (8 << 20)))

    # TODO(synk): for Fp >~ 2048 tile the feature axis (K-loop + f32 accumulator or
    # two-pass softmax) instead of keeping W^T fully resident; and on v7x evaluate
    # pltpu.CORE_PARALLEL on the batch axis for true 2-TensorCore sharding.
    if nbuf * w_bytes + 2 * (2 * _SUBLANE * Fp * 4) > _vmem_budget_bytes():
        raise NotImplementedError(
            f"weight ({w_bytes >> 20} MiB) does not fit resident in VMEM; "
            "feature-axis tiling not implemented")

    out = pl.pallas_call(
        attention_kernel,
        out_shape=jax.ShapeDtypeStruct((B, Fp), x.dtype),
        grid_spec=pltpu.PrefetchScalarGridSpec(
            num_scalar_prefetch=0,
            grid=grid,
            in_specs=in_specs,
            out_specs=pl.BlockSpec((tb, Fp), lambda i: (i, 0)),
        ),
        compiler_params=pltpu.CompilerParams(
            dimension_semantics=("parallel",),
            vmem_limit_bytes=vmem_limit,
        ),
        cost_estimate=cost,
    )(x_in, wt, b2)

    if F != Fp:
        out = out[:, :F]
    return out


_SINGLE_BUFFER_CONSTS = True   # dropped at runtime if pl.Buffered(1) is unsupported


def attention_forward(x, wt, b2, *, tb=None):
    """x: (B, F) f32. wt: (Fp, Fp) pre-transposed/padded weight. b2: (1, Fp) f32."""
    global _SINGLE_BUFFER_CONSTS
    B, F = x.shape
    Fp = wt.shape[1]
    if tb is None:
        # Size the tile assuming worst-case (double-buffered) constants so it
        # fits either pipelining path.
        const_bytes = 2 * (Fp * Fp * wt.dtype.itemsize + Fp * 4)
        tb = _pick_batch_tile(B, Fp, const_bytes, _vmem_budget_bytes())
    tb = int(tb)
    if _SINGLE_BUFFER_CONSTS:
        try:
            return _attention_forward_impl(x, wt, b2, tb=tb,
                                           single_buffer_consts=True)
        except Exception:
            _SINGLE_BUFFER_CONSTS = False   # retry without the buffering hint
    return _attention_forward_impl(x, wt, b2, tb=tb, single_buffer_consts=False)


def attention_ref(x, weight, bias):
    """Pure-JAX (f32) reference matching the PyTorch forward."""
    scores = x @ weight.T + bias
    scores = jax.nn.softmax(scores, axis=1)
    return x * scores


if __name__ == "__main__":
    key = jax.random.PRNGKey(0)

    # ---- main test: lane-dense features, batch tiled across >=2 grid steps ----
    B, F = 512, 128
    kx, kw, kb = jax.random.split(key, 3)
    x = jax.random.normal(kx, (B, F), dtype=jnp.float32)
    bound = 1.0 / jnp.sqrt(jnp.float32(F))
    weight = jax.random.uniform(kw, (F, F), minval=-bound, maxval=bound,
                                dtype=jnp.float32)            # (out, in)
    bias = jax.random.uniform(kb, (F,), minval=-bound, maxval=bound,
                              dtype=jnp.float32)

    wt, b2 = prepare_attention_params(weight, bias)           # bf16 MXU weights
    out = jax.block_until_ready(attention_forward(x, wt, b2))
    ref = attention_ref(x, weight, bias)
    assert out.shape == (B, F)
    # bf16 MXU inputs -> relaxed (bf16-appropriate) tolerance.
    assert jnp.allclose(out, ref, atol=1e-2, rtol=2e-2), \
        f"max abs err {jnp.max(jnp.abs(out - ref))}"

    # ---- unaligned shapes: ragged batch tile + feature-lane padding/masking ----
    Bs, Fs = 20, 32
    ks = jax.random.split(key, 6)
    xs = jax.random.normal(ks[3], (Bs, Fs), dtype=jnp.float32)
    bnd = 1.0 / jnp.sqrt(jnp.float32(Fs))
    ws = jax.random.uniform(ks[4], (Fs, Fs), minval=-bnd, maxval=bnd,
                            dtype=jnp.float32)
    bs = jax.random.uniform(ks[5], (Fs,), minval=-bnd, maxval=bnd,
                            dtype=jnp.float32)
    wts, b2s = prepare_attention_params(ws, bs, matmul_dtype=jnp.float32)
    outs = jax.block_until_ready(attention_forward(xs, wts, b2s))
    refs = attention_ref(xs, ws, bs)
    assert outs.shape == (Bs, Fs)
    assert jnp.allclose(outs, refs, atol=1e-4, rtol=1e-4), \
        f"max abs err {jnp.max(jnp.abs(outs - refs))}"

    print("KERNEL_OK")
</pallas_src>

<mosaic_0001>
module attributes {stable_mosaic.version = 11 : i64} {
  func.func @attention_kernel(%arg0: i32, %arg1: memref<256x128xf32, #tpu.memory_space<vmem>>, %arg2: memref<128x128xbf16, #tpu.memory_space<vmem>>, %arg3: memref<1x128xf32, #tpu.memory_space<vmem>>, %arg4: memref<256x128xf32, #tpu.memory_space<vmem>>) attributes {dimension_semantics = [#tpu.dimension_semantics<parallel>], iteration_bounds = array<i64: 2>, scalar_prefetch = 0 : i64, scratch_operands = 0 : i64, tpu.core_type = #tpu.core_type<tc>, window_params = [{transform_indices = @transform_0, window_bounds = array<i64: 256, 128>}, {pipeline_mode = #tpu.pipeline_mode<synchronous>, transform_indices = @transform_1, window_bounds = array<i64: 128, 128>}, {pipeline_mode = #tpu.pipeline_mode<synchronous>, transform_indices = @transform_2, window_bounds = array<i64: 1, 128>}, {transform_indices = @transform_3, window_bounds = array<i64: 256, 128>}]} {
    %c0 = arith.constant 0 : index
    %c0_0 = arith.constant 0 : index
    %0 = vector.load %arg1[%c0, %c0_0] : memref<256x128xf32, #tpu.memory_space<vmem>>, vector<256x128xf32>
    %1 = arith.truncf %0 : vector<256x128xf32> to vector<256x128xbf16>
    %c0_1 = arith.constant 0 : index
    %c0_2 = arith.constant 0 : index
    %2 = vector.load %arg2[%c0_1, %c0_2] : memref<128x128xbf16, #tpu.memory_space<vmem>>, vector<128x128xbf16>
    %cst = arith.constant dense<0.000000e+00> : vector<256x128xf32>
    %3 = tpu.matmul %1, %2, %cst {dimension_numbers = #tpu.dot_dimension_numbers<[1], [0], [0], [1], [0, 0, 1, 1], [], []>} : vector<256x128xbf16>, vector<128x128xbf16>, vector<256x128xf32> -> vector<256x128xf32>
    %c0_3 = arith.constant 0 : index
    %c0_4 = arith.constant 0 : index
    %4 = vector.load %arg3[%c0_3, %c0_4] : memref<1x128xf32, #tpu.memory_space<vmem>>, vector<1x128xf32>
    %5 = vector.broadcast %4 : vector<1x128xf32> to vector<256x128xf32>
    %6 = arith.addf %3, %5 : vector<256x128xf32>
    %cst_5 = arith.constant dense<0xFF800000> : vector<256xf32>
    %7 = vector.multi_reduction <maximumf>, %6, %cst_5 [1] : vector<256x128xf32> to vector<256xf32>
    %8 = vector.shape_cast %7 : vector<256xf32> to vector<256x1xf32>
    %9 = vector.broadcast %8 : vector<256x1xf32> to vector<256x128xf32>
    %10 = arith.subf %6, %9 : vector<256x128xf32>
    %11 = math.exp %10 : vector<256x128xf32>
    %cst_6 = arith.constant dense<0.000000e+00> : vector<256xf32>
    %12 = vector.multi_reduction <add>, %11, %cst_6 [1] : vector<256x128xf32> to vector<256xf32>
    %13 = vector.shape_cast %12 : vector<256xf32> to vector<256x1xf32>
    %14 = vector.broadcast %13 : vector<256x1xf32> to vector<256x128xf32>
    %15 = arith.divf %11, %14 : vector<256x128xf32>
    %16 = arith.mulf %0, %15 : vector<256x128xf32>
    %c0_7 = arith.constant 0 : index
    %c0_8 = arith.constant 0 : index
    %17 = vector.load %arg4[%c0_7, %c0_8] : memref<256x128xf32, #tpu.memory_space<vmem>>, vector<256x128xf32>
    tpu.vector_store %arg4[%c0_7, %c0_8], %16 {strides = array<i32>} : memref<256x128xf32, #tpu.memory_space<vmem>>, vector<256x128xf32>,
    return
  }
  func.func @transform_0(%arg0: i32) -> (i32, i32) {
    %c0_i32 = arith.constant 0 : i32
    %c0_i32_0 = arith.constant 0 : i32
    return %arg0, %c0_i32 : i32, i32
  }
  func.func @transform_1(%arg0: i32) -> (i32, i32) {
    %c0_i32 = arith.constant 0 : i32
    %c0_i32_0 = arith.constant 0 : i32
    %c0_i32_1 = arith.constant 0 : i32
    return %c0_i32, %c0_i32_0 : i32, i32
  }
  func.func @transform_2(%arg0: i32) -> (i32, i32) {
    %c0_i32 = arith.constant 0 : i32
    %c0_i32_0 = arith.constant 0 : i32
    %c0_i32_1 = arith.constant 0 : i32
    return %c0_i32, %c0_i32_0 : i32, i32
  }
  func.func @transform_3(%arg0: i32) -> (i32, i32) {
    %c0_i32 = arith.constant 0 : i32
    %c0_i32_0 = arith.constant 0 : i32
    return %arg0, %c0_i32 : i32, i32
  }
}

module attributes {stable_mosaic.version = 11 : i64} {
  func.func @attention_kernel(%arg0: i32, %arg1: memref<256x128xf32, #tpu.memory_space<vmem>>, %arg2: memref<128x128xbf16, #tpu.memory_space<vmem>>, %arg3: memref<1x128xf32, #tpu.memory_space<vmem>>, %arg4: memref<256x128xf32, #tpu.memory_space<vmem>>) attributes {dimension_semantics = [#tpu.dimension_semantics<parallel>], iteration_bounds = array<i64: 2>, scalar_prefetch = 0 : i64, scratch_operands = 0 : i64, tpu.core_type = #tpu.core_type<tc>, window_params = [{transform_indices = @transform_0, window_bounds = array<i64: 256, 128>}, {pipeline_mode = #tpu.pipeline_mode<synchronous>, transform_indices = @transform_1, window_bounds = array<i64: 128, 128>}, {pipeline_mode = #tpu.pipeline_mode<synchronous>, transform_indices = @transform_2, window_bounds = array<i64: 1, 128>}, {transform_indices = @transform_3, window_bounds = array<i64: 256, 128>}]} {
    %c0 = arith.constant 0 : index
    %c0_0 = arith.constant 0 : index
    %0 = vector.load %arg1[%c0, %c0_0] : memref<256x128xf32, #tpu.memory_space<vmem>>, vector<256x128xf32>
    %1 = arith.truncf %0 : vector<256x128xf32> to vector<256x128xbf16>
    %c0_1 = arith.constant 0 : index
    %c0_2 = arith.constant 0 : index
    %2 = vector.load %arg2[%c0_1, %c0_2] : memref<128x128xbf16, #tpu.memory_space<vmem>>, vector<128x128xbf16>
    %cst = arith.constant dense<0.000000e+00> : vector<256x128xf32>
    %3 = tpu.matmul %1, %2, %cst {dimension_numbers = #tpu.dot_dimension_numbers<[1], [0], [0], [1], [0, 0, 1, 1], [], []>} : vector<256x128xbf16>, vector<128x128xbf16>, vector<256x128xf32> -> vector<256x128xf32>
    %c0_3 = arith.constant 0 : index
    %c0_4 = arith.constant 0 : index
    %4 = vector.load %arg3[%c0_3, %c0_4] : memref<1x128xf32, #tpu.memory_space<vmem>>, vector<1x128xf32>
    %5 = vector.broadcast %4 : vector<1x128xf32> to vector<256x128xf32>
    %6 = arith.addf %3, %5 : vector<256x128xf32>
    %cst_5 = arith.constant dense<0xFF800000> : vector<256xf32>
    %7 = vector.multi_reduction <maximumf>, %6, %cst_5 [1] : vector<256x128xf32> to vector<256xf32>
    %8 = vector.shape_cast %7 : vector<256xf32> to vector<256x1xf32>
    %9 = vector.broadcast %8 : vector<256x1xf32> to vector<256x128xf32>
    %10 = arith.subf %6, %9 : vector<256x128xf32>
    %11 = math.exp %10 : vector<256x128xf32>
    %cst_6 = arith.constant dense<0.000000e+00> : vector<256xf32>
    %12 = vector.multi_reduction <add>, %11, %cst_6 [1] : vector<256x128xf32> to vector<256xf32>
    %13 = vector.shape_cast %12 : vector<256xf32> to vector<256x1xf32>
    %14 = vector.broadcast %13 : vector<256x1xf32> to vector<256x128xf32>
    %15 = arith.divf %11, %14 : vector<256x128xf32>
    %16 = arith.mulf %0, %15 : vector<256x128xf32>
    %c0_7 = arith.constant 0 : index
    %c0_8 = arith.constant 0 : index
    %17 = vector.load %arg4[%c0_7, %c0_8] : memref<256x128xf32, #tpu.memory_space<vmem>>, vector<256x128xf32>
    tpu.vector_store %arg4[%c0_7, %c0_8], %16 {strides = array<i32>} : memref<256x128xf32, #tpu.memory_space<vmem>>, vector<256x128xf32>,
    return
  }
  func.func @transform_0(%arg0: i32) -> (i32, i32) {
    %c0_i32 = arith.constant 0 : i32
    %c0_i32_0 = arith.constant 0 : i32
    return %arg0, %c0_i32 : i32, i32
  }
  func.func @transform_1(%arg0: i32) -> (i32, i32) {
    %c0_i32 = arith.constant 0 : i32
    %c0_i32_0 = arith.constant 0 : i32
    %c0_i32_1 = arith.constant 0 : i32
    return %c0_i32, %c0_i32_0 : i32, i32
  }
  func.func @transform_2(%arg0: i32) -> (i32, i32) {
    %c0_i32 = arith.constant 0 : i32
    %c0_i32_0 = arith.constant 0 : i32
    %c0_i32_1 = arith.constant 0 : i32
    return %c0_i32, %c0_i32_0 : i32, i32
  }
  func.func @transform_3(%arg0: i32) -> (i32, i32) {
    %c0_i32 = arith.constant 0 : i32
    %c0_i32_0 = arith.constant 0 : i32
    return %arg0, %c0_i32 : i32, i32
  }
}

</mosaic_0001>

<bundles_post_ra>
// kernel: _attention_forward_impl.1
= control target key start
LH: loop header
LB: loop body
LE: loop exit
PB: predicated region body
PF: predicated region fallthrough
CT: control target
= control target key end

     0   :  { %8 = vsyncpa [#allocation3], 0  ;;  %s2699_s0 = inlined_call_operand.hbm [shape: f32[512,128], index: 0, kind: input, shape index: {}]   ;;  %s2700_s1 = inlined_call_operand.hbm [shape: bf16[128,128], index: 1, kind: input, shape index: {}]   ;;  %s2701_s2 = inlined_call_operand.vmem [shape: f32[1,128], index: 2, kind: input, shape index: {}]   ;;  %s2702_s3 = inlined_call_operand.hbm [shape: f32[512,128], index: 3, kind: output, shape index: {}]  }
   0x1   :  { %10 = vsyncpa [#allocation3 + $0x1], 0 }
   0x2   :  { %11 = vsyncpa [#allocation6], 0 }
   0x3   :  { %12 = vsyncpa [#allocation4], 0 }
   0x4   :  { %14 = vsyncpa [#allocation4 + $0x1], 0  ;;  %s1740_s12 = smov 0   ;;  %s1742_s13 = smov 0  }
   0x5   :  { %s1744_s14 = smov 0   ;;  %s1746_s15 = smov 0  }
   0x6 LB: > { %s1761_s16 = sadd.s32 4294967295, %s1711_s15   ;;  %s1282_s17 = sadd.s32 4294967294, %s1711_s15   ;;  %s1711_s15 = sphi %s1746_s15, %s2760_s15   ;;  %s1707_s14 = sphi %s1744_s14, %s2759_s14   ;;  %s1703_s13 = sphi %s1742_s13, %s2758_s13   ;;  %s1699_s12 = sphi %s1740_s12, %s2757_s12  }
   0x7   : > { %p40_p0 = scmp.ne.s32.totalorder %s1703_s13, %s1699_s12  ;;  %p41_p1 = scmp.eq.s32.totalorder %s1761_s16, 0 }
   0x8   : > { %p106_p2 = scmp.eq.s32.totalorder %s1761_s16, 1  ;;  %p112_p3 = scmp.eq.s32.totalorder %s1282_s17, 1 }
   0x9   : > { %p1770_p4 = por %p41_p1, %p40_p0  ;;  %p1283_p5 = scmp.ge.s32.totalorder %s1711_s15, 1 }
   0xa   : > { %p1775_p6 = por %p112_p3, %p40_p0  ;;  %p119_p7 = scmp.lt.s32.totalorder %s1711_s15, 3 }
   0xb   : > { %s130_s22 = sshll.u32 %s2700_s1, 4  ;;  %s1713_s24 = smov [#allocation5]   ;;  %s131_s22 = int_to_ptr.hbm [resolvable:$true] %s130_s22 }
   0xc   : > { %p1783_p8 = pnand %p1283_p5, %p119_p7  ;;  %s132_s25 = sshll.u32 %s1713_s24, 4  ;;  %s133_s25 = int_to_ptr.vmem [resolvable:$true] %s132_s25 }
   0xd   : > { %s1793_s26 = sadd.s32 1, %s1711_s15   ;;  %s1714_s27 = smov 64  }
   0xe   : > { %p1372_p9 = pneg %p1783_p8  ;;  %s1715_s28 = smov 4  }
   0xf   : > { %s24_s29 = ssub.s32 %s1711_s15, %s1793_s26  ;;  %s27_s30 = sadd.s32 1, %s1707_s14 }
  0x10   : > { %p1373_p10 = pnand %p1372_p9, %p41_p1  ;;  %p25_p12 = scmp.eq.s32.totalorder %s24_s29, 0 }
  0x11   : > { %p34_p13 = scmp.ne.s32.totalorder %s1707_s14, %s1703_s13  ;;  %p35_p0 = scmp.eq.s32.totalorder %s1711_s15, 0 }
  0x12   : > { %1375 = dma.hbm_to_vmem [thread:$0]  (!%p1373_p10), %s131_s22, 1024, %s133_s25, [#allocation6], %s1714_s27, %s1714_s27, %s1715_s28  }
  0x13   : > { %p1385_p3 = scmp.lt.s32.totalorder %s1711_s15, 2  ;;  %p36_p5 = por %p35_p0, %p34_p13 }
  0x14   : > { %s1803_s4 = scalar_select %p25_p12, %s1707_s14, %s27_s30  }
  0x15   : > { %p1807_p7 = por %p106_p2, %p34_p13  ;;  %s149_s6 = sand.u32 1, %s1707_s14  }
  0x16   : > { %s1330_s7 = sshll.u32 %s1711_s15, 8  ;;  %s1286_s8 = sshll.u32 %s149_s6, 8 }
  0x17   : > { %s158_s11 = scalar_lea.hbm %s2699_s0, %s1330_s7  ;;  %s153_s20 = scalar_lea.vmem [#allocation2], %s1286_s8 }
  0x18   : > { %s159_s17 = sshll.u32 %s158_s11, 4  ;;  %s161_s21 = sshll.u32 %s153_s20, 4  ;;  %s160_s17 = int_to_ptr.hbm [resolvable:$true] %s159_s17  ;;  %s162_s21 = int_to_ptr.vmem [resolvable:$true] %s161_s21 }
  0x19   : > { %p1818_p9 = pnand %p1385_p3, %p36_p5  ;;  %s150_s24 = scalar_lea.sflag [#allocation3], %s149_s6 }
  0x1a   : > { %s1611_s25 = sshra.s32 %s160_s17, 4  ;;  %s1618_s30 = scalar_lea.hbm %s2699_s0, 512  ;;  %s1612_s25 = int_to_ptr.hbm [resolvable:$true] %s1611_s25 }
  0x1b   : > { %s1613_s27 = scalar_lea.hbm %s1612_s25, 256  ;;  %p1615_p10 = pneg %p1818_p9 }
  0x1c   : > { %p1614_p2 = scmp.ne.s32.totalorder %s1612_s25, %s1613_s27  ;;  %p1619_p0 = scmp.lt.s32.totalorder %s1612_s25, %s2699_s0 }
  0x1d   : > { %p1620_p3 = scmp.lt.s32.totalorder %s1618_s30, %s1613_s27 }
  0x1e   : > { %p1616_p12 = pnand %p1615_p10, %p1614_p2 }
  0x1f   : > { %p1621_p5 = por %p1620_p3, %p1619_p0 }
  0x20   : > { %p1617_p13 = pneg %p1616_p12 }
  0x22   : > { %p1622_p11 = pnand %p1621_p5, %p1617_p13 }
  0x24   : > { %1625 = shalt.err (!%p1622_p11)
}
  0x25   : > { %s1716_s6 = smov 128   ;;  %s1717_s9 = smov 8  }
  0x26   : > { %1379 = dma.hbm_to_vmem [thread:$0]  (!%p1818_p9), %s160_s17, 4096, %s162_s21, %s150_s24, %s1716_s6, %s1716_s6, %s1717_s9  }
  0x27   : > { %173 = sbr.rel (%p1783_p8) target bundleno = 587 (0x24b), region = 32  ;;  %s1835_s10 = sand.u32 (!%p1783_p8), 1, %s1703_s13  }
  0x28   : > { %s1290_s11 = sshll.u32 (!%p1783_p8), %s1835_s10, 8  ;;  %s176_s20 = scalar_lea.sflag (!%p1783_p8), [#allocation3], %s1835_s10 }
  0x29   : > { %s1841_s25 = scalar_lea.vmem (!%p1783_p8), [#allocation2], %s1290_s11 }
  0x2c   : > { %1686 = dma.done.wait (%p1770_p4), %s176_s20, 4096  }
  0x2d   : > { %1688 = vsyncadd (%p1770_p4), %s176_s20, 4294963200 }
  0x2e   : > { %1690 = dma.done.wait (%p41_p1), [#allocation6], 1024  }
  0x2f   : > { %1692 = vsyncadd (%p41_p1), [#allocation6], 4294966272  ;;  %v1338_v0 = vld [vmem:[#allocation5 + $0x38] sm:$0xff]  ;;  %v1337_v1 = vld [vmem:[#allocation5 + $0x30] sm:$0xff]  ;;  %s2183_s17 = scalar_lea.vmem [#allocation7], %s1290_s11  ;;  %s1339_s21 = sshll.u32 %s1761_s16, 8 }
  0x30   : > { %326 = vmatpush.bf16.msra.mxu0 %v1338_v0  ;;  %1340 = vmatpush.bf16.msra.mxu1 %v1338_v0  ;;  %v1336_v2 = vld [vmem:[#allocation5 + $0x28] sm:$0xff]  ;;  %v1335_v3 = vld [vmem:[#allocation5 + $0x20] sm:$0xff]  ;;  %v1334_v4 = vld [vmem:[#allocation5 + $0x18] sm:$0xff]  ;;  %s1195_s24 = scalar_lea.hbm %s2702_s3, %s1339_s21  ;;  %s1196_s27 = sshll.u32 %s2183_s17, 4  ;;  %s1197_s27 = int_to_ptr.vmem [resolvable:$true] %s1196_s27 }
  0x31   : > { %1341 = vmatpush.bf16.msra.mxu2 %v1338_v0  ;;  %1342 = vmatpush.bf16.msra.mxu3 %v1338_v0  ;;  %v1333_v5 = vld [vmem:[#allocation5 + $0x10] sm:$0xff]  ;;  %v1332_v6 = vld [vmem:[#allocation5 + $0x8] sm:$0xff]  ;;  %v1331_v7 = vld [vmem:[#allocation5] sm:$0xff]  ;;  %s1198_s28 = sshll.u32 %s1195_s24, 4  ;;  %s1184_s29 = scalar_lea.sflag [#allocation4], %s1835_s10  ;;  %s1199_s28 = int_to_ptr.hbm [resolvable:$true] %s1198_s28 }
  0x32   : > { %v1852_v8 = vld [vmem:[%s1841_s25] sm:$0xff]  ;;  %v1855_v9 = vld [vmem:[%s1841_s25 + $0x8] sm:$0xff]  ;;  %v1878_v20 = vld [vmem:[%s1841_s25 + $0x10] sm:$0xff]  ;;  %s1655_s30 = sshra.s32 %s1199_s28, 4  ;;  %s1661_s9 = scalar_lea.hbm %s2702_s3, 512  ;;  %s1656_s30 = int_to_ptr.hbm [resolvable:$true] %s1655_s30 }
  0x33   : > { %v1858_v10 = vld [vmem:[%s1841_s25 + $0x40] sm:$0xff]  ;;  %v219_v11 = vld [vmem:[%s1841_s25 + $0x48] sm:$0xff]  ;;  %v242_v16 = vpack.c.bf16 %v1855_v9, %v1852_v8  ;;  %v213_v21 = vld [vmem:[%s1841_s25 + $0x18] sm:$0xff]  ;;  %s1657_s7 = scalar_lea.hbm %s1656_s30, 256  ;;  %p1662_p11 = scmp.lt.s32.totalorder %s1656_s30, %s2702_s3 }
  0x34   : > { %327 = vmatpush.bf16.msra.mxu0 %v1337_v1  ;;  %1343 = vmatpush.bf16.msra.mxu1 %v1337_v1  ;;  %v1862_v12 = vld [vmem:[%s1841_s25 + $0x80] sm:$0xff]  ;;  %v1865_v13 = vld [vmem:[%s1841_s25 + $0x88] sm:$0xff]  ;;  %v246_v17 = vpack.c.bf16 %v219_v11, %v1858_v10  ;;  %v236_v22 = vld [vmem:[%s1841_s25 + $0xd0] sm:$0xff]  ;;  %v243_v28 = vpack.c.bf16 %v213_v21, %v1878_v20  ;;  %p1658_p1 = scmp.ne.s32.totalorder %s1656_s30, %s1657_s7  ;;  %p1663_p9 = scmp.lt.s32.totalorder %s1661_s9, %s1657_s7 }
  0x35   : > { %1344 = vmatpush.bf16.msra.mxu2 %v1337_v1  ;;  %1345 = vmatpush.bf16.msra.mxu3 %v1337_v1  ;;  %v1868_v14 = vld [vmem:[%s1841_s25 + $0xc0] sm:$0xff]  ;;  %v235_v15 = vld [vmem:[%s1841_s25 + $0xc8] sm:$0xff]  ;;  %v250_v18 = vpack.c.bf16 %v1865_v13, %v1862_v12  ;;  %v220_v23 = vld [vmem:[%s1841_s25 + $0x50] sm:$0xff] }
  0x36   : > { %v254_v19 = vpack.c.bf16 %v235_v15, %v1868_v14  ;;  %v221_v24 = vld [vmem:[%s1841_s25 + $0x58] sm:$0xff]  ;;  %v228_v26 = vld [vmem:[%s1841_s25 + $0x90] sm:$0xff]  ;;  %v214_v32 = vld [vmem:[%s1841_s25 + $0x20] sm:$0xff]  ;;  %p1659_p4 = pnand %p1658_p1, %p1807_p7  ;;  %p1664_p2 = por %p1663_p9, %p1662_p11 }
  0x37   : > { %v237_v25 = vld [vmem:[%s1841_s25 + $0xd8] sm:$0xff]  ;;  %v247_v29 = vpack.c.bf16 %v221_v24, %v220_v23  ;;  %v215_v33 = vld [vmem:[%s1841_s25 + $0x28] sm:$0xff]  ;;  %v230_v34 = vld [vmem:[%s1841_s25 + $0xa0] sm:$0xff] }
  0x38   : > { %328 = vmatpush.bf16.msra.mxu0 %v1336_v2  ;;  %1346 = vmatpush.bf16.msra.mxu1 %v1336_v2  ;;  %v229_v27 = vld [vmem:[%s1841_s25 + $0x98] sm:$0xff]  ;;  %v255_v30 = vpack.c.bf16 %v237_v25, %v236_v22  ;;  %v222_v35 = vld [vmem:[%s1841_s25 + $0x60] sm:$0xff]  ;;  %v223_v36 = vld [vmem:[%s1841_s25 + $0x68] sm:$0xff]  ;;  %v244_v40 = vpack.c.bf16 %v215_v33, %v214_v32  ;;  %p1660_p8 = pneg %p1659_p4 }
  0x39   : > { %1347 = vmatpush.bf16.msra.mxu2 %v1336_v2  ;;  %1348 = vmatpush.bf16.msra.mxu3 %v1336_v2  ;;  %v251_v31 = vpack.c.bf16 %v229_v27, %v228_v26  ;;  %v231_v37 = vld [vmem:[%s1841_s25 + $0xa8] sm:$0xff]  ;;  %v238_v38 = vld [vmem:[%s1841_s25 + $0xe0] sm:$0xff]  ;;  %v248_v41 = vpack.c.bf16 %v223_v36, %v222_v35  ;;  %v216_v44 = vld [vmem:[%s1841_s25 + $0x30] sm:$0xff] }
  0x3a   : > { %v239_v39 = vld [vmem:[%s1841_s25 + $0xe8] sm:$0xff]  ;;  %v252_v42 = vpack.c.bf16 %v231_v37, %v230_v34  ;;  %v217_v45 = vld [vmem:[%s1841_s25 + $0x38] sm:$0xff]  ;;  %v232_v46 = vld [vmem:[%s1841_s25 + $0xb0] sm:$0xff]  ;;  %p1665_p10 = pnand %p1664_p2, %p1660_p8 }
  0x3b   : > { %v256_v43 = vpack.c.bf16 %v239_v39, %v238_v38  ;;  %v224_v47 = vld [vmem:[%s1841_s25 + $0x70] sm:$0xff]  ;;  %v225_v48 = vld [vmem:[%s1841_s25 + $0x78] sm:$0xff]  ;;  %v245_v52 = vpack.c.bf16 %v217_v45, %v216_v44  ;;  %v1907_v56 = vld [vmem:[%s2701_s2] ss:$0 sm:$0xff] }
  0x3c   : > { %329 = vmatpush.bf16.msra.mxu0 %v1335_v3  ;;  %1349 = vmatpush.bf16.msra.mxu1 %v1335_v3  ;;  %v233_v49 = vld [vmem:[%s1841_s25 + $0xb8] sm:$0xff]  ;;  %v240_v50 = vld [vmem:[%s1841_s25 + $0xf0] sm:$0xff]  ;;  %v249_v53 = vpack.c.bf16 %v225_v48, %v224_v47 }
  0x3d   : > { %1350 = vmatpush.bf16.msra.mxu2 %v1335_v3  ;;  %1351 = vmatpush.bf16.msra.mxu3 %v1335_v3  ;;  %v241_v51 = vld [vmem:[%s1841_s25 + $0xf8] sm:$0xff]  ;;  %v253_v54 = vpack.c.bf16 %v233_v49, %v232_v46 }
  0x3e   : > { %v257_v55 = vpack.c.bf16 %v241_v51, %v240_v50 }
  0x40   : > { %330 = vmatpush.bf16.msra.mxu0 %v1334_v4  ;;  %1352 = vmatpush.bf16.msra.mxu1 %v1334_v4 }
  0x41   : > { %1353 = vmatpush.bf16.msra.mxu2 %v1334_v4  ;;  %1354 = vmatpush.bf16.msra.mxu3 %v1334_v4 }
  0x44   : > { %331 = vmatpush.bf16.msra.mxu0 %v1333_v5  ;;  %1355 = vmatpush.bf16.msra.mxu1 %v1333_v5 }
  0x45   : > { %1356 = vmatpush.bf16.msra.mxu2 %v1333_v5  ;;  %1357 = vmatpush.bf16.msra.mxu3 %v1333_v5 }
  0x48   : > { %332 = vmatpush.bf16.msra.mxu0 %v1332_v6  ;;  %1358 = vmatpush.bf16.msra.mxu1 %v1332_v6 }
  0x49   : > { %1359 = vmatpush.bf16.msra.mxu2 %v1332_v6  ;;  %1360 = vmatpush.bf16.msra.mxu3 %v1332_v6 }
  0x4c   : > { %333 = vmatpush.bf16.msra.mxu0 %v1331_v7  ;;  %1361 = vmatpush.bf16.msra.mxu1 %v1331_v7 }
  0x4d   : > { %1362 = vmatpush.bf16.msra.mxu2 %v1331_v7  ;;  %1363 = vmatpush.bf16.msra.mxu3 %v1331_v7 }
  0x4f   : > { %334 = vmatmul.bf16.vlgmr.msra.gmra.mxu0 %v242_v16  ;;  %354 = vmatmul.bf16.vlgmr.msra.gmra.mxu1 %v246_v17 }
  0x50   : > { %374 = vmatmul.bf16.vlgmr.msra.gmra.mxu2 %v250_v18  ;;  %394 = vmatmul.bf16.vlgmr.msra.gmra.mxu3 %v254_v19 }
  0x5f   : > { %339 = vmatmul.bf16.gmra.mxu0 %v243_v28  ;;  %359 = vmatmul.bf16.gmra.mxu1 %v247_v29 }
  0x60   : > { %399 = vmatmul.bf16.gmra.mxu3 %v255_v30  ;;  %379 = vmatmul.bf16.gmra.mxu2 %v251_v31 }
  0x6f   : > { %344 = vmatmul.bf16.gmra.mxu0 %v244_v40  ;;  %364 = vmatmul.bf16.gmra.mxu1 %v248_v41 }
  0x70   : > { %384 = vmatmul.bf16.gmra.mxu2 %v252_v42  ;;  %404 = vmatmul.bf16.gmra.mxu3 %v256_v43 }
  0x7f   : > { %349 = vmatmul.bf16.gmra.mxu0 %v245_v52  ;;  %369 = vmatmul.bf16.gmra.mxu1 %v249_v53 }
  0x80   : > { %389 = vmatmul.bf16.gmra.mxu2 %v253_v54  ;;  %409 = vmatmul.bf16.gmra.mxu3 %v257_v55 }
  0xcc   : > { %v335_v57 = vpop.f32.mrf.mxu0  ;;  %v355_v58 = vpop.f32.mrf.mxu1 }
  0xcd   : > { %v1910_v59 = vadd.f32 %v1907_v56, %v335_v57  ;;  %v1913_v60 = vadd.f32 %v1907_v56, %v355_v58 }
  0xcf   : > { %431 = vmax.xlane.f32.xlu2 %v1913_v60  ;;  %415 = vmax.xlane.f32.xlu0 %v1910_v59 }
  0xd3   : > { %v375_v61 = vpop.f32.mrf.mxu2  ;;  %v395_v62 = vpop.f32.mrf.mxu3 }
  0xd4   : > { %v1918_v63 = vadd.f32 %v1907_v56, %v375_v61  ;;  %v337_v0 = vpop.f32.mrf.mxu0  ;;  %v357_v1 = vpop.f32.mrf.mxu1  ;;  %v1921_v2 = vadd.f32 %v1907_v56, %v395_v62 }
  0xd5   : > { %v1932_v7 = vadd.f32 %v1907_v56, %v337_v0  ;;  %v1944_v21 = vadd.f32 %v1907_v56, %v357_v1 }
  0xd6   : > { %447 = vmax.xlane.f32.xlu1 %v1918_v63 }
  0xd7   : > { %463 = vmax.xlane.f32.xlu0 %v1921_v2 }
  0xdb   : > { %v377_v3 = vpop.f32.mrf.mxu2  ;;  %v397_v4 = vpop.f32.mrf.mxu3 }
  0xdc   : > { %v1926_v5 = vadd.f32 %v1907_v56, %v377_v3  ;;  %v1929_v6 = vadd.f32 %v1907_v56, %v397_v4  ;;  %v340_v11 = vpop.f32.mrf.mxu0  ;;  %v360_v15 = vpop.f32.mrf.mxu1 }
  0xdd   : > { %v1938_v16 = vadd.f32 %v1907_v56, %v340_v11  ;;  %v1950_v24 = vadd.f32 %v1907_v56, %v360_v15 }
  0xde   : > { %465 = vmax.xlane.f32.xlu1 %v1929_v6  ;;  %449 = vmax.xlane.f32.xlu2 %v1926_v5 }
  0xdf   : > { %417 = vmax.xlane.f32.xlu0 %v1932_v7 }
  0xe3   : > { %v400_v17 = vpop.f32.mrf.mxu3  ;;  %v380_v18 = vpop.f32.mrf.mxu2 }
  0xe4   : > { %v1941_v19 = vadd.f32 %v1907_v56, %v400_v17  ;;  %v342_v22 = vpop.f32.mrf.mxu0  ;;  %v362_v23 = vpop.f32.mrf.mxu1  ;;  %v1956_v26 = vadd.f32 %v1907_v56, %v380_v18 }
  0xe5   : > { %v1953_v25 = vadd.f32 %v1907_v56, %v362_v23  ;;  %v1965_v31 = vadd.f32 %v1907_v56, %v342_v22 }
  0xe6   : > { %467 = vmax.xlane.f32.xlu2 %v1941_v19  ;;  %419 = vmax.xlane.f32.xlu1 %v1938_v16 }
  0xe7   : > { %433 = vmax.xlane.f32.xlu0 %v1944_v21 }
  0xeb   : > { %v382_v27 = vpop.f32.mrf.mxu2  ;;  %v402_v29 = vpop.f32.mrf.mxu3 }
  0xec   : > { %v345_v28 = vpop.f32.mrf.mxu0  ;;  %v1968_v32 = vadd.f32 %v1907_v56, %v402_v29  ;;  %v365_v34 = vpop.f32.mrf.mxu1  ;;  %v1980_v37 = vadd.f32 %v1907_v56, %v382_v27 }
  0xed   : > { %v1962_v30 = vadd.f32 %v1907_v56, %v345_v28  ;;  %v1977_v36 = vadd.f32 %v1907_v56, %v365_v34 }
  0xee   : > { %437 = vmax.xlane.f32.xlu2 %v1953_v25  ;;  %435 = vmax.xlane.f32.xlu1 %v1950_v24 }
  0xef   : > { %451 = vmax.xlane.f32.xlu0 %v1956_v26 }
  0xf3   : > { %v385_v33 = vpop.f32.mrf.mxu2  ;;  %v405_v38 = vpop.f32.mrf.mxu3 }
  0xf4   : > { %v1974_v35 = vadd.f32 %v1907_v56, %v385_v33  ;;  %v347_v39 = vpop.f32.mrf.mxu0  ;;  %v1986_v41 = vadd.f32 %v1907_v56, %v405_v38  ;;  %v367_v44 = vpop.f32.mrf.mxu1 }
  0xf5   : > { %v1989_v42 = vadd.f32 %v1907_v56, %v347_v39  ;;  %v2004_v49 = vadd.f32 %v1907_v56, %v367_v44 }
  0xf6   : > { %423 = vmax.xlane.f32.xlu2 %v1962_v30  ;;  %421 = vmax.xlane.f32.xlu1 %v1965_v31 }
  0xf7   : > { %469 = vmax.xlane.f32.xlu0 %v1968_v32 }
  0xfb   : > { %v387_v40 = vpop.f32.mrf.mxu2  ;;  %v407_v45 = vpop.f32.mrf.mxu3 }
  0xfc   : > { %v1992_v43 = vadd.f32 %v1907_v56, %v387_v40  ;;  %v350_v46 = vpop.f32.mrf.mxu0  ;;  %v1998_v47 = vadd.f32 %v1907_v56, %v407_v45  ;;  %v370_v51 = vpop.f32.mrf.mxu1 }
  0xfd   : > { %v2001_v48 = vadd.f32 %v1907_v56, %v350_v46  ;;  %v2010_v52 = vadd.f32 %v1907_v56, %v370_v51 }
  0xfe   : > { %455 = vmax.xlane.f32.xlu2 %v1974_v35  ;;  %453 = vmax.xlane.f32.xlu1 %v1980_v37 }
  0xff   : > { %439 = vmax.xlane.f32.xlu0 %v1977_v36 }
 0x103   : > { %v390_v50 = vpop.f32.mrf.mxu2  ;;  %v410_v54 = vpop.f32.mrf.mxu3 }
 0x104   : > { %v2013_v53 = vadd.f32 %v1907_v56, %v390_v50  ;;  %v2016_v55 = vadd.f32 %v1907_v56, %v410_v54  ;;  %v352_v58 = vpop.f32.mrf.mxu0  ;;  %v372_v61 = vpop.f32.mrf.mxu1 }
 0x105   : > { %v2025_v0 = vadd.f32 %v1907_v56, %v352_v58  ;;  %v2028_v1 = vadd.f32 %v1907_v56, %v372_v61 }
 0x106   : > { %425 = vmax.xlane.f32.xlu2 %v1989_v42  ;;  %471 = vmax.xlane.f32.xlu1 %v1986_v41 }
 0x107   : > { %457 = vmax.xlane.f32.xlu0 %v1992_v43 }
 0x10b   : > { %v392_v57 = vpop.f32.mrf.mxu2  ;;  %v412_v3 = vpop.f32.mrf.mxu3 }
 0x10c   : > { %v2022_v62 = vadd.f32 %v1907_v56, %v392_v57  ;;  %v2034_v4 = vadd.f32 %v1907_v56, %v412_v3 }
 0x10e   : > { %473 = vmax.xlane.f32.xlu2 %v1998_v47  ;;  %441 = vmax.xlane.f32.xlu1 %v2004_v49 }
 0x10f   : > { %427 = vmax.xlane.f32.xlu0 %v2001_v48 }
 0x116   : > { %443 = vmax.xlane.f32.xlu2 %v2010_v52  ;;  %459 = vmax.xlane.f32.xlu1 %v2013_v53 }
 0x117   : > { %475 = vmax.xlane.f32.xlu0 %v2016_v55 }
 0x11e   : > { %461 = vmax.xlane.f32.xlu2 %v2022_v62  ;;  %429 = vmax.xlane.f32.xlu1 %v2025_v0 }
 0x11f   : > { %445 = vmax.xlane.f32.xlu0 %v2028_v1 }
 0x126   : > { %477 = vmax.xlane.f32.xlu1 %v2034_v4 }
 0x142   : > { %v432_v11 = vpop.xlane.xlu2 %431  ;;  %v416_v15 = vpop.xlane.xlu0 %415 }
 0x143   : > { %v487_v17 = vsub.f32 %v1913_v60, %v432_v11  ;;  %v479_v18 = vsub.f32 %v1910_v59, %v416_v15 }
 0x145   : > { %v527_v22 = vmul.f32 1.442695, %v487_v17  ;;  %v511_v23 = vmul.f32 1.442695, %v479_v18 }
 0x147   : > { %1428 = vpow2.f32 %v527_v22 }
 0x148   : > { %1430 = vpow2.f32 %v511_v23 }
 0x149   : > { %v448_v27 = vpop.xlane.xlu1 %447 }
 0x14a   : > { %v495_v28 = vsub.f32 %v1918_v63, %v448_v27  ;;  %v464_v29 = vpop.xlane.xlu0 %463 }
 0x14b   : > { %v503_v33 = vsub.f32 %v1921_v2, %v464_v29 }
 0x14c   : > { %v543_v56 = vmul.f32 1.442695, %v495_v28 }
 0x14d   : > { %v2041_v34 = vpop.eup %1428  ;;  %v559_v38 = vmul.f32 1.442695, %v503_v33 }
 0x14e   : > { %v2043_v39 = vpop.eup %1430  ;;  %1432 = vpow2.f32 %v543_v56  ;;  %591 = vadd.xlane.f32.xlu1 %v2041_v34 }
 0x14f   : > { %1434 = vpow2.f32 %v559_v38  ;;  %575 = vadd.xlane.f32.xlu2 %v2043_v39 }
 0x151   : > { %v466_v59 = vpop.xlane.xlu1 %465  ;;  %v450_v60 = vpop.xlane.xlu2 %449 }
 0x152   : > { %v496_v40 = vsub.f32 %v1926_v5, %v450_v60  ;;  %v418_v63 = vpop.xlane.xlu0 %417  ;;  %v504_v51 = vsub.f32 %v1929_v6, %v466_v59 }
 0x153   : > { %v480_v44 = vsub.f32 %v1932_v7, %v418_v63 }
 0x154   : > { %v2049_v2 = vpop.eup %1432  ;;  %v545_v45 = vmul.f32 1.442695, %v496_v40  ;;  %v561_v5 = vmul.f32 1.442695, %v504_v51 }
 0x155   : > { %v2051_v46 = vpop.eup %1434  ;;  %v513_v50 = vmul.f32 1.442695, %v480_v44  ;;  %607 = vadd.xlane.f32.xlu0 %v2049_v2 }
 0x156   : > { %1436 = vpow2.f32 %v545_v45 }
 0x157   : > { %623 = vadd.xlane.f32.xlu2 %v2051_v46  ;;  %1438 = vpow2.f32 %v513_v50 }
 0x158   : > { %1440 = vpow2.f32 %v561_v5 }
 0x159   : > { %v468_v54 = vpop.xlane.xlu2 %467  ;;  %v420_v57 = vpop.xlane.xlu1 %419 }
 0x15a   : > { %v481_v58 = vsub.f32 %v1938_v16, %v420_v57  ;;  %v434_v7 = vpop.xlane.xlu0 %433  ;;  %v505_v6 = vsub.f32 %v1941_v19, %v468_v54 }
 0x15b   : > { %v488_v61 = vsub.f32 %v1944_v21, %v434_v7 }
 0x15c   : > { %v515_v3 = vmul.f32 1.442695, %v481_v58  ;;  %v2058_v11 = vpop.eup %1436  ;;  %v563_v22 = vmul.f32 1.442695, %v505_v6 }
 0x15d   : > { %v529_v15 = vmul.f32 1.442695, %v488_v61  ;;  %v2060_v17 = vpop.eup %1438  ;;  %609 = vadd.xlane.f32.xlu1 %v2058_v11 }
 0x15e   : > { %1442 = vpow2.f32 %v515_v3  ;;  %577 = vadd.xlane.f32.xlu0 %v2060_v17  ;;  %v2067_v28 = vpop.eup %1440 }
 0x15f   : > { %1444 = vpow2.f32 %v529_v15 }
 0x160   : > { %1446 = vpow2.f32 %v563_v22 }
 0x161   : > { %v438_v18 = vpop.xlane.xlu2 %437  ;;  %v436_v16 = vpop.xlane.xlu1 %435 }
 0x162   : > { %v489_v21 = vsub.f32 %v1950_v24, %v436_v16  ;;  %v452_v23 = vpop.xlane.xlu0 %451  ;;  %v490_v38 = vsub.f32 %v1953_v25, %v438_v18 }
 0x163   : > { %v497_v27 = vsub.f32 %v1956_v26, %v452_v23 }
 0x164   : > { %v531_v29 = vmul.f32 1.442695, %v489_v21  ;;  %v2069_v33 = vpop.eup %1442  ;;  %v533_v40 = vmul.f32 1.442695, %v490_v38 }
 0x165   : > { %v547_v19 = vmul.f32 1.442695, %v497_v27  ;;  %v2071_v56 = vpop.eup %1444  ;;  %579 = vadd.xlane.f32.xlu1 %v2069_v33 }
 0x166   : > { %1448 = vpow2.f32 %v531_v29  ;;  %625 = vadd.xlane.f32.xlu0 %v2067_v28  ;;  %593 = vadd.xlane.f32.xlu2 %v2071_v56  ;;  %v2078_v63 = vpop.eup %1446 }
 0x167   : > { %1450 = vpow2.f32 %v547_v19 }
 0x168   : > { %1452 = vpow2.f32 %v533_v40 }
 0x169   : > { %v424_v24 = vpop.xlane.xlu2 %423  ;;  %v422_v26 = vpop.xlane.xlu1 %421 }
 0x16a   : > { %v482_v59 = vsub.f32 %v1965_v31, %v422_v26  ;;  %v470_v60 = vpop.xlane.xlu0 %469  ;;  %v483_v6 = vsub.f32 %v1962_v30, %v424_v24 }
 0x16b   : > { %v506_v25 = vsub.f32 %v1968_v32, %v470_v60 }
 0x16c   : > { %v517_v44 = vmul.f32 1.442695, %v482_v59  ;;  %v2080_v45 = vpop.eup %1448  ;;  %v519_v22 = vmul.f32 1.442695, %v483_v6 }
 0x16d   : > { %v2082_v50 = vpop.eup %1450  ;;  %627 = vadd.xlane.f32.xlu1 %v2078_v63  ;;  %v565_v58 = vmul.f32 1.442695, %v506_v25 }
 0x16e   : > { %595 = vadd.xlane.f32.xlu0 %v2080_v45  ;;  %611 = vadd.xlane.f32.xlu2 %v2082_v50  ;;  %1454 = vpow2.f32 %v517_v44  ;;  %v2090_v3 = vpop.eup %1452 }
 0x171   : > { %v456_v31 = vpop.xlane.xlu2 %455  ;;  %v454_v51 = vpop.xlane.xlu1 %453 }
 0x172   : > { %v499_v54 = vsub.f32 %v1974_v35, %v456_v31  ;;  %v498_v57 = vsub.f32 %v1980_v37, %v454_v51  ;;  %v440_v5 = vpop.xlane.xlu0 %439 }
 0x173   : > { %v491_v32 = vsub.f32 %v1977_v36, %v440_v5 }
 0x174   : > { %v551_v7 = vmul.f32 1.442695, %v499_v54  ;;  %v549_v61 = vmul.f32 1.442695, %v498_v57  ;;  %v2092_v15 = vpop.eup %1454 }
 0x175   : > { %597 = vadd.xlane.f32.xlu1 %v2090_v3  ;;  %v535_v23 = vmul.f32 1.442695, %v491_v32 }
 0x176   : > { %1456 = vpow2.f32 %v551_v7  ;;  %581 = vadd.xlane.f32.xlu2 %v2092_v15 }
 0x177   : > { %1458 = vpow2.f32 %v549_v61 }
 0x178   : > { %1460 = vpow2.f32 %v565_v58 }
 0x179   : > { %v426_v35 = vpop.xlane.xlu2 %425  ;;  %v472_v37 = vpop.xlane.xlu1 %471 }
 0x17a   : > { %v484_v18 = vsub.f32 %v1989_v42, %v426_v35  ;;  %v458_v16 = vpop.xlane.xlu0 %457  ;;  %v507_v30 = vsub.f32 %v1986_v41, %v472_v37 }
 0x17b   : > { %v500_v36 = vsub.f32 %v1992_v43, %v458_v16 }
 0x17c   : > { %v2099_v21 = vpop.eup %1456  ;;  %v521_v27 = vmul.f32 1.442695, %v484_v18  ;;  %v567_v26 = vmul.f32 1.442695, %v507_v30 }
 0x17d   : > { %v2101_v29 = vpop.eup %1458  ;;  %615 = vadd.xlane.f32.xlu1 %v2099_v21  ;;  %v553_v60 = vmul.f32 1.442695, %v500_v36 }
 0x17e   : > { %v2103_v19 = vpop.eup %1460  ;;  %1462 = vpow2.f32 %v521_v27  ;;  %613 = vadd.xlane.f32.xlu0 %v2101_v29 }
 0x17f   : > { %1464 = vpow2.f32 %v519_v22  ;;  %629 = vadd.xlane.f32.xlu2 %v2103_v19 }
 0x180   : > { %1466 = vpow2.f32 %v535_v23 }
 0x181   : > { %v474_v42 = vpop.xlane.xlu2 %473  ;;  %v442_v38 = vpop.xlane.xlu1 %441  ;;  %1468 = vpow2.f32 %v567_v26 }
 0x182   : > { %v428_v24 = vpop.xlane.xlu0 %427  ;;  %v492_v41 = vsub.f32 %v2004_v49, %v442_v38  ;;  %1470 = vpow2.f32 %v553_v60  ;;  %v508_v27 = vsub.f32 %v1998_v47, %v474_v42 }
 0x183   : > { %v485_v43 = vsub.f32 %v2001_v48, %v428_v24 }
 0x184   : > { %v2110_v59 = vpop.eup %1462  ;;  %v537_v57 = vmul.f32 1.442695, %v492_v41  ;;  %v569_v30 = vmul.f32 1.442695, %v508_v27 }
 0x185   : > { %v2112_v40 = vpop.eup %1464  ;;  %585 = vadd.xlane.f32.xlu1 %v2110_v59  ;;  %v523_v5 = vmul.f32 1.442695, %v485_v43 }
 0x186   : > { %v2114_v44 = vpop.eup %1466  ;;  %583 = vadd.xlane.f32.xlu0 %v2112_v40 }
 0x187   : > { %599 = vadd.xlane.f32.xlu2 %v2114_v44  ;;  %v2122_v7 = vpop.eup %1468 }
 0x188   : > { %v2124_v61 = vpop.eup %1470 }
 0x189   : > { %v444_v25 = vpop.xlane.xlu2 %443  ;;  %v460_v31 = vpop.xlane.xlu1 %459 }
 0x18a   : > { %v493_v51 = vsub.f32 %v2010_v52, %v444_v25  ;;  %v476_v54 = vpop.xlane.xlu0 %475  ;;  %v501_v49 = vsub.f32 %v2013_v53, %v460_v31 }
 0x18c   : > { %v539_v58 = vmul.f32 1.442695, %v493_v51  ;;  %v555_v35 = vmul.f32 1.442695, %v501_v49 }
 0x18e   : > { %1472 = vpow2.f32 %v539_v58  ;;  %631 = vadd.xlane.f32.xlu0 %v2122_v7 }
 0x18f   : > { %1474 = vpow2.f32 %v537_v57  ;;  %617 = vadd.xlane.f32.xlu2 %v2124_v61 }
 0x190   : > { %1476 = vpow2.f32 %v523_v5 }
 0x191   : > { %v462_v48 = vpop.xlane.xlu2 %461  ;;  %v430_v6 = vpop.xlane.xlu1 %429 }
 0x192   : > { %v502_v52 = vsub.f32 %v2022_v62, %v462_v48  ;;  %v446_v32 = vpop.xlane.xlu0 %445  ;;  %v486_v62 = vsub.f32 %v2025_v0, %v430_v6 }
 0x193   : > { %v494_v37 = vsub.f32 %v2028_v1, %v446_v32  ;;  %v509_v1 = vsub.f32 %v2016_v55, %v476_v54 }
 0x194   : > { %v2131_v18 = vpop.eup %1472  ;;  %v557_v16 = vmul.f32 1.442695, %v502_v52  ;;  %v525_v36 = vmul.f32 1.442695, %v486_v62 }
 0x195   : > { %v2133_v22 = vpop.eup %1474  ;;  %v541_v23 = vmul.f32 1.442695, %v494_v37  ;;  %603 = vadd.xlane.f32.xlu1 %v2131_v18  ;;  %v571_v24 = vmul.f32 1.442695, %v509_v1 }
 0x196   : > { %v2136_v53 = vpop.eup %1476  ;;  %1478 = vpow2.f32 %v557_v16  ;;  %601 = vadd.xlane.f32.xlu0 %v2133_v22 }
 0x197   : > { %1480 = vpow2.f32 %v555_v35  ;;  %587 = vadd.xlane.f32.xlu2 %v2136_v53 }
 0x198   : > { %1482 = vpow2.f32 %v541_v23 }
 0x199   : > { %v478_v26 = vpop.xlane.xlu1 %477  ;;  %1484 = vpow2.f32 %v569_v30 }
 0x19a   : > { %1486 = vpow2.f32 %v525_v36  ;;  %v510_v0 = vsub.f32 %v2034_v4, %v478_v26 }
 0x19b   : > { %1488 = vpow2.f32 %v571_v24 }
 0x19c   : > { %v2143_v38 = vpop.eup %1478  ;;  %v573_v55 = vmul.f32 1.442695, %v510_v0 }
 0x19d   : > { %v2145_v60 = vpop.eup %1480  ;;  %621 = vadd.xlane.f32.xlu1 %v2143_v38 }
 0x19e   : > { %v2148_v47 = vpop.eup %1482  ;;  %619 = vadd.xlane.f32.xlu0 %v2145_v60  ;;  %1490 = vpow2.f32 %v573_v55 }
 0x19f   : > { %605 = vadd.xlane.f32.xlu2 %v2148_v47  ;;  %v2153_v42 = vpop.eup %1484 }
 0x1a0   : > { %v2155_v41 = vpop.eup %1486 }
 0x1a1   : > { %v2158_v43 = vpop.eup %1488 }
 0x1a4   : > { %v2162_v25 = vpop.eup %1490 }
 0x1a5   : > { %633 = vadd.xlane.f32.xlu1 %v2153_v42 }
 0x1a6   : > { %589 = vadd.xlane.f32.xlu0 %v2155_v41 }
 0x1a7   : > { %635 = vadd.xlane.f32.xlu2 %v2158_v43 }
 0x1ae   : > { %637 = vadd.xlane.f32.xlu0 %v2162_v25 }
 0x1c1   : > { %v592_v4 = vpop.xlane.xlu1 %591 }
 0x1c2   : > { %1492 = vrcp.f32 %v592_v4  ;;  %v576_v31 = vpop.xlane.xlu2 %575  ;;  %v768_v52 = vand.u32 2147483647, %v592_v4  ;;  %v770_v6 = vand.u32 2147483648, %v592_v4  ;;  %vm764_vm2 = vweird.f32 %v592_v4 }
 0x1c3   : > { %1494 = vrcp.f32 %v576_v31  ;;  %v648_v35 = vand.u32 2147483647, %v576_v31  ;;  %v650_v16 = vand.u32 2147483648, %v576_v31  ;;  %vm644_vm4 = vweird.f32 %v576_v31 }
 0x1c4   : > { %vm769_vm3 = vcmp.eq.f32.partialorder %v768_v52, 8.507059e+37  ;;  %v771_v1 = vor.u32 1.1754944e-38, %v770_v6 }
 0x1c5   : > { %vm649_vm6 = vcmp.eq.f32.partialorder %v648_v35, 8.507059e+37  ;;  %v651_v0 = vor.u32 1.1754944e-38, %v650_v16 }
 0x1c8   : > { %v1493_v51 = vpop.eup %1492  ;;  %v608_v54 = vpop.xlane.xlu0 %607 }
 0x1c9   : > { %v1495_v57 = vpop.eup %1494  ;;  %v760_v5 = vmul.f32 %v1493_v51, %v592_v4  ;;  %1496 = vrcp.f32 %v608_v54  ;;  %vm765_vm0 = vweird.f32 %v1493_v51  ;;  %vm884_vm8 = vweird.f32 %v608_v54 }
 0x1ca   : > { %v640_v58 = vmul.f32 %v1495_v57, %v576_v31  ;;  %v2165_v49 = vpop.xlane.xlu2 %623  ;;  %vm645_vm1 = vweird.f32 %v1495_v57  ;;  %vm766_vm5 = vmor %vm764_vm2, %vm765_vm0  ;;  %v888_v55 = vand.u32 2147483647, %v608_v54  ;;  %v890_v35 = vand.u32 2147483648, %v608_v54 }
 0x1cb   : > { %v761_v48 = vsub.f32 1.0, %v760_v5  ;;  %1498 = vrcp.f32 %v2165_v49  ;;  %vm646_vm7 = vmor %vm644_vm4, %vm645_vm1  ;;  %vm1004_vm13 = vweird.f32 %v2165_v49 }
 0x1cc   : > { %v641_v32 = vsub.f32 1.0, %v640_v58  ;;  %vm889_vm12 = vcmp.eq.f32.partialorder %v888_v55, 8.507059e+37 }
 0x1cd   : > { %v762_v37 = vmul.f32 %v1493_v51, %v761_v48 }
 0x1ce   : > { %v642_v23 = vmul.f32 %v1495_v57, %v641_v32 }
 0x1cf   : > { %v1497_v27 = vpop.eup %1496  ;;  %v763_v62 = vadd.f32 %v1493_v51, %v762_v37 }
 0x1d0   : > { %v643_v30 = vadd.f32 %v1495_v57, %v642_v23  ;;  %v880_v36 = vmul.f32 %v1497_v27, %v608_v54  ;;  %v2168_v5 = vpop.xlane.xlu1 %609  ;;  %vm885_vm9 = vweird.f32 %v1497_v27 }
 0x1d1   : > { %v1499_v24 = vpop.eup %1498  ;;  %v767_v26 = vsel %vm766_vm5, %v1493_v51, %v763_v62  ;;  %v2171_v52 = vpop.xlane.xlu0 %577  ;;  %1500 = vrcp.f32 %v2168_v5  ;;  %v1010_v62 = vand.u32 2147483648, %v2165_v49  ;;  %vm886_vm11 = vmor %vm884_vm8, %vm885_vm9  ;;  %vm899_vm1 = vweird.f32 %v2168_v5 }
 0x1d2   : > { %v772_v58 = vsel %vm769_vm3, %v771_v1, %v767_v26  ;;  %v647_v48 = vsel %vm646_vm7, %v1495_v57, %v643_v30  ;;  %v881_v32 = vsub.f32 1.0, %v880_v36  ;;  %v1000_v4 = vmul.f32 %v1499_v24, %v2165_v49 }
 0x1d3   : > { %v773_v31 = vmul.f32 %v2041_v34, %v772_v58  ;;  %v652_v6 = vsel %vm649_vm6, %v651_v0, %v647_v48  ;;  %v1008_v57 = vand.u32 2147483647, %v2165_v49  ;;  %1502 = vrcp.f32 %v2171_v52 }
 0x1d4   : > { %v653_v51 = vmul.f32 %v2043_v39, %v652_v6  ;;  %v882_v37 = vmul.f32 %v1497_v27, %v881_v32  ;;  %v1001_v16 = vsub.f32 1.0, %v1000_v4  ;;  %vm1005_vm10 = vweird.f32 %v1499_v24 }
 0x1d5   : > { %v1127_v23 = vmul.f32 %v773_v31, %v1858_v10  ;;  %v891_v10 = vor.u32 1.1754944e-38, %v890_v35  ;;  %vm1006_vm14 = vmor %vm1004_vm13, %vm1005_vm10  ;;  %v1011_v0 = vor.u32 1.1754944e-38, %v1010_v62  ;;  %vm1009_vm15 = vcmp.eq.f32.partialorder %v1008_v57, 8.507059e+37 }
 0x1d6   : > { %v1119_v34 = vmul.f32 %v653_v51, %v1852_v8  ;;  %v883_v1 = vadd.f32 %v1497_v27, %v882_v37  ;;  %v1002_v30 = vmul.f32 %v1499_v24, %v1001_v16  ;;  %v903_v31 = vand.u32 2147483647, %v2168_v5 }
 0x1d7   : > { %1159 = vst [vmem:[%s2183_s17 + $0x40] sm:$0xff] %v1127_v23  ;;  %v1501_v26 = vpop.eup %1500  ;;  %v905_v49 = vand.u32 2147483648, %v2168_v5  ;;  %v663_v37 = vand.u32 2147483647, %v2171_v52  ;;  %v665_v16 = vand.u32 2147483648, %v2171_v52  ;;  %vm659_vm2 = vweird.f32 %v2171_v52 }
 0x1d8   : > { %1151 = vst [vmem:[%s2183_s17] sm:$0xff] %v1119_v34  ;;  %v887_v39 = vsel %vm886_vm11, %v1497_v27, %v883_v1  ;;  %v1003_v36 = vadd.f32 %v1499_v24, %v1002_v30  ;;  %v2189_v58 = vpop.xlane.xlu1 %579  ;;  %v895_v54 = vmul.f32 %v1501_v26, %v2168_v5  ;;  %vm900_vm0 = vweird.f32 %v1501_v26 }
 0x1d9   : > { %v892_v8 = vsel %vm889_vm12, %v891_v10, %v887_v39  ;;  %v2193_v4 = vpop.xlane.xlu2 %593  ;;  %v1503_v27 = vpop.eup %1502  ;;  %1504 = vrcp.f32 %v2189_v58  ;;  %vm2213_vm3 = vcmp.eq.f32.partialorder %v903_v31, 8.507059e+37  ;;  %vm901_vm5 = vmor %vm899_vm1, %vm900_vm0  ;;  %vm2218_vm6 = vcmp.eq.f32.partialorder %v663_v37, 8.507059e+37 }
 0x1da   : > { %v893_v48 = vmul.f32 %v2049_v2, %v892_v8  ;;  %v1007_v32 = vsel %vm1006_vm14, %v1499_v24, %v1003_v36  ;;  %v896_v2 = vsub.f32 1.0, %v895_v54  ;;  %v655_v24 = vmul.f32 %v1503_v27, %v2171_v52  ;;  %v2201_v51 = vpop.xlane.xlu0 %625 }
 0x1db   : > { %v1012_v55 = vsel %vm1009_vm15, %v1011_v0, %v1007_v32  ;;  %1506 = vrcp.f32 %v2193_v4  ;;  %vm660_vm4 = vweird.f32 %v1503_v27  ;;  %v666_v5 = vor.u32 1.1754944e-38, %v665_v16 }
 0x1dc   : > { %v1135_v6 = vmul.f32 %v893_v48, %v1862_v12  ;;  %v1013_v35 = vmul.f32 %v2051_v46, %v1012_v55  ;;  %v897_v57 = vmul.f32 %v1501_v26, %v896_v2  ;;  %v656_v12 = vsub.f32 1.0, %v655_v24  ;;  %vm661_vm9 = vmor %vm659_vm2, %vm660_vm4 }
 0x1dd   : > { %v678_v46 = vand.u32 2147483647, %v2189_v58  ;;  %1508 = vrcp.f32 %v2201_v51  ;;  %vm674_vm7 = vweird.f32 %v2189_v58  ;;  %v680_v32 = vand.u32 2147483648, %v2189_v58 }
 0x1de   : > { %1167 = vst [vmem:[%s2183_s17 + $0x80] sm:$0xff] %v1135_v6  ;;  %v1143_v23 = vmul.f32 %v1013_v35, %v1868_v14  ;;  %v898_v62 = vadd.f32 %v1501_v26, %v897_v57  ;;  %v657_v1 = vmul.f32 %v1503_v27, %v656_v12  ;;  %v906_v14 = vor.u32 1.1754944e-38, %v905_v49 }
 0x1df   : > { %v1505_v30 = vpop.eup %1504  ;;  %vm2226_vm8 = vcmp.eq.f32.partialorder %v678_v46, 8.507059e+37  ;;  %vm779_vm10 = vweird.f32 %v2193_v4  ;;  %v785_v52 = vand.u32 2147483648, %v2193_v4  ;;  %v1023_v37 = vand.u32 2147483647, %v2201_v51 }
 0x1e0   : > { %1175 = vst [vmem:[%s2183_s17 + $0xc0] sm:$0xff] %v1143_v23  ;;  %v2223_v39 = vpop.xlane.xlu1 %627  ;;  %v902_v36 = vsel %vm901_vm5, %v1501_v26, %v898_v62  ;;  %v658_v8 = vadd.f32 %v1503_v27, %v657_v1  ;;  %v670_v0 = vmul.f32 %v1505_v30, %v2189_v58  ;;  %v783_v26 = vand.u32 2147483647, %v2193_v4 }
 0x1e1   : > { %v1507_v54 = vpop.eup %1506  ;;  %v907_v55 = vsel %vm2213_vm3, %v906_v14, %v902_v36  ;;  %1510 = vrcp.f32 %v2223_v39  ;;  %vm675_vm11 = vweird.f32 %v1505_v30  ;;  %v2245_v16 = vpop.xlane.xlu2 %611  ;;  %v681_v12 = vor.u32 1.1754944e-38, %v680_v32 }
 0x1e2   : > { %v908_v31 = vmul.f32 %v2058_v11, %v907_v55  ;;  %v662_v49 = vsel %vm661_vm9, %v1503_v27, %v658_v8  ;;  %v671_v6 = vsub.f32 1.0, %v670_v0  ;;  %v775_v35 = vmul.f32 %v1507_v54, %v2193_v4  ;;  %vm676_vm14 = vmor %vm674_vm7, %vm675_vm11  ;;  %v2262_v36 = vpop.xlane.xlu0 %595 }
 0x1e3   : > { %v1509_v2 = vpop.eup %1508  ;;  %v667_v24 = vsel %vm2218_vm6, %v666_v5, %v662_v49  ;;  %vm780_vm12 = vweird.f32 %v1507_v54  ;;  %vm1019_vm13 = vweird.f32 %v2201_v51  ;;  %1512 = vrcp.f32 %v2245_v16 }
 0x1e4   : > { %v1136_v23 = vmul.f32 %v908_v31, %v1865_v13  ;;  %v668_v11 = vmul.f32 %v2060_v17, %v667_v24  ;;  %v672_v27 = vmul.f32 %v1505_v30, %v671_v6  ;;  %v776_v57 = vsub.f32 1.0, %v775_v35  ;;  %vm781_vm1 = vmor %vm779_vm10, %vm780_vm12 }
 0x1e5   : > { %v1015_v46 = vmul.f32 %v1509_v2, %v2201_v51  ;;  %vm2257_vm15 = vcmp.eq.f32.partialorder %v783_v26, 8.507059e+37  ;;  %v786_v17 = vor.u32 1.1754944e-38, %v785_v52  ;;  %v1025_v5 = vand.u32 2147483648, %v2201_v51 }
 0x1e6   : > { %1168 = vst [vmem:[%s2183_s17 + $0x88] sm:$0xff] %v1136_v23  ;;  %v1120_v62 = vmul.f32 %v668_v11, %v1855_v9  ;;  %v673_v34 = vadd.f32 %v1505_v30, %v672_v27  ;;  %v777_v1 = vmul.f32 %v1507_v54, %v776_v57  ;;  %vm2267_vm0 = vcmp.eq.f32.partialorder %v1023_v37, 8.507059e+37  ;;  %v1556_v57 = vld [vmem:[%s1841_s25 + $0x48] sm:$0xff] }
 0x1e7   : > { %v1511_v14 = vpop.eup %1510  ;;  %v1016_v10 = vsub.f32 1.0, %v1015_v46  ;;  %vm1020_vm2 = vweird.f32 %v1509_v2  ;;  %v1038_v31 = vand.u32 2147483647, %v2223_v39  ;;  %1514 = vrcp.f32 %v2262_v36 }
 0x1e8   : > { %v2264_v9 = vpop.xlane.xlu1 %597  ;;  %1152 = vst [vmem:[%s2183_s17 + $0x8] sm:$0xff] %v1120_v62  ;;  %v677_v8 = vsel %vm676_vm14, %v1505_v30, %v673_v34  ;;  %v778_v0 = vadd.f32 %v1507_v54, %v777_v1  ;;  %v1030_v58 = vmul.f32 %v1511_v14, %v2223_v39  ;;  %v1026_v24 = vor.u32 1.1754944e-38, %v1025_v5  ;;  %vm1021_vm3 = vmor %vm1019_vm13, %vm1020_vm2 }
 0x1e9   : > { %v682_v55 = vsel %vm2226_vm8, %v681_v12, %v677_v8  ;;  %v1017_v26 = vmul.f32 %v1509_v2, %v1016_v10  ;;  %v1040_v4 = vand.u32 2147483648, %v2223_v39  ;;  %v1513_v52 = vpop.eup %1512  ;;  %vm1035_vm4 = vweird.f32 %v1511_v14 }
 0x1ea   : > { %v683_v30 = vmul.f32 %v2069_v33, %v682_v55  ;;  %v782_v49 = vsel %vm781_vm1, %v1507_v54, %v778_v0  ;;  %v1031_v6 = vsub.f32 1.0, %v1030_v58  ;;  %vm1034_vm5 = vweird.f32 %v2223_v39 }
 0x1eb   : > { %v787_v48 = vsel %vm2257_vm15, %v786_v17, %v782_v49  ;;  %v1018_v35 = vadd.f32 %v1509_v2, %v1017_v26  ;;  %vm2288_vm6 = vcmp.eq.f32.partialorder %v1038_v31, 8.507059e+37  ;;  %v910_v27 = vmul.f32 %v1513_v52, %v2245_v16  ;;  %vm1036_vm7 = vmor %vm1034_vm5, %vm1035_vm4  ;;  %v1557_v17 = vld [vmem:[%s1841_s25 + $0xc8] sm:$0xff]  ;;  %v1558_v49 = vld [vmem:[%s1841_s25 + $0xd0] sm:$0xff] }
 0x1ec   : > { %v1121_v37 = vmul.f32 %v683_v30, %v1878_v20  ;;  %v788_v23 = vmul.f32 %v2071_v56, %v787_v48  ;;  %v1032_v33 = vmul.f32 %v1511_v14, %v1031_v6  ;;  %v918_v12 = vand.u32 2147483647, %v2245_v16 }
 0x1ed   : > { %v1022_v54 = vsel %vm1021_vm3, %v1509_v2, %v1018_v35  ;;  %v2298_v2 = vpop.xlane.xlu2 %581  ;;  %v1041_v46 = vor.u32 1.1754944e-38, %v1040_v4  ;;  %v911_v62 = vsub.f32 1.0, %v910_v27  ;;  %1516 = vrcp.f32 %v2264_v9  ;;  %v1515_v34 = vpop.eup %1514 }
 0x1ee   : > { %1153 = vst [vmem:[%s2183_s17 + $0x10] sm:$0xff] %v1121_v37  ;;  %v1128_v20 = vmul.f32 %v1556_v57, %v788_v23  ;;  %v1027_v56 = vsel %vm2267_vm0, %v1026_v24, %v1022_v54  ;;  %v1033_v51 = vadd.f32 %v1511_v14, %v1032_v33  ;;  %vm914_vm8 = vweird.f32 %v2245_v16 }
 0x1ef   : > { %v1028_v39 = vmul.f32 %v2067_v28, %v1027_v56  ;;  %vm915_vm9 = vweird.f32 %v1513_v52  ;;  %v920_v13 = vand.u32 2147483648, %v2245_v16  ;;  %v912_v5 = vmul.f32 %v1513_v52, %v911_v62 }
 0x1f0   : > { %1160 = vst [vmem:[%s2183_s17 + $0x48] sm:$0xff] %v1128_v20  ;;  %v1037_v1 = vsel %vm1036_vm7, %v1511_v14, %v1033_v51  ;;  %v790_v8 = vmul.f32 %v1515_v34, %v2262_v36  ;;  %v2309_v0 = vpop.xlane.xlu1 %615  ;;  %vm2312_vm10 = vcmp.eq.f32.partialorder %v918_v12, 8.507059e+37  ;;  %v798_v58 = vand.u32 2147483647, %v2262_v36  ;;  %vm916_vm11 = vmor %vm914_vm8, %vm915_vm9  ;;  %v1559_v12 = vld [vmem:[%s1841_s25 + $0x90] sm:$0xff] }
 0x1f1   : > { %v1144_v10 = vmul.f32 %v1557_v17, %v1028_v39  ;;  %v1042_v28 = vsel %vm2288_vm6, %v1041_v46, %v1037_v1  ;;  %v800_v55 = vand.u32 2147483648, %v2262_v36  ;;  %v913_v26 = vadd.f32 %v1513_v52, %v912_v5  ;;  %v2327_v48 = vpop.xlane.xlu0 %613 }
 0x1f2   : > { %v1043_v32 = vmul.f32 %v2078_v63, %v1042_v28  ;;  %v791_v31 = vsub.f32 1.0, %v790_v8  ;;  %v813_v30 = vand.u32 2147483647, %v2264_v9  ;;  %1518 = vrcp.f32 %v2298_v2 }
 0x1f3   : > { %1176 = vst [vmem:[%s2183_s17 + $0xc8] sm:$0xff] %v1144_v10  ;;  %v921_v63 = vor.u32 1.1754944e-38, %v920_v13  ;;  %vm794_vm12 = vweird.f32 %v2262_v36  ;;  %1520 = vrcp.f32 %v2309_v0  ;;  %v1517_v35 = vpop.eup %1516  ;;  %v917_v24 = vsel %vm916_vm11, %v1513_v52, %v913_v26 }
 0x1f4   : > { %v1145_v6 = vmul.f32 %v1558_v49, %v1043_v32  ;;  %v792_v4 = vmul.f32 %v1515_v34, %v791_v31  ;;  %vm795_vm13 = vweird.f32 %v1515_v34  ;;  %v815_v37 = vand.u32 2147483648, %v2264_v9 }
 0x1f5   : > { %v922_v23 = vsel %vm2312_vm10, %v921_v63, %v917_v24  ;;  %vm2333_vm14 = vcmp.eq.f32.partialorder %v798_v58, 8.507059e+37  ;;  %v801_v33 = vor.u32 1.1754944e-38, %v800_v55  ;;  %v805_v54 = vmul.f32 %v1517_v35, %v2264_v9  ;;  %vm796_vm1 = vmor %vm794_vm12, %vm795_vm13  ;;  %v2349_v51 = vpop.xlane.xlu2 %629  ;;  %v1560_v58 = vld [vmem:[%s1841_s25 + $0x50] sm:$0xff] }
 0x1f6   : > { %1177 = vst [vmem:[%s2183_s17 + $0xd0] sm:$0xff] %v1145_v6  ;;  %v923_v11 = vmul.f32 %v2082_v50, %v922_v23  ;;  %v793_v27 = vadd.f32 %v1515_v34, %v792_v4  ;;  %vm809_vm15 = vweird.f32 %v2264_v9  ;;  %vm2340_vm0 = vcmp.eq.f32.partialorder %v813_v30, 8.507059e+37 }
 0x1f7   : > { %v806_v57 = vsub.f32 1.0, %v805_v54  ;;  %v693_v20 = vand.u32 2147483647, %v2298_v2  ;;  %v695_v56 = vand.u32 2147483648, %v2298_v2  ;;  %1522 = vrcp.f32 %v2327_v48 }
 0x1f8   : > { %v1519_v50 = vpop.eup %1518  ;;  %v1137_v39 = vmul.f32 %v1559_v12, %v923_v11  ;;  %v797_v46 = vsel %vm796_vm1, %v1515_v34, %v793_v27  ;;  %v816_v62 = vor.u32 1.1754944e-38, %v815_v37  ;;  %v948_v1 = vand.u32 2147483647, %v2309_v0  ;;  %v2374_v63 = vpop.xlane.xlu1 %585  ;;  %v1561_v27 = vld [vmem:[%s1841_s25 + $0x58] sm:$0xff] }
 0x1f9   : > { %v1521_v36 = vpop.eup %1520  ;;  %v802_v13 = vsel %vm2333_vm14, %v801_v33, %v797_v46  ;;  %v807_v17 = vmul.f32 %v1517_v35, %v806_v57  ;;  %vm810_vm2 = vweird.f32 %v1517_v35  ;;  %v685_v10 = vmul.f32 %v1519_v50, %v2298_v2  ;;  %v2376_v24 = vpop.xlane.xlu0 %583  ;;  %v1565_v46 = vld [vmem:[%s1841_s25 + $0xd8] sm:$0xff] }
 0x1fa   : > { %1169 = vst [vmem:[%s2183_s17 + $0x90] sm:$0xff] %v1137_v39  ;;  %v803_v28 = vmul.f32 %v2080_v45, %v802_v13  ;;  %vm689_vm3 = vweird.f32 %v2298_v2  ;;  %v940_v5 = vmul.f32 %v1521_v36, %v2309_v0  ;;  %vm944_vm4 = vweird.f32 %v2309_v0  ;;  %vm811_vm6 = vmor %vm809_vm15, %vm810_vm2 }
 0x1fb   : > { %v808_v34 = vadd.f32 %v1517_v35, %v807_v17  ;;  %v686_v8 = vsub.f32 1.0, %v685_v10  ;;  %vm2361_vm5 = vcmp.eq.f32.partialorder %v693_v20, 8.507059e+37  ;;  %v696_v14 = vor.u32 1.1754944e-38, %v695_v56  ;;  %v1562_v10 = vld [vmem:[%s1841_s25 + $0x18] sm:$0xff] }
 0x1fc   : > { %v1129_v55 = vmul.f32 %v1560_v58, %v803_v28  ;;  %v941_v45 = vsub.f32 1.0, %v940_v5  ;;  %vm2368_vm7 = vcmp.eq.f32.partialorder %v948_v1, 8.507059e+37  ;;  %1524 = vrcp.f32 %v2349_v51 }
 0x1fd   : > { %v1523_v31 = vpop.eup %1522  ;;  %v812_v30 = vsel %vm811_vm6, %v1517_v35, %v808_v34  ;;  %v687_v49 = vmul.f32 %v1519_v50, %v686_v8  ;;  %vm690_vm8 = vweird.f32 %v1519_v50  ;;  %v950_v6 = vand.u32 2147483648, %v2309_v0  ;;  %v2392_v20 = vpop.xlane.xlu2 %599  ;;  %v1563_v8 = vld [vmem:[%s1841_s25 + $0xa0] sm:$0xff] }
 0x1fe   : > { %1161 = vst [vmem:[%s2183_s17 + $0x50] sm:$0xff] %v1129_v55  ;;  %v817_v9 = vsel %vm2340_vm0, %v816_v62, %v812_v30  ;;  %v942_v4 = vmul.f32 %v1521_v36, %v941_v45  ;;  %vm945_vm9 = vweird.f32 %v1521_v36  ;;  %v925_v37 = vmul.f32 %v1523_v31, %v2327_v48  ;;  %vm691_vm11 = vmor %vm689_vm3, %vm690_vm8 }
 0x1ff   : > { %v818_v23 = vmul.f32 %v2090_v3, %v817_v9  ;;  %v688_v35 = vadd.f32 %v1519_v50, %v687_v49  ;;  %vm929_vm10 = vweird.f32 %v2327_v48  ;;  %v933_v16 = vand.u32 2147483647, %v2327_v48  ;;  %vm946_vm12 = vmor %vm944_vm4, %vm945_vm9 }
 0x200   : > { %v943_v33 = vadd.f32 %v1521_v36, %v942_v4  ;;  %v926_v54 = vsub.f32 1.0, %v925_v37  ;;  %v935_v11 = vand.u32 2147483648, %v2327_v48  ;;  %1526 = vrcp.f32 %v2374_v63 }
 0x201   : > { %v1130_v52 = vmul.f32 %v1561_v27, %v818_v23  ;;  %v692_v57 = vsel %vm691_vm11, %v1519_v50, %v688_v35  ;;  %v951_v3 = vor.u32 1.1754944e-38, %v950_v6  ;;  %vm930_vm13 = vweird.f32 %v1523_v31  ;;  %v2421_v45 = vpop.xlane.xlu0 %631  ;;  %v1564_v23 = vld [vmem:[%s1841_s25 + $0x98] sm:$0xff] }
 0x202   : > { %v1525_v2 = vpop.eup %1524  ;;  %v697_v56 = vsel %vm2361_vm5, %v696_v14, %v692_v57  ;;  %v947_v12 = vsel %vm946_vm12, %v1521_v36, %v943_v33  ;;  %v927_v39 = vmul.f32 %v1523_v31, %v926_v54  ;;  %1528 = vrcp.f32 %v2376_v24  ;;  %vm931_vm15 = vmor %vm929_vm10, %vm930_vm13 }
 0x203   : > { %1162 = vst [vmem:[%s2183_s17 + $0x58] sm:$0xff] %v1130_v52  ;;  %v698_v50 = vmul.f32 %v2092_v15, %v697_v56  ;;  %v952_v0 = vsel %vm2368_vm7, %v951_v3, %v947_v12  ;;  %vm2401_vm14 = vcmp.eq.f32.partialorder %v933_v16, 8.507059e+37  ;;  %v1045_v62 = vmul.f32 %v1525_v2, %v2349_v51 }
 0x204   : > { %v953_v1 = vmul.f32 %v2099_v21, %v952_v0  ;;  %v928_v36 = vadd.f32 %v1523_v31, %v927_v39  ;;  %v1053_v13 = vand.u32 2147483647, %v2349_v51  ;;  %v1055_v17 = vand.u32 2147483648, %v2349_v51 }
 0x205   : > { %v1122_v28 = vmul.f32 %v1562_v10, %v698_v50  ;;  %v936_v15 = vor.u32 1.1754944e-38, %v935_v11  ;;  %v1046_v5 = vsub.f32 1.0, %v1045_v62  ;;  %vm1049_vm0 = vweird.f32 %v2349_v51  ;;  %v2442_v27 = vpop.xlane.xlu2 %617 }
 0x206   : > { %v1527_v34 = vpop.eup %1526  ;;  %v1139_v21 = vmul.f32 %v1563_v8, %v953_v1  ;;  %v932_v32 = vsel %vm931_vm15, %v1523_v31, %v928_v36  ;;  %v723_v14 = vand.u32 2147483647, %v2374_v63  ;;  %1530 = vrcp.f32 %v2392_v20 }
 0x207   : > { %1154 = vst [vmem:[%s2183_s17 + $0x18] sm:$0xff] %v1122_v28  ;;  %v937_v58 = vsel %vm2401_vm14, %v936_v15, %v932_v32  ;;  %v1047_v48 = vmul.f32 %v1525_v2, %v1046_v5  ;;  %vm1050_vm1 = vweird.f32 %v1525_v2  ;;  %v715_v55 = vmul.f32 %v1527_v34, %v2374_v63 }
 0x208   : > { %v1529_v26 = vpop.eup %1528  ;;  %1171 = vst [vmem:[%s2183_s17 + $0xa0] sm:$0xff] %v1139_v21  ;;  %v938_v30 = vmul.f32 %v2101_v29, %v937_v58  ;;  %vm2425_vm2 = vcmp.eq.f32.partialorder %v1053_v13, 8.507059e+37  ;;  %v1056_v49 = vor.u32 1.1754944e-38, %v1055_v17  ;;  %v725_v6 = vand.u32 2147483648, %v2374_v63  ;;  %vm1051_vm4 = vmor %vm1049_vm0, %vm1050_vm1  ;;  %v2460_v13 = vpop.xlane.xlu1 %603 }
 0x209   : > { %v1048_v9 = vadd.f32 %v1525_v2, %v1047_v48  ;;  %v716_v4 = vsub.f32 1.0, %v715_v55  ;;  %vm719_vm3 = vweird.f32 %v2374_v63  ;;  %v700_v37 = vmul.f32 %v1529_v26, %v2376_v24 }
 0x20a   : > { %v1138_v35 = vmul.f32 %v1564_v23, %v938_v30  ;;  %vm2436_vm5 = vcmp.eq.f32.partialorder %v723_v14, 8.507059e+37  ;;  %v708_v16 = vand.u32 2147483647, %v2376_v24  ;;  %1532 = vrcp.f32 %v2421_v45  ;;  %v2477_v14 = vpop.xlane.xlu0 %601 }
 0x20b   : > { %v1052_v33 = vsel %vm1051_vm4, %v1525_v2, %v1048_v9  ;;  %v717_v54 = vmul.f32 %v1527_v34, %v716_v4  ;;  %vm720_vm6 = vweird.f32 %v1527_v34  ;;  %v701_v11 = vsub.f32 1.0, %v700_v37 }
 0x20c   : > { %v1531_v52 = vpop.eup %1530  ;;  %1170 = vst [vmem:[%s2183_s17 + $0x98] sm:$0xff] %v1138_v35  ;;  %v1057_v51 = vsel %vm2425_vm2, %v1056_v49, %v1052_v33  ;;  %v726_v57 = vor.u32 1.1754944e-38, %v725_v6  ;;  %vm705_vm7 = vweird.f32 %v1529_v26  ;;  %v710_v3 = vand.u32 2147483648, %v2376_v24  ;;  %vm721_vm8 = vmor %vm719_vm3, %vm720_vm6  ;;  %v1567_v49 = vld [vmem:[%s1841_s25 + $0x20] sm:$0xff] }
 0x20d   : > { %v1058_v56 = vmul.f32 %v2103_v19, %v1057_v51  ;;  %v718_v12 = vadd.f32 %v1527_v34, %v717_v54  ;;  %v702_v39 = vmul.f32 %v1529_v26, %v701_v11  ;;  %v820_v2 = vmul.f32 %v1531_v52, %v2392_v20  ;;  %v2495_v29 = vpop.xlane.xlu2 %587  ;;  %v1568_v51 = vld [vmem:[%s1841_s25 + $0x60] sm:$0xff] }
 0x20e   : > { %vm704_vm9 = vweird.f32 %v2376_v24  ;;  %vm2453_vm10 = vcmp.eq.f32.partialorder %v708_v16, 8.507059e+37  ;;  %v828_v0 = vand.u32 2147483647, %v2392_v20  ;;  %1534 = vrcp.f32 %v2442_v27 }
 0x20f   : > { %v1146_v19 = vmul.f32 %v1565_v46, %v1058_v56  ;;  %v722_v62 = vsel %vm721_vm8, %v1527_v34, %v718_v12  ;;  %v703_v1 = vadd.f32 %v1529_v26, %v702_v39  ;;  %v821_v36 = vsub.f32 1.0, %v820_v2  ;;  %vm706_vm11 = vmor %vm704_vm9, %vm705_vm7 }
 0x210   : > { %v1533_v63 = vpop.eup %1532  ;;  %v727_v24 = vsel %vm2436_vm5, %v726_v57, %v722_v62  ;;  %v711_v17 = vor.u32 1.1754944e-38, %v710_v3  ;;  %vm825_vm12 = vweird.f32 %v1531_v52  ;;  %v830_v10 = vand.u32 2147483648, %v2392_v20 }
 0x211   : > { %1178 = vst [vmem:[%s2183_s17 + $0xd8] sm:$0xff] %v1146_v19  ;;  %v728_v28 = vmul.f32 %v2110_v59, %v727_v24  ;;  %v707_v15 = vsel %vm706_vm11, %v1529_v26, %v703_v1  ;;  %v822_v5 = vmul.f32 %v1531_v52, %v821_v36  ;;  %v1060_v34 = vmul.f32 %v1533_v63, %v2421_v45  ;;  %v1566_v59 = vld [vmem:[%s1841_s25 + $0x28] sm:$0xff]  ;;  %v1569_v24 = vld [vmem:[%s1841_s25 + $0xe0] sm:$0xff] }
 0x212   : > { %v712_v8 = vsel %vm2453_vm10, %v711_v17, %v707_v15  ;;  %vm824_vm13 = vweird.f32 %v2392_v20  ;;  %vm2472_vm14 = vcmp.eq.f32.partialorder %v828_v0, 8.507059e+37  ;;  %v1068_v32 = vand.u32 2147483647, %v2421_v45  ;;  %v2523_v36 = vpop.xlane.xlu0 %619 }
 0x213   : > { %v1124_v58 = vmul.f32 %v1566_v59, %v728_v28  ;;  %v713_v48 = vmul.f32 %v2112_v40, %v712_v8  ;;  %v823_v55 = vadd.f32 %v1531_v52, %v822_v5  ;;  %v1061_v26 = vsub.f32 1.0, %v1060_v34  ;;  %vm826_vm15 = vmor %vm824_vm13, %vm825_vm12  ;;  %v1573_v28 = vld [vmem:[%s1841_s25 + $0x30] sm:$0xff] }
 0x214   : > { %v1535_v30 = vpop.eup %1534  ;;  %v831_v20 = vor.u32 1.1754944e-38, %v830_v10  ;;  %vm1065_vm0 = vweird.f32 %v1533_v63  ;;  %v1070_v31 = vand.u32 2147483648, %v2421_v45  ;;  %1536 = vrcp.f32 %v2460_v13 }
 0x215   : > { %1156 = vst [vmem:[%s2183_s17 + $0x28] sm:$0xff] %v1124_v58  ;;  %v1123_v6 = vmul.f32 %v1567_v49, %v713_v48  ;;  %v827_v9 = vsel %vm826_vm15, %v1531_v52, %v823_v55  ;;  %v1062_v4 = vmul.f32 %v1533_v63, %v1061_v26  ;;  %v955_v37 = vmul.f32 %v1535_v30, %v2442_v27  ;;  %v1570_v26 = vld [vmem:[%s1841_s25 + $0xa8] sm:$0xff] }
 0x216   : > { %v832_v40 = vsel %vm2472_vm14, %v831_v20, %v827_v9  ;;  %vm1064_vm1 = vweird.f32 %v2421_v45  ;;  %vm2490_vm2 = vcmp.eq.f32.partialorder %v1068_v32, 8.507059e+37  ;;  %v963_v35 = vand.u32 2147483647, %v2442_v27 }
 0x217   : > { %1155 = vst [vmem:[%s2183_s17 + $0x20] sm:$0xff] %v1123_v6  ;;  %v833_v16 = vmul.f32 %v2114_v44, %v832_v40  ;;  %v1063_v33 = vadd.f32 %v1533_v63, %v1062_v4  ;;  %v956_v54 = vsub.f32 1.0, %v955_v37  ;;  %1538 = vrcp.f32 %v2477_v14  ;;  %vm1066_vm3 = vmor %vm1064_vm1, %vm1065_vm0  ;;  %v2505_v44 = vpop.xlane.xlu1 %621  ;;  %v2548_v4 = vpop.xlane.xlu2 %605 }
 0x218   : > { %v1071_v11 = vor.u32 1.1754944e-38, %v1070_v31  ;;  %vm960_vm4 = vweird.f32 %v1535_v30  ;;  %v965_v45 = vand.u32 2147483648, %v2442_v27  ;;  %v858_v52 = vand.u32 2147483647, %v2460_v13 }
 0x219   : > { %v1131_v57 = vmul.f32 %v1568_v51, %v833_v16  ;;  %v1067_v3 = vsel %vm1066_vm3, %v1533_v63, %v1063_v33  ;;  %v957_v56 = vmul.f32 %v1535_v30, %v956_v54  ;;  %1540 = vrcp.f32 %v2495_v29 }
 0x21a   : > { %v1537_v12 = vpop.eup %1536  ;;  %v1072_v39 = vsel %vm2490_vm2, %v1071_v11, %v1067_v3  ;;  %vm959_vm5 = vweird.f32 %v2442_v27  ;;  %vm2510_vm6 = vcmp.eq.f32.partialorder %v963_v35, 8.507059e+37  ;;  %v860_v50 = vand.u32 2147483648, %v2460_v13  ;;  %v2565_v3 = vpop.xlane.xlu0 %589 }
 0x21b   : > { %1163 = vst [vmem:[%s2183_s17 + $0x60] sm:$0xff] %v1131_v57  ;;  %v1073_v0 = vmul.f32 %v2122_v7, %v1072_v39  ;;  %v958_v46 = vadd.f32 %v1535_v30, %v957_v56  ;;  %v850_v19 = vmul.f32 %v1537_v12, %v2460_v13  ;;  %v843_v62 = vand.u32 2147483647, %v2477_v14  ;;  %vm961_vm7 = vmor %vm959_vm5, %vm960_vm4 }
 0x21c   : > { %v966_v1 = vor.u32 1.1754944e-38, %v965_v45  ;;  %vm854_vm8 = vweird.f32 %v2460_v13  ;;  %v845_v27 = vand.u32 2147483648, %v2477_v14  ;;  %1542 = vrcp.f32 %v2505_v44 }
 0x21d   : > { %v1539_v63 = vpop.eup %1538  ;;  %v1147_v7 = vmul.f32 %v1569_v24, %v1073_v0  ;;  %v962_v17 = vsel %vm961_vm7, %v1535_v30, %v958_v46  ;;  %v851_v10 = vsub.f32 1.0, %v850_v19  ;;  %vm2526_vm9 = vcmp.eq.f32.partialorder %v858_v52, 8.507059e+37 }
 0x21e   : > { %v967_v15 = vsel %vm2510_vm6, %v966_v1, %v962_v17  ;;  %v861_v5 = vor.u32 1.1754944e-38, %v860_v50  ;;  %v835_v34 = vmul.f32 %v1539_v63, %v2477_v14  ;;  %vm839_vm10 = vweird.f32 %v2477_v14 }
 0x21f   : > { %v1541_v8 = vpop.eup %1540  ;;  %1179 = vst [vmem:[%s2183_s17 + $0xe0] sm:$0xff] %v1147_v7  ;;  %v968_v21 = vmul.f32 %v2124_v61, %v967_v15  ;;  %v852_v32 = vmul.f32 %v1537_v12, %v851_v10  ;;  %vm855_vm11 = vweird.f32 %v1537_v12  ;;  %vm2536_vm12 = vcmp.eq.f32.partialorder %v843_v62, 8.507059e+37  ;;  %v2573_v2 = vpop.xlane.xlu1 %633 }
 0x220   : > { %v836_v58 = vsub.f32 1.0, %v835_v34  ;;  %v846_v48 = vor.u32 1.1754944e-38, %v845_v27  ;;  %v730_v55 = vmul.f32 %v1541_v8, %v2495_v29  ;;  %vm734_vm13 = vweird.f32 %v2495_v29  ;;  %vm856_vm14 = vmor %vm854_vm8, %vm855_vm11 }
 0x221   : > { %v1140_v30 = vmul.f32 %v1570_v26, %v968_v21  ;;  %v853_v20 = vadd.f32 %v1537_v12, %v852_v32  ;;  %v738_v31 = vand.u32 2147483647, %v2495_v29  ;;  %1544 = vrcp.f32 %v2523_v36 }
 0x222   : > { %v1543_v61 = vpop.eup %1542  ;;  %v837_v49 = vmul.f32 %v1539_v63, %v836_v58  ;;  %vm840_vm15 = vweird.f32 %v1539_v63  ;;  %v731_v6 = vsub.f32 1.0, %v730_v55  ;;  %v740_v9 = vand.u32 2147483648, %v2495_v29 }
 0x223   : > { %1172 = vst [vmem:[%s2183_s17 + $0xa8] sm:$0xff] %v1140_v30  ;;  %v857_v37 = vsel %vm856_vm14, %v1537_v12, %v853_v20  ;;  %vm735_vm0 = vweird.f32 %v1541_v8  ;;  %v985_v40 = vmul.f32 %v1543_v61, %v2505_v44  ;;  %vm989_vm1 = vweird.f32 %v2505_v44  ;;  %vm841_vm2 = vmor %vm839_vm10, %vm840_vm15 }
 0x224   : > { %v862_v23 = vsel %vm2526_vm9, %v861_v5, %v857_v37  ;;  %v838_v13 = vadd.f32 %v1539_v63, %v837_v49  ;;  %v732_v35 = vmul.f32 %v1541_v8, %v731_v6  ;;  %v995_v16 = vand.u32 2147483648, %v2505_v44  ;;  %vm736_vm4 = vmor %vm734_vm13, %vm735_vm0 }
 0x225   : > { %v863_v33 = vmul.f32 %v2131_v18, %v862_v23  ;;  %v986_v54 = vsub.f32 1.0, %v985_v40  ;;  %v993_v11 = vand.u32 2147483647, %v2505_v44  ;;  %1546 = vrcp.f32 %v2548_v4  ;;  %v1571_v18 = vld [vmem:[%s1841_s25 + $0x70] sm:$0xff] }
 0x226   : > { %v842_v45 = vsel %vm841_vm2, %v1539_v63, %v838_v13  ;;  %v733_v52 = vadd.f32 %v1541_v8, %v732_v35  ;;  %vm2561_vm3 = vcmp.eq.f32.partialorder %v738_v31, 8.507059e+37  ;;  %v741_v57 = vor.u32 1.1754944e-38, %v740_v9  ;;  %v1572_v63 = vld [vmem:[%s1841_s25 + $0x68] sm:$0xff] }
 0x227   : > { %v1545_v56 = vpop.eup %1544  ;;  %v1133_v14 = vmul.f32 %v1571_v18, %v863_v33  ;;  %v847_v12 = vsel %vm2536_vm12, %v846_v48, %v842_v45  ;;  %v987_v39 = vmul.f32 %v1543_v61, %v986_v54  ;;  %vm990_vm5 = vweird.f32 %v1543_v61  ;;  %v1574_v48 = vld [vmem:[%s1841_s25 + $0xb8] sm:$0xff] }
 0x228   : > { %v848_v50 = vmul.f32 %v2133_v22, %v847_v12  ;;  %v737_v0 = vsel %vm736_vm4, %v1541_v8, %v733_v52  ;;  %v996_v46 = vor.u32 1.1754944e-38, %v995_v16  ;;  %v970_v19 = vmul.f32 %v1545_v56, %v2523_v36  ;;  %vm991_vm6 = vmor %vm989_vm1, %vm990_vm5  ;;  %v1575_v16 = vld [vmem:[%s1841_s25 + $0xb0] sm:$0xff] }
 0x229   : > { %1165 = vst [vmem:[%s2183_s17 + $0x70] sm:$0xff] %v1133_v14  ;;  %v742_v62 = vsel %vm2561_vm3, %v741_v57, %v737_v0  ;;  %v988_v1 = vadd.f32 %v1543_v61, %v987_v39  ;;  %v978_v29 = vand.u32 2147483647, %v2523_v36  ;;  %v980_v27 = vand.u32 2147483648, %v2523_v36 }
 0x22a   : > { %v1132_v24 = vmul.f32 %v1572_v63, %v848_v50  ;;  %v743_v7 = vmul.f32 %v2136_v53, %v742_v62  ;;  %v971_v22 = vsub.f32 1.0, %v970_v19  ;;  %1548 = vrcp.f32 %v2573_v2  ;;  %v2590_v53 = vpop.xlane.xlu2 %635  ;;  %v1576_v50 = vld [vmem:[%s1841_s25 + $0x78] sm:$0xff] }
 0x22b   : > { %v1547_v17 = vpop.eup %1546  ;;  %v992_v10 = vsel %vm991_vm6, %v1543_v61, %v988_v1  ;;  %vm994_vm7 = vcmp.eq.f32.partialorder %v993_v11, 8.507059e+37  ;;  %vm975_vm8 = vweird.f32 %v1545_v56  ;;  %vm974_vm9 = vweird.f32 %v2523_v36  ;;  %v2606_v61 = vpop.xlane.xlu0 %637 }
 0x22c   : > { %1164 = vst [vmem:[%s2183_s17 + $0x68] sm:$0xff] %v1132_v24  ;;  %v1125_v15 = vmul.f32 %v1573_v28, %v743_v7  ;;  %v997_v5 = vsel %vm994_vm7, %v996_v46, %v992_v10  ;;  %v972_v34 = vmul.f32 %v1545_v56, %v971_v22  ;;  %v865_v8 = vmul.f32 %v1547_v17, %v2548_v4  ;;  %vm976_vm11 = vmor %vm974_vm9, %vm975_vm8 }
 0x22d   : > { %v998_v44 = vmul.f32 %v2143_v38, %v997_v5  ;;  %vm2594_vm10 = vcmp.eq.f32.partialorder %v978_v29, 8.507059e+37  ;;  %v981_v59 = vor.u32 1.1754944e-38, %v980_v27  ;;  %1550 = vrcp.f32 %v2565_v3  ;;  %v1577_v5 = vld [vmem:[%s1841_s25 + $0xe8] sm:$0xff] }
 0x22e   : > { %1157 = vst [vmem:[%s2183_s17 + $0x30] sm:$0xff] %v1125_v15  ;;  %v973_v32 = vadd.f32 %v1545_v56, %v972_v34  ;;  %v866_v58 = vsub.f32 1.0, %v865_v8  ;;  %v873_v26 = vand.u32 2147483647, %v2548_v4  ;;  %v875_v38 = vand.u32 2147483648, %v2548_v4 }
 0x22f   : > { %v1142_v55 = vmul.f32 %v1574_v48, %v998_v44  ;;  %1552 = vrcp.f32 %v2590_v53  ;;  %vm870_vm12 = vweird.f32 %v1547_v17  ;;  %v1083_v31 = vand.u32 2147483647, %v2573_v2 }
 0x230   : > { %v1549_v36 = vpop.eup %1548  ;;  %v977_v30 = vsel %vm976_vm11, %v1545_v56, %v973_v32  ;;  %v867_v20 = vmul.f32 %v1547_v17, %v866_v58  ;;  %vm869_vm13 = vweird.f32 %v2548_v4  ;;  %v1085_v40 = vand.u32 2147483648, %v2573_v2 }
 0x231   : > { %1174 = vst [vmem:[%s2183_s17 + $0xb8] sm:$0xff] %v1142_v55  ;;  %v982_v49 = vsel %vm2594_vm10, %v981_v59, %v977_v30  ;;  %v1075_v6 = vmul.f32 %v1549_v36, %v2573_v2  ;;  %vm871_vm14 = vmor %vm869_vm13, %vm870_vm12  ;;  %vm874_vm15 = vcmp.eq.f32.partialorder %v873_v26, 8.507059e+37  ;;  %v876_v23 = vor.u32 1.1754944e-38, %v875_v38  ;;  %v1578_v55 = vld [vmem:[%s1841_s25 + $0x38] sm:$0xff]  ;;  %v1579_v38 = vld [vmem:[%s1841_s25 + $0xf0] sm:$0xff] }
 0x232   : > { %v983_v9 = vmul.f32 %v2145_v60, %v982_v49  ;;  %v868_v37 = vadd.f32 %v1547_v17, %v867_v20  ;;  %1554 = vrcp.f32 %v2606_v61  ;;  %vm1079_vm0 = vweird.f32 %v2573_v2 }
 0x233   : > { %v1076_v13 = vsub.f32 1.0, %v1075_v6  ;;  %v1551_v35 = vpop.eup %1550  ;;  %vm2618_vm1 = vcmp.eq.f32.partialorder %v1083_v31, 8.507059e+37  ;;  %vm1080_vm2 = vweird.f32 %v1549_v36  ;;  %v1086_v57 = vor.u32 1.1754944e-38, %v1085_v40  ;;  %v1580_v31 = vld [vmem:[%s1841_s25 + $0xf8] sm:$0xff] }
 0x234   : > { %v1141_v33 = vmul.f32 %v1575_v16, %v983_v9  ;;  %v872_v54 = vsel %vm871_vm14, %v1547_v17, %v868_v37  ;;  %v745_v52 = vmul.f32 %v1551_v35, %v2565_v3  ;;  %vm749_vm3 = vweird.f32 %v2565_v3  ;;  %vm1081_vm4 = vmor %vm1079_vm0, %vm1080_vm2 }
 0x235   : > { %v1553_v4 = vpop.eup %1552  ;;  %v877_v11 = vsel %vm874_vm15, %v876_v23, %v872_v54  ;;  %v1077_v45 = vmul.f32 %v1549_v36, %v1076_v13  ;;  %v753_v12 = vand.u32 2147483647, %v2565_v3  ;;  %v755_v39 = vand.u32 2147483648, %v2565_v3 }
 0x236   : > { %1173 = vst [vmem:[%s2183_s17 + $0xb0] sm:$0xff] %v1141_v33  ;;  %v878_v51 = vmul.f32 %v2148_v47, %v877_v11  ;;  %v1090_v56 = vmul.f32 %v1553_v4, %v2590_v53  ;;  %v746_v14 = vsub.f32 1.0, %v745_v52  ;;  %vm1094_vm5 = vweird.f32 %v2590_v53 }
 0x237   : > { %v1078_v18 = vadd.f32 %v1549_v36, %v1077_v45  ;;  %v1098_v47 = vand.u32 2147483647, %v2590_v53  ;;  %vm750_vm6 = vweird.f32 %v1551_v35  ;;  %v1100_v29 = vand.u32 2147483648, %v2590_v53 }
 0x238   : > { %v1134_v0 = vmul.f32 %v1576_v50, %v878_v51  ;;  %v1091_v46 = vsub.f32 1.0, %v1090_v56  ;;  %v1555_v19 = vpop.eup %1554  ;;  %v747_v1 = vmul.f32 %v1551_v35, %v746_v14  ;;  %vm1095_vm7 = vweird.f32 %v1553_v4  ;;  %vm751_vm9 = vmor %vm749_vm3, %vm750_vm6 }
 0x239   : > { %v1082_v62 = vsel %vm1081_vm4, %v1549_v36, %v1078_v18  ;;  %v1105_v2 = vmul.f32 %v1555_v19, %v2606_v61  ;;  %vm754_vm8 = vcmp.eq.f32.partialorder %v753_v12, 8.507059e+37  ;;  %v756_v22 = vor.u32 1.1754944e-38, %v755_v39  ;;  %vm1096_vm11 = vmor %vm1094_vm5, %vm1095_vm7 }
 0x23a   : > { %1166 = vst [vmem:[%s2183_s17 + $0x78] sm:$0xff] %v1134_v0  ;;  %v1087_v27 = vsel %vm2618_vm1, %v1086_v57, %v1082_v62  ;;  %v1092_v63 = vmul.f32 %v1553_v4, %v1091_v46  ;;  %v748_v7 = vadd.f32 %v1551_v35, %v747_v1  ;;  %vm2642_vm10 = vcmp.eq.f32.partialorder %v1098_v47, 8.507059e+37 }
 0x23b   : > { %v1088_v24 = vmul.f32 %v2153_v42, %v1087_v27  ;;  %v1106_v28 = vsub.f32 1.0, %v1105_v2  ;;  %v1113_v15 = vand.u32 2147483647, %v2606_v61  ;;  %v1101_v3 = vor.u32 1.1754944e-38, %v1100_v29 }
 0x23c   : > { %v1093_v17 = vadd.f32 %v1553_v4, %v1092_v63  ;;  %v752_v42 = vsel %vm751_vm9, %v1551_v35, %v748_v7  ;;  %v1115_v8 = vand.u32 2147483648, %v2606_v61  ;;  %vm1110_vm12 = vweird.f32 %v1555_v19 }
 0x23d   : > { %v1148_v34 = vmul.f32 %v1577_v5, %v1088_v24  ;;  %v757_v44 = vsel %vm754_vm8, %v756_v22, %v752_v42  ;;  %v1107_v32 = vmul.f32 %v1555_v19, %v1106_v28  ;;  %vm1109_vm13 = vweird.f32 %v2606_v61 }
 0x23e   : > { %v1097_v21 = vsel %vm1096_vm11, %v1553_v4, %v1093_v17  ;;  %v758_v59 = vmul.f32 %v2155_v41, %v757_v44  ;;  %vm1111_vm14 = vmor %vm1109_vm13, %vm1110_vm12  ;;  %v1116_v41 = vor.u32 1.1754944e-38, %v1115_v8  ;;  %vm1114_vm15 = vcmp.eq.f32.partialorder %v1113_v15, 8.507059e+37 }
 0x23f   : > { %1180 = vst [vmem:[%s2183_s17 + $0xe8] sm:$0xff] %v1148_v34  ;;  %v1102_v58 = vsel %vm2642_vm10, %v1101_v3, %v1097_v21  ;;  %v1108_v48 = vadd.f32 %v1555_v19, %v1107_v32 }
 0x240   : > { %v1103_v53 = vmul.f32 %v2158_v43, %v1102_v58  ;;  %v1126_v26 = vmul.f32 %v1578_v55, %v758_v59 }
 0x241   : > { %v1112_v30 = vsel %vm1111_vm14, %v1555_v19, %v1108_v48 }
 0x242   : > { %v1149_v36 = vmul.f32 %v1579_v38, %v1103_v53  ;;  %1158 = vst [vmem:[%s2183_s17 + $0x38] sm:$0xff] %v1126_v26  ;;  %v1117_v20 = vsel %vm1114_vm15, %v1116_v41, %v1112_v30 }
 0x243   : > { %v1118_v43 = vmul.f32 %v2162_v25, %v1117_v20 }
 0x244   : > { %1181 = vst [vmem:[%s2183_s17 + $0xf0] sm:$0xff] %v1149_v36 }
 0x245   : > { %v1150_v61 = vmul.f32 %v1580_v31, %v1118_v43 }
 0x247   : > { %1182 = vst [vmem:[%s2183_s17 + $0xf8] sm:$0xff] %v1150_v61 }
 0x248   : > { %1668 = shalt.err (!%p1665_p10)
}
 0x249   : > { %s1718_s10 = smov 128   ;;  %s1719_s25 = smov 8  }
 0x24a   : > { %1370 = dma.vmem_to_hbm [thread:$0]  (%p1807_p7), %s1197_s27, 4096, %s1199_s28, %s1184_s29, %s1718_s10, %s1718_s10, %s1719_s25  }
 0x24b PF: > { %s1213_s18 = sand.u32 1, %s1699_s12   ;;  %p2756_p12 = scmp.ge.s32.totalorder %s1711_s15, 2 }
 0x24c   : > { %s1214_s23 = scalar_lea.sflag [#allocation4], %s1213_s18 }
 0x24d   : > { %p1381_p13 = pnand %p2756_p12, %p1775_p6 }
 0x24f   : > { %p1382_p0 = pneg %p1381_p13 }
 0x251   : > { %1694 = dma.done.wait (%p1382_p0), %s1214_s23, 4096  }
 0x252   : > { %1696 = vsyncadd (%p1382_p0), %s1214_s23, 4294963200  ;;  %p17_p3 = scmp.ge.s32.totalorder %s1793_s26, 4   ;;  %s2757_s12 = smov %s1703_s13 }
 0x253   : > { %s2758_s13 = smov %s1707_s14  ;;  %s2759_s14 = smov %s1803_s4 }
 0x254   : > { %s2760_s15 = smov %s1793_s26  ;;  %19 = sbr.rel (!%p17_p3) target bundleno = 6 (0x6), region = 81 }
 0x259   :  { %1220 = vsyncpa [#allocation3], 1 }
 0x25a   :  { %1222 = vsyncpa [#allocation3 + $0x1], 1 }
 0x25b   :  { %1223 = vsyncpa [#allocation6], 1 }
 0x25c   :  { %1224 = vsyncpa [#allocation4], 1 }
 0x25d   :  { %1226 = vsyncpa [#allocation4 + $0x1], 1 }

// kernel: _attention_forward_impl.1
= control target key start
LH: loop header
LB: loop body
LE: loop exit
PB: predicated region body
PF: predicated region fallthrough
CT: control target
= control target key end

     0   :  { %8 = vsyncpa [#allocation3], 0  ;;  %s2699_s0 = inlined_call_operand.hbm [shape: f32[512,128], index: 0, kind: input, shape index: {}]   ;;  %s2700_s1 = inlined_call_operand.hbm [shape: bf16[128,128], index: 1, kind: input, shape index: {}]   ;;  %s2701_s2 = inlined_call_operand.vmem [shape: f32[1,128], index: 2, kind: input, shape index: {}]   ;;  %s2702_s3 = inlined_call_operand.hbm [shape: f32[512,128], index: 3, kind: output, shape index: {}]  }
   0x1   :  { %10 = vsyncpa [#allocation3 + $0x1], 0 }
   0x2   :  { %11 = vsyncpa [#allocation6], 0 }
   0x3   :  { %12 = vsyncpa [#allocation4], 0 }
   0x4   :  { %14 = vsyncpa [#allocation4 + $0x1], 0  ;;  %s1740_s12 = smov 0   ;;  %s1742_s13 = smov 0  }
   0x5   :  { %s1744_s14 = smov 0   ;;  %s1746_s15 = smov 0  }
   0x6 LB: > { %s1761_s16 = sadd.s32 4294967295, %s1711_s15   ;;  %s1282_s17 = sadd.s32 4294967294, %s1711_s15   ;;  %s1711_s15 = sphi %s1746_s15, %s2760_s15   ;;  %s1707_s14 = sphi %s1744_s14, %s2759_s14   ;;  %s1703_s13 = sphi %s1742_s13, %s2758_s13   ;;  %s1699_s12 = sphi %s1740_s12, %s2757_s12  }
   0x7   : > { %p40_p0 = scmp.ne.s32.totalorder %s1703_s13, %s1699_s12  ;;  %p41_p1 = scmp.eq.s32.totalorder %s1761_s16, 0 }
   0x8   : > { %p106_p2 = scmp.eq.s32.totalorder %s1761_s16, 1  ;;  %p112_p3 = scmp.eq.s32.totalorder %s1282_s17, 1 }
   0x9   : > { %p1770_p4 = por %p41_p1, %p40_p0  ;;  %p1283_p5 = scmp.ge.s32.totalorder %s1711_s15, 1 }
   0xa   : > { %p1775_p6 = por %p112_p3, %p40_p0  ;;  %p119_p7 = scmp.lt.s32.totalorder %s1711_s15, 3 }
   0xb   : > { %s130_s22 = sshll.u32 %s2700_s1, 4  ;;  %s1713_s24 = smov [#allocation5]   ;;  %s131_s22 = int_to_ptr.hbm [resolvable:$true] %s130_s22 }
   0xc   : > { %p1783_p8 = pnand %p1283_p5, %p119_p7  ;;  %s132_s25 = sshll.u32 %s1713_s24, 4  ;;  %s133_s25 = int_to_ptr.vmem [resolvable:$true] %s132_s25 }
   0xd   : > { %s1793_s26 = sadd.s32 1, %s1711_s15   ;;  %s1714_s27 = smov 64  }
   0xe   : > { %p1372_p9 = pneg %p1783_p8  ;;  %s1715_s28 = smov 4  }
   0xf   : > { %s24_s29 = ssub.s32 %s1711_s15, %s1793_s26  ;;  %s27_s30 = sadd.s32 1, %s1707_s14 }
  0x10   : > { %p1373_p10 = pnand %p1372_p9, %p41_p1  ;;  %p25_p12 = scmp.eq.s32.totalorder %s24_s29, 0 }
  0x11   : > { %p34_p13 = scmp.ne.s32.totalorder %s1707_s14, %s1703_s13  ;;  %p35_p0 = scmp.eq.s32.totalorder %s1711_s15, 0 }
  0x12   : > { %1375 = dma.hbm_to_vmem [thread:$0]  (!%p1373_p10), %s131_s22, 1024, %s133_s25, [#allocation6], %s1714_s27, %s1714_s27, %s1715_s28  }
  0x13   : > { %p1385_p3 = scmp.lt.s32.totalorder %s1711_s15, 2  ;;  %p36_p5 = por %p35_p0, %p34_p13 }
  0x14   : > { %s1803_s4 = scalar_select %p25_p12, %s1707_s14, %s27_s30  }
  0x15   : > { %p1807_p7 = por %p106_p2, %p34_p13  ;;  %s149_s6 = sand.u32 1, %s1707_s14  }
  0x16   : > { %s1330_s7 = sshll.u32 %s1711_s15, 8  ;;  %s1286_s8 = sshll.u32 %s149_s6, 8 }
  0x17   : > { %s158_s11 = scalar_lea.hbm %s2699_s0, %s1330_s7  ;;  %s153_s20 = scalar_lea.vmem [#allocation2], %s1286_s8 }
  0x18   : > { %s159_s17 = sshll.u32 %s158_s11, 4  ;;  %s161_s21 = sshll.u32 %s153_s20, 4  ;;  %s160_s17 = int_to_ptr.hbm [resolvable:$true] %s159_s17  ;;  %s162_s21 = int_to_ptr.vmem [resolvable:$true] %s161_s21 }
  0x19   : > { %p1818_p9 = pnand %p1385_p3, %p36_p5  ;;  %s150_s24 = scalar_lea.sflag [#allocation3], %s149_s6 }
  0x1a   : > { %s1611_s25 = sshra.s32 %s160_s17, 4  ;;  %s1618_s30 = scalar_lea.hbm %s2699_s0, 512  ;;  %s1612_s25 = int_to_ptr.hbm [resolvable:$true] %s1611_s25 }
  0x1b   : > { %s1613_s27 = scalar_lea.hbm %s1612_s25, 256  ;;  %p1615_p10 = pneg %p1818_p9 }
  0x1c   : > { %p1614_p2 = scmp.ne.s32.totalorder %s1612_s25, %s1613_s27  ;;  %p1619_p0 = scmp.lt.s32.totalorder %s1612_s25, %s2699_s0 }
  0x1d   : > { %p1620_p3 = scmp.lt.s32.totalorder %s1618_s30, %s1613_s27 }
  0x1e   : > { %p1616_p12 = pnand %p1615_p10, %p1614_p2 }
  0x1f   : > { %p1621_p5 = por %p1620_p3, %p1619_p0 }
  0x20   : > { %p1617_p13 = pneg %p1616_p12 }
  0x22   : > { %p1622_p11 = pnand %p1621_p5, %p1617_p13 }
  0x24   : > { %1625 = shalt.err (!%p1622_p11)
}
  0x25   : > { %s1716_s6 = smov 128   ;;  %s1717_s9 = smov 8  }
  0x26   : > { %1379 = dma.hbm_to_vmem [thread:$0]  (!%p1818_p9), %s160_s17, 4096, %s162_s21, %s150_s24, %s1716_s6, %s1716_s6, %s1717_s9  }
  0x27   : > { %173 = sbr.rel (%p1783_p8) target bundleno = 587 (0x24b), region = 32  ;;  %s1835_s10 = sand.u32 (!%p1783_p8), 1, %s1703_s13  }
  0x28   : > { %s1290_s11 = sshll.u32 (!%p1783_p8), %s1835_s10, 8  ;;  %s176_s20 = scalar_lea.sflag (!%p1783_p8), [#allocation3], %s1835_s10 }
  0x29   : > { %s1841_s25 = scalar_lea.vmem (!%p1783_p8), [#allocation2], %s1290_s11 }
  0x2c   : > { %1686 = dma.done.wait (%p1770_p4), %s176_s20, 4096  }
  0x2d   : > { %1688 = vsyncadd (%p1770_p4), %s176_s20, 4294963200 }
  0x2e   : > { %1690 = dma.done.wait (%p41_p1), [#allocation6], 1024  }
  0x2f   : > { %1692 = vsyncadd (%p41_p1), [#allocation6], 4294966272  ;;  %v1338_v0 = vld [vmem:[#allocation5 + $0x38] sm:$0xff]  ;;  %v1337_v1 = vld [vmem:[#allocation5 + $0x30] sm:$0xff]  ;;  %s2183_s17 = scalar_lea.vmem [#allocation7], %s1290_s11  ;;  %s1339_s21 = sshll.u32 %s1761_s16, 8 }
  0x30   : > { %326 = vmatpush.bf16.msra.mxu0 %v1338_v0  ;;  %1340 = vmatpush.bf16.msra.mxu1 %v1338_v0  ;;  %v1336_v2 = vld [vmem:[#allocation5 + $0x28] sm:$0xff]  ;;  %v1335_v3 = vld [vmem:[#allocation5 + $0x20] sm:$0xff]  ;;  %v1334_v4 = vld [vmem:[#allocation5 + $0x18] sm:$0xff]  ;;  %s1195_s24 = scalar_lea.hbm %s2702_s3, %s1339_s21  ;;  %s1196_s27 = sshll.u32 %s2183_s17, 4  ;;  %s1197_s27 = int_to_ptr.vmem [resolvable:$true] %s1196_s27 }
  0x31   : > { %1341 = vmatpush.bf16.msra.mxu2 %v1338_v0  ;;  %1342 = vmatpush.bf16.msra.mxu3 %v1338_v0  ;;  %v1333_v5 = vld [vmem:[#allocation5 + $0x10] sm:$0xff]  ;;  %v1332_v6 = vld [vmem:[#allocation5 + $0x8] sm:$0xff]  ;;  %v1331_v7 = vld [vmem:[#allocation5] sm:$0xff]  ;;  %s1198_s28 = sshll.u32 %s1195_s24, 4  ;;  %s1184_s29 = scalar_lea.sflag [#allocation4], %s1835_s10  ;;  %s1199_s28 = int_to_ptr.hbm [resolvable:$true] %s1198_s28 }
  0x32   : > { %v1852_v8 = vld [vmem:[%s1841_s25] sm:$0xff]  ;;  %v1855_v9 = vld [vmem:[%s1841_s25 + $0x8] sm:$0xff]  ;;  %v1878_v20 = vld [vmem:[%s1841_s25 + $0x10] sm:$0xff]  ;;  %s1655_s30 = sshra.s32 %s1199_s28, 4  ;;  %s1661_s9 = scalar_lea.hbm %s2702_s3, 512  ;;  %s1656_s30 = int_to_ptr.hbm [resolvable:$true] %s1655_s30 }
  0x33   : > { %v1858_v10 = vld [vmem:[%s1841_s25 + $0x40] sm:$0xff]  ;;  %v219_v11 = vld [vmem:[%s1841_s25 + $0x48] sm:$0xff]  ;;  %v242_v16 = vpack.c.bf16 %v1855_v9, %v1852_v8  ;;  %v213_v21 = vld [vmem:[%s1841_s25 + $0x18] sm:$0xff]  ;;  %s1657_s7 = scalar_lea.hbm %s1656_s30, 256  ;;  %p1662_p11 = scmp.lt.s32.totalorder %s1656_s30, %s2702_s3 }
  0x34   : > { %327 = vmatpush.bf16.msra.mxu0 %v1337_v1  ;;  %1343 = vmatpush.bf16.msra.mxu1 %v1337_v1  ;;  %v1862_v12 = vld [vmem:[%s1841_s25 + $0x80] sm:$0xff]  ;;  %v1865_v13 = vld [vmem:[%s1841_s25 + $0x88] sm:$0xff]  ;;  %v246_v17 = vpack.c.bf16 %v219_v11, %v1858_v10  ;;  %v236_v22 = vld [vmem:[%s1841_s25 + $0xd0] sm:$0xff]  ;;  %v243_v28 = vpack.c.bf16 %v213_v21, %v1878_v20  ;;  %p1658_p1 = scmp.ne.s32.totalorder %s1656_s30, %s1657_s7  ;;  %p1663_p9 = scmp.lt.s32.totalorder %s1661_s9, %s1657_s7 }
  0x35   : > { %1344 = vmatpush.bf16.msra.mxu2 %v1337_v1  ;;  %1345 = vmatpush.bf16.msra.mxu3 %v1337_v1  ;;  %v1868_v14 = vld [vmem:[%s1841_s25 + $0xc0] sm:$0xff]  ;;  %v235_v15 = vld [vmem:[%s1841_s25 + $0xc8] sm:$0xff]  ;;  %v250_v18 = vpack.c.bf16 %v1865_v13, %v1862_v12  ;;  %v220_v23 = vld [vmem:[%s1841_s25 + $0x50] sm:$0xff] }
  0x36   : > { %v254_v19 = vpack.c.bf16 %v235_v15, %v1868_v14  ;;  %v221_v24 = vld [vmem:[%s1841_s25 + $0x58] sm:$0xff]  ;;  %v228_v26 = vld [vmem:[%s1841_s25 + $0x90] sm:$0xff]  ;;  %v214_v32 = vld [vmem:[%s1841_s25 + $0x20] sm:$0xff]  ;;  %p1659_p4 = pnand %p1658_p1, %p1807_p7  ;;  %p1664_p2 = por %p1663_p9, %p1662_p11 }
  0x37   : > { %v237_v25 = vld [vmem:[%s1841_s25 + $0xd8] sm:$0xff]  ;;  %v247_v29 = vpack.c.bf16 %v221_v24, %v220_v23  ;;  %v215_v33 = vld [vmem:[%s1841_s25 + $0x28] sm:$0xff]  ;;  %v230_v34 = vld [vmem:[%s1841_s25 + $0xa0] sm:$0xff] }
  0x38   : > { %328 = vmatpush.bf16.msra.mxu0 %v1336_v2  ;;  %1346 = vmatpush.bf16.msra.mxu1 %v1336_v2  ;;  %v229_v27 = vld [vmem:[%s1841_s25 + $0x98] sm:$0xff]  ;;  %v255_v30 = vpack.c.bf16 %v237_v25, %v236_v22  ;;  %v222_v35 = vld [vmem:[%s1841_s25 + $0x60] sm:$0xff]  ;;  %v223_v36 = vld [vmem:[%s1841_s25 + $0x68] sm:$0xff]  ;;  %v244_v40 = vpack.c.bf16 %v215_v33, %v214_v32  ;;  %p1660_p8 = pneg %p1659_p4 }
  0x39   : > { %1347 = vmatpush.bf16.msra.mxu2 %v1336_v2  ;;  %1348 = vmatpush.bf16.msra.mxu3 %v1336_v2  ;;  %v251_v31 = vpack.c.bf16 %v229_v27, %v228_v26  ;;  %v231_v37 = vld [vmem:[%s1841_s25 + $0xa8] sm:$0xff]  ;;  %v238_v38 = vld [vmem:[%s1841_s25 + $0xe0] sm:$0xff]  ;;  %v248_v41 = vpack.c.bf16 %v223_v36, %v222_v35  ;;  %v216_v44 = vld [vmem:[%s1841_s25 + $0x30] sm:$0xff] }
  0x3a   : > { %v239_v39 = vld [vmem:[%s1841_s25 + $0xe8] sm:$0xff]  ;;  %v252_v42 = vpack.c.bf16 %v231_v37, %v230_v34  ;;  %v217_v45 = vld [vmem:[%s1841_s25 + $0x38] sm:$0xff]  ;;  %v232_v46 = vld [vmem:[%s1841_s25 + $0xb0] sm:$0xff]  ;;  %p1665_p10 = pnand %p1664_p2, %p1660_p8 }
  0x3b   : > { %v256_v43 = vpack.c.bf16 %v239_v39, %v238_v38  ;;  %v224_v47 = vld [vmem:[%s1841_s25 + $0x70] sm:$0xff]  ;;  %v225_v48 = vld [vmem:[%s1841_s25 + $0x78] sm:$0xff]  ;;  %v245_v52 = vpack.c.bf16 %v217_v45, %v216_v44  ;;  %v1907_v56 = vld [vmem:[%s2701_s2] ss:$0 sm:$0xff] }
  0x3c   : > { %329 = vmatpush.bf16.msra.mxu0 %v1335_v3  ;;  %1349 = vmatpush.bf16.msra.mxu1 %v1335_v3  ;;  %v233_v49 = vld [vmem:[%s1841_s25 + $0xb8] sm:$0xff]  ;;  %v240_v50 = vld [vmem:[%s1841_s25 + $0xf0] sm:$0xff]  ;;  %v249_v53 = vpack.c.bf16 %v225_v48, %v224_v47 }
  0x3d   : > { %1350 = vmatpush.bf16.msra.mxu2 %v1335_v3  ;;  %1351 = vmatpush.bf16.msra.mxu3 %v1335_v3  ;;  %v241_v51 = vld [vmem:[%s1841_s25 + $0xf8] sm:$0xff]  ;;  %v253_v54 = vpack.c.bf16 %v233_v49, %v232_v46 }
  0x3e   : > { %v257_v55 = vpack.c.bf16 %v241_v51, %v240_v50 }
  0x40   : > { %330 = vmatpush.bf16.msra.mxu0 %v1334_v4  ;;  %1352 = vmatpush.bf16.msra.mxu1 %v1334_v4 }
  0x41   : > { %1353 = vmatpush.bf16.msra.mxu2 %v1334_v4  ;;  %1354 = vmatpush.bf16.msra.mxu3 %v1334_v4 }
  0x44   : > { %331 = vmatpush.bf16.msra.mxu0 %v1333_v5  ;;  %1355 = vmatpush.bf16.msra.mxu1 %v1333_v5 }
  0x45   : > { %1356 = vmatpush.bf16.msra.mxu2 %v1333_v5  ;;  %1357 = vmatpush.bf16.msra.mxu3 %v1333_v5 }
  0x48   : > { %332 = vmatpush.bf16.msra.mxu0 %v1332_v6  ;;  %1358 = vmatpush.bf16.msra.mxu1 %v1332_v6 }
  0x49   : > { %1359 = vmatpush.bf16.msra.mxu2 %v1332_v6  ;;  %1360 = vmatpush.bf16.msra.mxu3 %v1332_v6 }
  0x4c   : > { %333 = vmatpush.bf16.msra.mxu0 %v1331_v7  ;;  %1361 = vmatpush.bf16.msra.mxu1 %v1331_v7 }
  0x4d   : > { %1362 = vmatpush.bf16.msra.mxu2 %v1331_v7  ;;  %1363 = vmatpush.bf16.msra.mxu3 %v1331_v7 }
  0x4f   : > { %334 = vmatmul.bf16.vlgmr.msra.gmra.mxu0 %v242_v16  ;;  %354 = vmatmul.bf16.vlgmr.msra.gmra.mxu1 %v246_v17 }
  0x50   : > { %374 = vmatmul.bf16.vlgmr.msra.gmra.mxu2 %v250_v18  ;;  %394 = vmatmul.bf16.vlgmr.msra.gmra.mxu3 %v254_v19 }
  0x5f   : > { %339 = vmatmul.bf16.gmra.mxu0 %v243_v28  ;;  %359 = vmatmul.bf16.gmra.mxu1 %v247_v29 }
  0x60   : > { %399 = vmatmul.bf16.gmra.mxu3 %v255_v30  ;;  %379 = vmatmul.bf16.gmra.mxu2 %v251_v31 }
  0x6f   : > { %344 = vmatmul.bf16.gmra.mxu0 %v244_v40  ;;  %364 = vmatmul.bf16.gmra.mxu1 %v248_v41 }
  0x70   : > { %384 = vmatmul.bf16.gmra.mxu2 %v252_v42  ;;  %404 = vmatmul.bf16.gmra.mxu3 %v256_v43 }
  0x7f   : > { %349 = vmatmul.bf16.gmra.mxu0 %v245_v52  ;;  %369 = vmatmul.bf16.gmra.mxu1 %v249_v53 }
  0x80   : > { %389 = vmatmul.bf16.gmra.mxu2 %v253_v54  ;;  %409 = vmatmul.bf16.gmra.mxu3 %v257_v55 }
  0xcc   : > { %v335_v57 = vpop.f32.mrf.mxu0  ;;  %v355_v58 = vpop.f32.mrf.mxu1 }
  0xcd   : > { %v1910_v59 = vadd.f32 %v1907_v56, %v335_v57  ;;  %v1913_v60 = vadd.f32 %v1907_v56, %v355_v58 }
  0xcf   : > { %431 = vmax.xlane.f32.xlu2 %v1913_v60  ;;  %415 = vmax.xlane.f32.xlu0 %v1910_v59 }
  0xd3   : > { %v375_v61 = vpop.f32.mrf.mxu2  ;;  %v395_v62 = vpop.f32.mrf.mxu3 }
  0xd4   : > { %v1918_v63 = vadd.f32 %v1907_v56, %v375_v61  ;;  %v337_v0 = vpop.f32.mrf.mxu0  ;;  %v357_v1 = vpop.f32.mrf.mxu1  ;;  %v1921_v2 = vadd.f32 %v1907_v56, %v395_v62 }
  0xd5   : > { %v1932_v7 = vadd.f32 %v1907_v56, %v337_v0  ;;  %v1944_v21 = vadd.f32 %v1907_v56, %v357_v1 }
  0xd6   : > { %447 = vmax.xlane.f32.xlu1 %v1918_v63 }
  0xd7   : > { %463 = vmax.xlane.f32.xlu0 %v1921_v2 }
  0xdb   : > { %v377_v3 = vpop.f32.mrf.mxu2  ;;  %v397_v4 = vpop.f32.mrf.mxu3 }
  0xdc   : > { %v1926_v5 = vadd.f32 %v1907_v56, %v377_v3  ;;  %v1929_v6 = vadd.f32 %v1907_v56, %v397_v4  ;;  %v340_v11 = vpop.f32.mrf.mxu0  ;;  %v360_v15 = vpop.f32.mrf.mxu1 }
  0xdd   : > { %v1938_v16 = vadd.f32 %v1907_v56, %v340_v11  ;;  %v1950_v24 = vadd.f32 %v1907_v56, %v360_v15 }
  0xde   : > { %465 = vmax.xlane.f32.xlu1 %v1929_v6  ;;  %449 = vmax.xlane.f32.xlu2 %v1926_v5 }
  0xdf   : > { %417 = vmax.xlane.f32.xlu0 %v1932_v7 }
  0xe3   : > { %v400_v17 = vpop.f32.mrf.mxu3  ;;  %v380_v18 = vpop.f32.mrf.mxu2 }
  0xe4   : > { %v1941_v19 = vadd.f32 %v1907_v56, %v400_v17  ;;  %v342_v22 = vpop.f32.mrf.mxu0  ;;  %v362_v23 = vpop.f32.mrf.mxu1  ;;  %v1956_v26 = vadd.f32 %v1907_v56, %v380_v18 }
  0xe5   : > { %v1953_v25 = vadd.f32 %v1907_v56, %v362_v23  ;;  %v1965_v31 = vadd.f32 %v1907_v56, %v342_v22 }
  0xe6   : > { %467 = vmax.xlane.f32.xlu2 %v1941_v19  ;;  %419 = vmax.xlane.f32.xlu1 %v1938_v16 }
  0xe7   : > { %433 = vmax.xlane.f32.xlu0 %v1944_v21 }
  0xeb   : > { %v382_v27 = vpop.f32.mrf.mxu2  ;;  %v402_v29 = vpop.f32.mrf.mxu3 }
  0xec   : > { %v345_v28 = vpop.f32.mrf.mxu0  ;;  %v1968_v32 = vadd.f32 %v1907_v56, %v402_v29  ;;  %v365_v34 = vpop.f32.mrf.mxu1  ;;  %v1980_v37 = vadd.f32 %v1907_v56, %v382_v27 }
  0xed   : > { %v1962_v30 = vadd.f32 %v1907_v56, %v345_v28  ;;  %v1977_v36 = vadd.f32 %v1907_v56, %v365_v34 }
  0xee   : > { %437 = vmax.xlane.f32.xlu2 %v1953_v25  ;;  %435 = vmax.xlane.f32.xlu1 %v1950_v24 }
  0xef   : > { %451 = vmax.xlane.f32.xlu0 %v1956_v26 }
  0xf3   : > { %v385_v33 = vpop.f32.mrf.mxu2  ;;  %v405_v38 = vpop.f32.mrf.mxu3 }
  0xf4   : > { %v1974_v35 = vadd.f32 %v1907_v56, %v385_v33  ;;  %v347_v39 = vpop.f32.mrf.mxu0  ;;  %v1986_v41 = vadd.f32 %v1907_v56, %v405_v38  ;;  %v367_v44 = vpop.f32.mrf.mxu1 }
  0xf5   : > { %v1989_v42 = vadd.f32 %v1907_v56, %v347_v39  ;;  %v2004_v49 = vadd.f32 %v1907_v56, %v367_v44 }
  0xf6   : > { %423 = vmax.xlane.f32.xlu2 %v1962_v30  ;;  %421 = vmax.xlane.f32.xlu1 %v1965_v31 }
  0xf7   : > { %469 = vmax.xlane.f32.xlu0 %v1968_v32 }
  0xfb   : > { %v387_v40 = vpop.f32.mrf.mxu2  ;;  %v407_v45 = vpop.f32.mrf.mxu3 }
  0xfc   : > { %v1992_v43 = vadd.f32 %v1907_v56, %v387_v40  ;;  %v350_v46 = vpop.f32.mrf.mxu0  ;;  %v1998_v47 = vadd.f32 %v1907_v56, %v407_v45  ;;  %v370_v51 = vpop.f32.mrf.mxu1 }
  0xfd   : > { %v2001_v48 = vadd.f32 %v1907_v56, %v350_v46  ;;  %v2010_v52 = vadd.f32 %v1907_v56, %v370_v51 }
  0xfe   : > { %455 = vmax.xlane.f32.xlu2 %v1974_v35  ;;  %453 = vmax.xlane.f32.xlu1 %v1980_v37 }
  0xff   : > { %439 = vmax.xlane.f32.xlu0 %v1977_v36 }
 0x103   : > { %v390_v50 = vpop.f32.mrf.mxu2  ;;  %v410_v54 = vpop.f32.mrf.mxu3 }
 0x104   : > { %v2013_v53 = vadd.f32 %v1907_v56, %v390_v50  ;;  %v2016_v55 = vadd.f32 %v1907_v56, %v410_v54  ;;  %v352_v58 = vpop.f32.mrf.mxu0  ;;  %v372_v61 = vpop.f32.mrf.mxu1 }
 0x105   : > { %v2025_v0 = vadd.f32 %v1907_v56, %v352_v58  ;;  %v2028_v1 = vadd.f32 %v1907_v56, %v372_v61 }
 0x106   : > { %425 = vmax.xlane.f32.xlu2 %v1989_v42  ;;  %471 = vmax.xlane.f32.xlu1 %v1986_v41 }
 0x107   : > { %457 = vmax.xlane.f32.xlu0 %v1992_v43 }
 0x10b   : > { %v392_v57 = vpop.f32.mrf.mxu2  ;;  %v412_v3 = vpop.f32.mrf.mxu3 }
 0x10c   : > { %v2022_v62 = vadd.f32 %v1907_v56, %v392_v57  ;;  %v2034_v4 = vadd.f32 %v1907_v56, %v412_v3 }
 0x10e   : > { %473 = vmax.xlane.f32.xlu2 %v1998_v47  ;;  %441 = vmax.xlane.f32.xlu1 %v2004_v49 }
 0x10f   : > { %427 = vmax.xlane.f32.xlu0 %v2001_v48 }
 0x116   : > { %443 = vmax.xlane.f32.xlu2 %v2010_v52  ;;  %459 = vmax.xlane.f32.xlu1 %v2013_v53 }
 0x117   : > { %475 = vmax.xlane.f32.xlu0 %v2016_v55 }
 0x11e   : > { %461 = vmax.xlane.f32.xlu2 %v2022_v62  ;;  %429 = vmax.xlane.f32.xlu1 %v2025_v0 }
 0x11f   : > { %445 = vmax.xlane.f32.xlu0 %v2028_v1 }
 0x126   : > { %477 = vmax.xlane.f32.xlu1 %v2034_v4 }
 0x142   : > { %v432_v11 = vpop.xlane.xlu2 %431  ;;  %v416_v15 = vpop.xlane.xlu0 %415 }
 0x143   : > { %v487_v17 = vsub.f32 %v1913_v60, %v432_v11  ;;  %v479_v18 = vsub.f32 %v1910_v59, %v416_v15 }
 0x145   : > { %v527_v22 = vmul.f32 1.442695, %v487_v17  ;;  %v511_v23 = vmul.f32 1.442695, %v479_v18 }
 0x147   : > { %1428 = vpow2.f32 %v527_v22 }
 0x148   : > { %1430 = vpow2.f32 %v511_v23 }
 0x149   : > { %v448_v27 = vpop.xlane.xlu1 %447 }
 0x14a   : > { %v495_v28 = vsub.f32 %v1918_v63, %v448_v27  ;;  %v464_v29 = vpop.xlane.xlu0 %463 }
 0x14b   : > { %v503_v33 = vsub.f32 %v1921_v2, %v464_v29 }
 0x14c   : > { %v543_v56 = vmul.f32 1.442695, %v495_v28 }
 0x14d   : > { %v2041_v34 = vpop.eup %1428  ;;  %v559_v38 = vmul.f32 1.442695, %v503_v33 }
 0x14e   : > { %v2043_v39 = vpop.eup %1430  ;;  %1432 = vpow2.f32 %v543_v56  ;;  %591 = vadd.xlane.f32.xlu1 %v2041_v34 }
 0x14f   : > { %1434 = vpow2.f32 %v559_v38  ;;  %575 = vadd.xlane.f32.xlu2 %v2043_v39 }
 0x151   : > { %v466_v59 = vpop.xlane.xlu1 %465  ;;  %v450_v60 = vpop.xlane.xlu2 %449 }
 0x152   : > { %v496_v40 = vsub.f32 %v1926_v5, %v450_v60  ;;  %v418_v63 = vpop.xlane.xlu0 %417  ;;  %v504_v51 = vsub.f32 %v1929_v6, %v466_v59 }
 0x153   : > { %v480_v44 = vsub.f32 %v1932_v7, %v418_v63 }
 0x154   : > { %v2049_v2 = vpop.eup %1432  ;;  %v545_v45 = vmul.f32 1.442695, %v496_v40  ;;  %v561_v5 = vmul.f32 1.442695, %v504_v51 }
 0x155   : > { %v2051_v46 = vpop.eup %1434  ;;  %v513_v50 = vmul.f32 1.442695, %v480_v44  ;;  %607 = vadd.xlane.f32.xlu0 %v2049_v2 }
 0x156   : > { %1436 = vpow2.f32 %v545_v45 }
 0x157   : > { %623 = vadd.xlane.f32.xlu2 %v2051_v46  ;;  %1438 = vpow2.f32 %v513_v50 }
 0x158   : > { %1440 = vpow2.f32 %v561_v5 }
 0x159   : > { %v468_v54 = vpop.xlane.xlu2 %467  ;;  %v420_v57 = vpop.xlane.xlu1 %419 }
 0x15a   : > { %v481_v58 = vsub.f32 %v1938_v16, %v420_v57  ;;  %v434_v7 = vpop.xlane.xlu0 %433  ;;  %v505_v6 = vsub.f32 %v1941_v19, %v468_v54 }
 0x15b   : > { %v488_v61 = vsub.f32 %v1944_v21, %v434_v7 }
 0x15c   : > { %v515_v3 = vmul.f32 1.442695, %v481_v58  ;;  %v2058_v11 = vpop.eup %1436  ;;  %v563_v22 = vmul.f32 1.442695, %v505_v6 }
 0x15d   : > { %v529_v15 = vmul.f32 1.442695, %v488_v61  ;;  %v2060_v17 = vpop.eup %1438  ;;  %609 = vadd.xlane.f32.xlu1 %v2058_v11 }
 0x15e   : > { %1442 = vpow2.f32 %v515_v3  ;;  %577 = vadd.xlane.f32.xlu0 %v2060_v17  ;;  %v2067_v28 = vpop.eup %1440 }
 0x15f   : > { %1444 = vpow2.f32 %v529_v15 }
 0x160   : > { %1446 = vpow2.f32 %v563_v22 }
 0x161   : > { %v438_v18 = vpop.xlane.xlu2 %437  ;;  %v436_v16 = vpop.xlane.xlu1 %435 }
 0x162   : > { %v489_v21 = vsub.f32 %v1950_v24, %v436_v16  ;;  %v452_v23 = vpop.xlane.xlu0 %451  ;;  %v490_v38 = vsub.f32 %v1953_v25, %v438_v18 }
 0x163   : > { %v497_v27 = vsub.f32 %v1956_v26, %v452_v23 }
 0x164   : > { %v531_v29 = vmul.f32 1.442695, %v489_v21  ;;  %v2069_v33 = vpop.eup %1442  ;;  %v533_v40 = vmul.f32 1.442695, %v490_v38 }
 0x165   : > { %v547_v19 = vmul.f32 1.442695, %v497_v27  ;;  %v2071_v56 = vpop.eup %1444  ;;  %579 = vadd.xlane.f32.xlu1 %v2069_v33 }
 0x166   : > { %1448 = vpow2.f32 %v531_v29  ;;  %625 = vadd.xlane.f32.xlu0 %v2067_v28  ;;  %593 = vadd.xlane.f32.xlu2 %v2071_v56  ;;  %v2078_v63 = vpop.eup %1446 }
 0x167   : > { %1450 = vpow2.f32 %v547_v19 }
 0x168   : > { %1452 = vpow2.f32 %v533_v40 }
 0x169   : > { %v424_v24 = vpop.xlane.xlu2 %423  ;;  %v422_v26 = vpop.xlane.xlu1 %421 }
 0x16a   : > { %v482_v59 = vsub.f32 %v1965_v31, %v422_v26  ;;  %v470_v60 = vpop.xlane.xlu0 %469  ;;  %v483_v6 = vsub.f32 %v1962_v30, %v424_v24 }
 0x16b   : > { %v506_v25 = vsub.f32 %v1968_v32, %v470_v60 }
 0x16c   : > { %v517_v44 = vmul.f32 1.442695, %v482_v59  ;;  %v2080_v45 = vpop.eup %1448  ;;  %v519_v22 = vmul.f32 1.442695, %v483_v6 }
 0x16d   : > { %v2082_v50 = vpop.eup %1450  ;;  %627 = vadd.xlane.f32.xlu1 %v2078_v63  ;;  %v565_v58 = vmul.f32 1.442695, %v506_v25 }
 0x16e   : > { %595 = vadd.xlane.f32.xlu0 %v2080_v45  ;;  %611 = vadd.xlane.f32.xlu2 %v2082_v50  ;;  %1454 = vpow2.f32 %v517_v44  ;;  %v2090_v3 = vpop.eup %1452 }
 0x171   : > { %v456_v31 = vpop.xlane.xlu2 %455  ;;  %v454_v51 = vpop.xlane.xlu1 %453 }
 0x172   : > { %v499_v54 = vsub.f32 %v1974_v35, %v456_v31  ;;  %v498_v57 = vsub.f32 %v1980_v37, %v454_v51  ;;  %v440_v5 = vpop.xlane.xlu0 %439 }
 0x173   : > { %v491_v32 = vsub.f32 %v1977_v36, %v440_v5 }
 0x174   : > { %v551_v7 = vmul.f32 1.442695, %v499_v54  ;;  %v549_v61 = vmul.f32 1.442695, %v498_v57  ;;  %v2092_v15 = vpop.eup %1454 }
 0x175   : > { %597 = vadd.xlane.f32.xlu1 %v2090_v3  ;;  %v535_v23 = vmul.f32 1.442695, %v491_v32 }
 0x176   : > { %1456 = vpow2.f32 %v551_v7  ;;  %581 = vadd.xlane.f32.xlu2 %v2092_v15 }
 0x177   : > { %1458 = vpow2.f32 %v549_v61 }
 0x178   : > { %1460 = vpow2.f32 %v565_v58 }
 0x179   : > { %v426_v35 = vpop.xlane.xlu2 %425  ;;  %v472_v37 = vpop.xlane.xlu1 %471 }
 0x17a   : > { %v484_v18 = vsub.f32 %v1989_v42, %v426_v35  ;;  %v458_v16 = vpop.xlane.xlu0 %457  ;;  %v507_v30 = vsub.f32 %v1986_v41, %v472_v37 }
 0x17b   : > { %v500_v36 = vsub.f32 %v1992_v43, %v458_v16 }
 0x17c   : > { %v2099_v21 = vpop.eup %1456  ;;  %v521_v27 = vmul.f32 1.442695, %v484_v18  ;;  %v567_v26 = vmul.f32 1.442695, %v507_v30 }
 0x17d   : > { %v2101_v29 = vpop.eup %1458  ;;  %615 = vadd.xlane.f32.xlu1 %v2099_v21  ;;  %v553_v60 = vmul.f32 1.442695, %v500_v36 }
 0x17e   : > { %v2103_v19 = vpop.eup %1460  ;;  %1462 = vpow2.f32 %v521_v27  ;;  %613 = vadd.xlane.f32.xlu0 %v2101_v29 }
 0x17f   : > { %1464 = vpow2.f32 %v519_v22  ;;  %629 = vadd.xlane.f32.xlu2 %v2103_v19 }
 0x180   : > { %1466 = vpow2.f32 %v535_v23 }
 0x181   : > { %v474_v42 = vpop.xlane.xlu2 %473  ;;  %v442_v38 = vpop.xlane.xlu1 %441  ;;  %1468 = vpow2.f32 %v567_v26 }
 0x182   : > { %v428_v24 = vpop.xlane.xlu0 %427  ;;  %v492_v41 = vsub.f32 %v2004_v49, %v442_v38  ;;  %1470 = vpow2.f32 %v553_v60  ;;  %v508_v27 = vsub.f32 %v1998_v47, %v474_v42 }
 0x183   : > { %v485_v43 = vsub.f32 %v2001_v48, %v428_v24 }
 0x184   : > { %v2110_v59 = vpop.eup %1462  ;;  %v537_v57 = vmul.f32 1.442695, %v492_v41  ;;  %v569_v30 = vmul.f32 1.442695, %v508_v27 }
 0x185   : > { %v2112_v40 = vpop.eup %1464  ;;  %585 = vadd.xlane.f32.xlu1 %v2110_v59  ;;  %v523_v5 = vmul.f32 1.442695, %v485_v43 }
 0x186   : > { %v2114_v44 = vpop.eup %1466  ;;  %583 = vadd.xlane.f32.xlu0 %v2112_v40 }
 0x187   : > { %599 = vadd.xlane.f32.xlu2 %v2114_v44  ;;  %v2122_v7 = vpop.eup %1468 }
 0x188   : > { %v2124_v61 = vpop.eup %1470 }
 0x189   : > { %v444_v25 = vpop.xlane.xlu2 %443  ;;  %v460_v31 = vpop.xlane.xlu1 %459 }
 0x18a   : > { %v493_v51 = vsub.f32 %v2010_v52, %v444_v25  ;;  %v476_v54 = vpop.xlane.xlu0 %475  ;;  %v501_v49 = vsub.f32 %v2013_v53, %v460_v31 }
 0x18c   : > { %v539_v58 = vmul.f32 1.442695, %v493_v51  ;;  %v555_v35 = vmul.f32 1.442695, %v501_v49 }
 0x18e   : > { %1472 = vpow2.f32 %v539_v58  ;;  %631 = vadd.xlane.f32.xlu0 %v2122_v7 }
 0x18f   : > { %1474 = vpow2.f32 %v537_v57  ;;  %617 = vadd.xlane.f32.xlu2 %v2124_v61 }
 0x190   : > { %1476 = vpow2.f32 %v523_v5 }
 0x191   : > { %v462_v48 = vpop.xlane.xlu2 %461  ;;  %v430_v6 = vpop.xlane.xlu1 %429 }
 0x192   : > { %v502_v52 = vsub.f32 %v2022_v62, %v462_v48  ;;  %v446_v32 = vpop.xlane.xlu0 %445  ;;  %v486_v62 = vsub.f32 %v2025_v0, %v430_v6 }
 0x193   : > { %v494_v37 = vsub.f32 %v2028_v1, %v446_v32  ;;  %v509_v1 = vsub.f32 %v2016_v55, %v476_v54 }
 0x194   : > { %v2131_v18 = vpop.eup %1472  ;;  %v557_v16 = vmul.f32 1.442695, %v502_v52  ;;  %v525_v36 = vmul.f32 1.442695, %v486_v62 }
 0x195   : > { %v2133_v22 = vpop.eup %1474  ;;  %v541_v23 = vmul.f32 1.442695, %v494_v37  ;;  %603 = vadd.xlane.f32.xlu1 %v2131_v18  ;;  %v571_v24 = vmul.f32 1.442695, %v509_v1 }
 0x196   : > { %v2136_v53 = vpop.eup %1476  ;;  %1478 = vpow2.f32 %v557_v16  ;;  %601 = vadd.xlane.f32.xlu0 %v2133_v22 }
 0x197   : > { %1480 = vpow2.f32 %v555_v35  ;;  %587 = vadd.xlane.f32.xlu2 %v2136_v53 }
 0x198   : > { %1482 = vpow2.f32 %v541_v23 }
 0x199   : > { %v478_v26 = vpop.xlane.xlu1 %477  ;;  %1484 = vpow2.f32 %v569_v30 }
 0x19a   : > { %1486 = vpow2.f32 %v525_v36  ;;  %v510_v0 = vsub.f32 %v2034_v4, %v478_v26 }
 0x19b   : > { %1488 = vpow2.f32 %v571_v24 }
 0x19c   : > { %v2143_v38 = vpop.eup %1478  ;;  %v573_v55 = vmul.f32 1.442695, %v510_v0 }
 0x19d   : > { %v2145_v60 = vpop.eup %1480  ;;  %621 = vadd.xlane.f32.xlu1 %v2143_v38 }
 0x19e   : > { %v2148_v47 = vpop.eup %1482  ;;  %619 = vadd.xlane.f32.xlu0 %v2145_v60  ;;  %1490 = vpow2.f32 %v573_v55 }
 0x19f   : > { %605 = vadd.xlane.f32.xlu2 %v2148_v47  ;;  %v2153_v42 = vpop.eup %1484 }
 0x1a0   : > { %v2155_v41 = vpop.eup %1486 }
 0x1a1   : > { %v2158_v43 = vpop.eup %1488 }
 0x1a4   : > { %v2162_v25 = vpop.eup %1490 }
 0x1a5   : > { %633 = vadd.xlane.f32.xlu1 %v2153_v42 }
 0x1a6   : > { %589 = vadd.xlane.f32.xlu0 %v2155_v41 }
 0x1a7   : > { %635 = vadd.xlane.f32.xlu2 %v2158_v43 }
 0x1ae   : > { %637 = vadd.xlane.f32.xlu0 %v2162_v25 }
 0x1c1   : > { %v592_v4 = vpop.xlane.xlu1 %591 }
 0x1c2   : > { %1492 = vrcp.f32 %v592_v4  ;;  %v576_v31 = vpop.xlane.xlu2 %575  ;;  %v768_v52 = vand.u32 2147483647, %v592_v4  ;;  %v770_v6 = vand.u32 2147483648, %v592_v4  ;;  %vm764_vm2 = vweird.f32 %v592_v4 }
 0x1c3   : > { %1494 = vrcp.f32 %v576_v31  ;;  %v648_v35 = vand.u32 2147483647, %v576_v31  ;;  %v650_v16 = vand.u32 2147483648, %v576_v31  ;;  %vm644_vm4 = vweird.f32 %v576_v31 }
 0x1c4   : > { %vm769_vm3 = vcmp.eq.f32.partialorder %v768_v52, 8.507059e+37  ;;  %v771_v1 = vor.u32 1.1754944e-38, %v770_v6 }
 0x1c5   : > { %vm649_vm6 = vcmp.eq.f32.partialorder %v648_v35, 8.507059e+37  ;;  %v651_v0 = vor.u32 1.1754944e-38, %v650_v16 }
 0x1c8   : > { %v1493_v51 = vpop.eup %1492  ;;  %v608_v54 = vpop.xlane.xlu0 %607 }
 0x1c9   : > { %v1495_v57 = vpop.eup %1494  ;;  %v760_v5 = vmul.f32 %v1493_v51, %v592_v4  ;;  %1496 = vrcp.f32 %v608_v54  ;;  %vm765_vm0 = vweird.f32 %v1493_v51  ;;  %vm884_vm8 = vweird.f32 %v608_v54 }
 0x1ca   : > { %v640_v58 = vmul.f32 %v1495_v57, %v576_v31  ;;  %v2165_v49 = vpop.xlane.xlu2 %623  ;;  %vm645_vm1 = vweird.f32 %v1495_v57  ;;  %vm766_vm5 = vmor %vm764_vm2, %vm765_vm0  ;;  %v888_v55 = vand.u32 2147483647, %v608_v54  ;;  %v890_v35 = vand.u32 2147483648, %v608_v54 }
 0x1cb   : > { %v761_v48 = vsub.f32 1.0, %v760_v5  ;;  %1498 = vrcp.f32 %v2165_v49  ;;  %vm646_vm7 = vmor %vm644_vm4, %vm645_vm1  ;;  %vm1004_vm13 = vweird.f32 %v2165_v49 }
 0x1cc   : > { %v641_v32 = vsub.f32 1.0, %v640_v58  ;;  %vm889_vm12 = vcmp.eq.f32.partialorder %v888_v55, 8.507059e+37 }
 0x1cd   : > { %v762_v37 = vmul.f32 %v1493_v51, %v761_v48 }
 0x1ce   : > { %v642_v23 = vmul.f32 %v1495_v57, %v641_v32 }
 0x1cf   : > { %v1497_v27 = vpop.eup %1496  ;;  %v763_v62 = vadd.f32 %v1493_v51, %v762_v37 }
 0x1d0   : > { %v643_v30 = vadd.f32 %v1495_v57, %v642_v23  ;;  %v880_v36 = vmul.f32 %v1497_v27, %v608_v54  ;;  %v2168_v5 = vpop.xlane.xlu1 %609  ;;  %vm885_vm9 = vweird.f32 %v1497_v27 }
 0x1d1   : > { %v1499_v24 = vpop.eup %1498  ;;  %v767_v26 = vsel %vm766_vm5, %v1493_v51, %v763_v62  ;;  %v2171_v52 = vpop.xlane.xlu0 %577  ;;  %1500 = vrcp.f32 %v2168_v5  ;;  %v1010_v62 = vand.u32 2147483648, %v2165_v49  ;;  %vm886_vm11 = vmor %vm884_vm8, %vm885_vm9  ;;  %vm899_vm1 = vweird.f32 %v2168_v5 }
 0x1d2   : > { %v772_v58 = vsel %vm769_vm3, %v771_v1, %v767_v26  ;;  %v647_v48 = vsel %vm646_vm7, %v1495_v57, %v643_v30  ;;  %v881_v32 = vsub.f32 1.0, %v880_v36  ;;  %v1000_v4 = vmul.f32 %v1499_v24, %v2165_v49 }
 0x1d3   : > { %v773_v31 = vmul.f32 %v2041_v34, %v772_v58  ;;  %v652_v6 = vsel %vm649_vm6, %v651_v0, %v647_v48  ;;  %v1008_v57 = vand.u32 2147483647, %v2165_v49  ;;  %1502 = vrcp.f32 %v2171_v52 }
 0x1d4   : > { %v653_v51 = vmul.f32 %v2043_v39, %v652_v6  ;;  %v882_v37 = vmul.f32 %v1497_v27, %v881_v32  ;;  %v1001_v16 = vsub.f32 1.0, %v1000_v4  ;;  %vm1005_vm10 = vweird.f32 %v1499_v24 }
 0x1d5   : > { %v1127_v23 = vmul.f32 %v773_v31, %v1858_v10  ;;  %v891_v10 = vor.u32 1.1754944e-38, %v890_v35  ;;  %vm1006_vm14 = vmor %vm1004_vm13, %vm1005_vm10  ;;  %v1011_v0 = vor.u32 1.1754944e-38, %v1010_v62  ;;  %vm1009_vm15 = vcmp.eq.f32.partialorder %v1008_v57, 8.507059e+37 }
 0x1d6   : > { %v1119_v34 = vmul.f32 %v653_v51, %v1852_v8  ;;  %v883_v1 = vadd.f32 %v1497_v27, %v882_v37  ;;  %v1002_v30 = vmul.f32 %v1499_v24, %v1001_v16  ;;  %v903_v31 = vand.u32 2147483647, %v2168_v5 }
 0x1d7   : > { %1159 = vst [vmem:[%s2183_s17 + $0x40] sm:$0xff] %v1127_v23  ;;  %v1501_v26 = vpop.eup %1500  ;;  %v905_v49 = vand.u32 2147483648, %v2168_v5  ;;  %v663_v37 = vand.u32 2147483647, %v2171_v52  ;;  %v665_v16 = vand.u32 2147483648, %v2171_v52  ;;  %vm659_vm2 = vweird.f32 %v2171_v52 }
 0x1d8   : > { %1151 = vst [vmem:[%s2183_s17] sm:$0xff] %v1119_v34  ;;  %v887_v39 = vsel %vm886_vm11, %v1497_v27, %v883_v1  ;;  %v1003_v36 = vadd.f32 %v1499_v24, %v1002_v30  ;;  %v2189_v58 = vpop.xlane.xlu1 %579  ;;  %v895_v54 = vmul.f32 %v1501_v26, %v2168_v5  ;;  %vm900_vm0 = vweird.f32 %v1501_v26 }
 0x1d9   : > { %v892_v8 = vsel %vm889_vm12, %v891_v10, %v887_v39  ;;  %v2193_v4 = vpop.xlane.xlu2 %593  ;;  %v1503_v27 = vpop.eup %1502  ;;  %1504 = vrcp.f32 %v2189_v58  ;;  %vm2213_vm3 = vcmp.eq.f32.partialorder %v903_v31, 8.507059e+37  ;;  %vm901_vm5 = vmor %vm899_vm1, %vm900_vm0  ;;  %vm2218_vm6 = vcmp.eq.f32.partialorder %v663_v37, 8.507059e+37 }
 0x1da   : > { %v893_v48 = vmul.f32 %v2049_v2, %v892_v8  ;;  %v1007_v32 = vsel %vm1006_vm14, %v1499_v24, %v1003_v36  ;;  %v896_v2 = vsub.f32 1.0, %v895_v54  ;;  %v655_v24 = vmul.f32 %v1503_v27, %v2171_v52  ;;  %v2201_v51 = vpop.xlane.xlu0 %625 }
 0x1db   : > { %v1012_v55 = vsel %vm1009_vm15, %v1011_v0, %v1007_v32  ;;  %1506 = vrcp.f32 %v2193_v4  ;;  %vm660_vm4 = vweird.f32 %v1503_v27  ;;  %v666_v5 = vor.u32 1.1754944e-38, %v665_v16 }
 0x1dc   : > { %v1135_v6 = vmul.f32 %v893_v48, %v1862_v12  ;;  %v1013_v35 = vmul.f32 %v2051_v46, %v1012_v55  ;;  %v897_v57 = vmul.f32 %v1501_v26, %v896_v2  ;;  %v656_v12 = vsub.f32 1.0, %v655_v24  ;;  %vm661_vm9 = vmor %vm659_vm2, %vm660_vm4 }
 0x1dd   : > { %v678_v46 = vand.u32 2147483647, %v2189_v58  ;;  %1508 = vrcp.f32 %v2201_v51  ;;  %vm674_vm7 = vweird.f32 %v2189_v58  ;;  %v680_v32 = vand.u32 2147483648, %v2189_v58 }
 0x1de   : > { %1167 = vst [vmem:[%s2183_s17 + $0x80] sm:$0xff] %v1135_v6  ;;  %v1143_v23 = vmul.f32 %v1013_v35, %v1868_v14  ;;  %v898_v62 = vadd.f32 %v1501_v26, %v897_v57  ;;  %v657_v1 = vmul.f32 %v1503_v27, %v656_v12  ;;  %v906_v14 = vor.u32 1.1754944e-38, %v905_v49 }
 0x1df   : > { %v1505_v30 = vpop.eup %1504  ;;  %vm2226_vm8 = vcmp.eq.f32.partialorder %v678_v46, 8.507059e+37  ;;  %vm779_vm10 = vweird.f32 %v2193_v4  ;;  %v785_v52 = vand.u32 2147483648, %v2193_v4  ;;  %v1023_v37 = vand.u32 2147483647, %v2201_v51 }
 0x1e0   : > { %1175 = vst [vmem:[%s2183_s17 + $0xc0] sm:$0xff] %v1143_v23  ;;  %v2223_v39 = vpop.xlane.xlu1 %627  ;;  %v902_v36 = vsel %vm901_vm5, %v1501_v26, %v898_v62  ;;  %v658_v8 = vadd.f32 %v1503_v27, %v657_v1  ;;  %v670_v0 = vmul.f32 %v1505_v30, %v2189_v58  ;;  %v783_v26 = vand.u32 2147483647, %v2193_v4 }
 0x1e1   : > { %v1507_v54 = vpop.eup %1506  ;;  %v907_v55 = vsel %vm2213_vm3, %v906_v14, %v902_v36  ;;  %1510 = vrcp.f32 %v2223_v39  ;;  %vm675_vm11 = vweird.f32 %v1505_v30  ;;  %v2245_v16 = vpop.xlane.xlu2 %611  ;;  %v681_v12 = vor.u32 1.1754944e-38, %v680_v32 }
 0x1e2   : > { %v908_v31 = vmul.f32 %v2058_v11, %v907_v55  ;;  %v662_v49 = vsel %vm661_vm9, %v1503_v27, %v658_v8  ;;  %v671_v6 = vsub.f32 1.0, %v670_v0  ;;  %v775_v35 = vmul.f32 %v1507_v54, %v2193_v4  ;;  %vm676_vm14 = vmor %vm674_vm7, %vm675_vm11  ;;  %v2262_v36 = vpop.xlane.xlu0 %595 }
 0x1e3   : > { %v1509_v2 = vpop.eup %1508  ;;  %v667_v24 = vsel %vm2218_vm6, %v666_v5, %v662_v49  ;;  %vm780_vm12 = vweird.f32 %v1507_v54  ;;  %vm1019_vm13 = vweird.f32 %v2201_v51  ;;  %1512 = vrcp.f32 %v2245_v16 }
 0x1e4   : > { %v1136_v23 = vmul.f32 %v908_v31, %v1865_v13  ;;  %v668_v11 = vmul.f32 %v2060_v17, %v667_v24  ;;  %v672_v27 = vmul.f32 %v1505_v30, %v671_v6  ;;  %v776_v57 = vsub.f32 1.0, %v775_v35  ;;  %vm781_vm1 = vmor %vm779_vm10, %vm780_vm12 }
 0x1e5   : > { %v1015_v46 = vmul.f32 %v1509_v2, %v2201_v51  ;;  %vm2257_vm15 = vcmp.eq.f32.partialorder %v783_v26, 8.507059e+37  ;;  %v786_v17 = vor.u32 1.1754944e-38, %v785_v52  ;;  %v1025_v5 = vand.u32 2147483648, %v2201_v51 }
 0x1e6   : > { %1168 = vst [vmem:[%s2183_s17 + $0x88] sm:$0xff] %v1136_v23  ;;  %v1120_v62 = vmul.f32 %v668_v11, %v1855_v9  ;;  %v673_v34 = vadd.f32 %v1505_v30, %v672_v27  ;;  %v777_v1 = vmul.f32 %v1507_v54, %v776_v57  ;;  %vm2267_vm0 = vcmp.eq.f32.partialorder %v1023_v37, 8.507059e+37  ;;  %v1556_v57 = vld [vmem:[%s1841_s25 + $0x48] sm:$0xff] }
 0x1e7   : > { %v1511_v14 = vpop.eup %1510  ;;  %v1016_v10 = vsub.f32 1.0, %v1015_v46  ;;  %vm1020_vm2 = vweird.f32 %v1509_v2  ;;  %v1038_v31 = vand.u32 2147483647, %v2223_v39  ;;  %1514 = vrcp.f32 %v2262_v36 }
 0x1e8   : > { %v2264_v9 = vpop.xlane.xlu1 %597  ;;  %1152 = vst [vmem:[%s2183_s17 + $0x8] sm:$0xff] %v1120_v62  ;;  %v677_v8 = vsel %vm676_vm14, %v1505_v30, %v673_v34  ;;  %v778_v0 = vadd.f32 %v1507_v54, %v777_v1  ;;  %v1030_v58 = vmul.f32 %v1511_v14, %v2223_v39  ;;  %v1026_v24 = vor.u32 1.1754944e-38, %v1025_v5  ;;  %vm1021_vm3 = vmor %vm1019_vm13, %vm1020_vm2 }
 0x1e9   : > { %v682_v55 = vsel %vm2226_vm8, %v681_v12, %v677_v8  ;;  %v1017_v26 = vmul.f32 %v1509_v2, %v1016_v10  ;;  %v1040_v4 = vand.u32 2147483648, %v2223_v39  ;;  %v1513_v52 = vpop.eup %1512  ;;  %vm1035_vm4 = vweird.f32 %v1511_v14 }
 0x1ea   : > { %v683_v30 = vmul.f32 %v2069_v33, %v682_v55  ;;  %v782_v49 = vsel %vm781_vm1, %v1507_v54, %v778_v0  ;;  %v1031_v6 = vsub.f32 1.0, %v1030_v58  ;;  %vm1034_vm5 = vweird.f32 %v2223_v39 }
 0x1eb   : > { %v787_v48 = vsel %vm2257_vm15, %v786_v17, %v782_v49  ;;  %v1018_v35 = vadd.f32 %v1509_v2, %v1017_v26  ;;  %vm2288_vm6 = vcmp.eq.f32.partialorder %v1038_v31, 8.507059e+37  ;;  %v910_v27 = vmul.f32 %v1513_v52, %v2245_v16  ;;  %vm1036_vm7 = vmor %vm1034_vm5, %vm1035_vm4  ;;  %v1557_v17 = vld [vmem:[%s1841_s25 + $0xc8] sm:$0xff]  ;;  %v1558_v49 = vld [vmem:[%s1841_s25 + $0xd0] sm:$0xff] }
 0x1ec   : > { %v1121_v37 = vmul.f32 %v683_v30, %v1878_v20  ;;  %v788_v23 = vmul.f32 %v2071_v56, %v787_v48  ;;  %v1032_v33 = vmul.f32 %v1511_v14, %v1031_v6  ;;  %v918_v12 = vand.u32 2147483647, %v2245_v16 }
 0x1ed   : > { %v1022_v54 = vsel %vm1021_vm3, %v1509_v2, %v1018_v35  ;;  %v2298_v2 = vpop.xlane.xlu2 %581  ;;  %v1041_v46 = vor.u32 1.1754944e-38, %v1040_v4  ;;  %v911_v62 = vsub.f32 1.0, %v910_v27  ;;  %1516 = vrcp.f32 %v2264_v9  ;;  %v1515_v34 = vpop.eup %1514 }
 0x1ee   : > { %1153 = vst [vmem:[%s2183_s17 + $0x10] sm:$0xff] %v1121_v37  ;;  %v1128_v20 = vmul.f32 %v1556_v57, %v788_v23  ;;  %v1027_v56 = vsel %vm2267_vm0, %v1026_v24, %v1022_v54  ;;  %v1033_v51 = vadd.f32 %v1511_v14, %v1032_v33  ;;  %vm914_vm8 = vweird.f32 %v2245_v16 }
 0x1ef   : > { %v1028_v39 = vmul.f32 %v2067_v28, %v1027_v56  ;;  %vm915_vm9 = vweird.f32 %v1513_v52  ;;  %v920_v13 = vand.u32 2147483648, %v2245_v16  ;;  %v912_v5 = vmul.f32 %v1513_v52, %v911_v62 }
 0x1f0   : > { %1160 = vst [vmem:[%s2183_s17 + $0x48] sm:$0xff] %v1128_v20  ;;  %v1037_v1 = vsel %vm1036_vm7, %v1511_v14, %v1033_v51  ;;  %v790_v8 = vmul.f32 %v1515_v34, %v2262_v36  ;;  %v2309_v0 = vpop.xlane.xlu1 %615  ;;  %vm2312_vm10 = vcmp.eq.f32.partialorder %v918_v12, 8.507059e+37  ;;  %v798_v58 = vand.u32 2147483647, %v2262_v36  ;;  %vm916_vm11 = vmor %vm914_vm8, %vm915_vm9  ;;  %v1559_v12 = vld [vmem:[%s1841_s25 + $0x90] sm:$0xff] }
 0x1f1   : > { %v1144_v10 = vmul.f32 %v1557_v17, %v1028_v39  ;;  %v1042_v28 = vsel %vm2288_vm6, %v1041_v46, %v1037_v1  ;;  %v800_v55 = vand.u32 2147483648, %v2262_v36  ;;  %v913_v26 = vadd.f32 %v1513_v52, %v912_v5  ;;  %v2327_v48 = vpop.xlane.xlu0 %613 }
 0x1f2   : > { %v1043_v32 = vmul.f32 %v2078_v63, %v1042_v28  ;;  %v791_v31 = vsub.f32 1.0, %v790_v8  ;;  %v813_v30 = vand.u32 2147483647, %v2264_v9  ;;  %1518 = vrcp.f32 %v2298_v2 }
 0x1f3   : > { %1176 = vst [vmem:[%s2183_s17 + $0xc8] sm:$0xff] %v1144_v10  ;;  %v921_v63 = vor.u32 1.1754944e-38, %v920_v13  ;;  %vm794_vm12 = vweird.f32 %v2262_v36  ;;  %1520 = vrcp.f32 %v2309_v0  ;;  %v1517_v35 = vpop.eup %1516  ;;  %v917_v24 = vsel %vm916_vm11, %v1513_v52, %v913_v26 }
 0x1f4   : > { %v1145_v6 = vmul.f32 %v1558_v49, %v1043_v32  ;;  %v792_v4 = vmul.f32 %v1515_v34, %v791_v31  ;;  %vm795_vm13 = vweird.f32 %v1515_v34  ;;  %v815_v37 = vand.u32 2147483648, %v2264_v9 }
 0x1f5   : > { %v922_v23 = vsel %vm2312_vm10, %v921_v63, %v917_v24  ;;  %vm2333_vm14 = vcmp.eq.f32.partialorder %v798_v58, 8.507059e+37  ;;  %v801_v33 = vor.u32 1.1754944e-38, %v800_v55  ;;  %v805_v54 = vmul.f32 %v1517_v35, %v2264_v9  ;;  %vm796_vm1 = vmor %vm794_vm12, %vm795_vm13  ;;  %v2349_v51 = vpop.xlane.xlu2 %629  ;;  %v1560_v58 = vld [vmem:[%s1841_s25 + $0x50] sm:$0xff] }
 0x1f6   : > { %1177 = vst [vmem:[%s2183_s17 + $0xd0] sm:$0xff] %v1145_v6  ;;  %v923_v11 = vmul.f32 %v2082_v50, %v922_v23  ;;  %v793_v27 = vadd.f32 %v1515_v34, %v792_v4  ;;  %vm809_vm15 = vweird.f32 %v2264_v9  ;;  %vm2340_vm0 = vcmp.eq.f32.partialorder %v813_v30, 8.507059e+37 }
 0x1f7   : > { %v806_v57 = vsub.f32 1.0, %v805_v54  ;;  %v693_v20 = vand.u32 2147483647, %v2298_v2  ;;  %v695_v56 = vand.u32 2147483648, %v2298_v2  ;;  %1522 = vrcp.f32 %v2327_v48 }
 0x1f8   : > { %v1519_v50 = vpop.eup %1518  ;;  %v1137_v39 = vmul.f32 %v1559_v12, %v923_v11  ;;  %v797_v46 = vsel %vm796_vm1, %v1515_v34, %v793_v27  ;;  %v816_v62 = vor.u32 1.1754944e-38, %v815_v37  ;;  %v948_v1 = vand.u32 2147483647, %v2309_v0  ;;  %v2374_v63 = vpop.xlane.xlu1 %585  ;;  %v1561_v27 = vld [vmem:[%s1841_s25 + $0x58] sm:$0xff] }
 0x1f9   : > { %v1521_v36 = vpop.eup %1520  ;;  %v802_v13 = vsel %vm2333_vm14, %v801_v33, %v797_v46  ;;  %v807_v17 = vmul.f32 %v1517_v35, %v806_v57  ;;  %vm810_vm2 = vweird.f32 %v1517_v35  ;;  %v685_v10 = vmul.f32 %v1519_v50, %v2298_v2  ;;  %v2376_v24 = vpop.xlane.xlu0 %583  ;;  %v1565_v46 = vld [vmem:[%s1841_s25 + $0xd8] sm:$0xff] }
 0x1fa   : > { %1169 = vst [vmem:[%s2183_s17 + $0x90] sm:$0xff] %v1137_v39  ;;  %v803_v28 = vmul.f32 %v2080_v45, %v802_v13  ;;  %vm689_vm3 = vweird.f32 %v2298_v2  ;;  %v940_v5 = vmul.f32 %v1521_v36, %v2309_v0  ;;  %vm944_vm4 = vweird.f32 %v2309_v0  ;;  %vm811_vm6 = vmor %vm809_vm15, %vm810_vm2 }
 0x1fb   : > { %v808_v34 = vadd.f32 %v1517_v35, %v807_v17  ;;  %v686_v8 = vsub.f32 1.0, %v685_v10  ;;  %vm2361_vm5 = vcmp.eq.f32.partialorder %v693_v20, 8.507059e+37  ;;  %v696_v14 = vor.u32 1.1754944e-38, %v695_v56  ;;  %v1562_v10 = vld [vmem:[%s1841_s25 + $0x18] sm:$0xff] }
 0x1fc   : > { %v1129_v55 = vmul.f32 %v1560_v58, %v803_v28  ;;  %v941_v45 = vsub.f32 1.0, %v940_v5  ;;  %vm2368_vm7 = vcmp.eq.f32.partialorder %v948_v1, 8.507059e+37  ;;  %1524 = vrcp.f32 %v2349_v51 }
 0x1fd   : > { %v1523_v31 = vpop.eup %1522  ;;  %v812_v30 = vsel %vm811_vm6, %v1517_v35, %v808_v34  ;;  %v687_v49 = vmul.f32 %v1519_v50, %v686_v8  ;;  %vm690_vm8 = vweird.f32 %v1519_v50  ;;  %v950_v6 = vand.u32 2147483648, %v2309_v0  ;;  %v2392_v20 = vpop.xlane.xlu2 %599  ;;  %v1563_v8 = vld [vmem:[%s1841_s25 + $0xa0] sm:$0xff] }
 0x1fe   : > { %1161 = vst [vmem:[%s2183_s17 + $0x50] sm:$0xff] %v1129_v55  ;;  %v817_v9 = vsel %vm2340_vm0, %v816_v62, %v812_v30  ;;  %v942_v4 = vmul.f32 %v1521_v36, %v941_v45  ;;  %vm945_vm9 = vweird.f32 %v1521_v36  ;;  %v925_v37 = vmul.f32 %v1523_v31, %v2327_v48  ;;  %vm691_vm11 = vmor %vm689_vm3, %vm690_vm8 }
 0x1ff   : > { %v818_v23 = vmul.f32 %v2090_v3, %v817_v9  ;;  %v688_v35 = vadd.f32 %v1519_v50, %v687_v49  ;;  %vm929_vm10 = vweird.f32 %v2327_v48  ;;  %v933_v16 = vand.u32 2147483647, %v2327_v48  ;;  %vm946_vm12 = vmor %vm944_vm4, %vm945_vm9 }
 0x200   : > { %v943_v33 = vadd.f32 %v1521_v36, %v942_v4  ;;  %v926_v54 = vsub.f32 1.0, %v925_v37  ;;  %v935_v11 = vand.u32 2147483648, %v2327_v48  ;;  %1526 = vrcp.f32 %v2374_v63 }
 0x201   : > { %v1130_v52 = vmul.f32 %v1561_v27, %v818_v23  ;;  %v692_v57 = vsel %vm691_vm11, %v1519_v50, %v688_v35  ;;  %v951_v3 = vor.u32 1.1754944e-38, %v950_v6  ;;  %vm930_vm13 = vweird.f32 %v1523_v31  ;;  %v2421_v45 = vpop.xlane.xlu0 %631  ;;  %v1564_v23 = vld [vmem:[%s1841_s25 + $0x98] sm:$0xff] }
 0x202   : > { %v1525_v2 = vpop.eup %1524  ;;  %v697_v56 = vsel %vm2361_vm5, %v696_v14, %v692_v57  ;;  %v947_v12 = vsel %vm946_vm12, %v1521_v36, %v943_v33  ;;  %v927_v39 = vmul.f32 %v1523_v31, %v926_v54  ;;  %1528 = vrcp.f32 %v2376_v24  ;;  %vm931_vm15 = vmor %vm929_vm10, %vm930_vm13 }
 0x203   : > { %1162 = vst [vmem:[%s2183_s17 + $0x58] sm:$0xff] %v1130_v52  ;;  %v698_v50 = vmul.f32 %v2092_v15, %v697_v56  ;;  %v952_v0 = vsel %vm2368_vm7, %v951_v3, %v947_v12  ;;  %vm2401_vm14 = vcmp.eq.f32.partialorder %v933_v16, 8.507059e+37  ;;  %v1045_v62 = vmul.f32 %v1525_v2, %v2349_v51 }
 0x204   : > { %v953_v1 = vmul.f32 %v2099_v21, %v952_v0  ;;  %v928_v36 = vadd.f32 %v1523_v31, %v927_v39  ;;  %v1053_v13 = vand.u32 2147483647, %v2349_v51  ;;  %v1055_v17 = vand.u32 2147483648, %v2349_v51 }
 0x205   : > { %v1122_v28 = vmul.f32 %v1562_v10, %v698_v50  ;;  %v936_v15 = vor.u32 1.1754944e-38, %v935_v11  ;;  %v1046_v5 = vsub.f32 1.0, %v1045_v62  ;;  %vm1049_vm0 = vweird.f32 %v2349_v51  ;;  %v2442_v27 = vpop.xlane.xlu2 %617 }
 0x206   : > { %v1527_v34 = vpop.eup %1526  ;;  %v1139_v21 = vmul.f32 %v1563_v8, %v953_v1  ;;  %v932_v32 = vsel %vm931_vm15, %v1523_v31, %v928_v36  ;;  %v723_v14 = vand.u32 2147483647, %v2374_v63  ;;  %1530 = vrcp.f32 %v2392_v20 }
 0x207   : > { %1154 = vst [vmem:[%s2183_s17 + $0x18] sm:$0xff] %v1122_v28  ;;  %v937_v58 = vsel %vm2401_vm14, %v936_v15, %v932_v32  ;;  %v1047_v48 = vmul.f32 %v1525_v2, %v1046_v5  ;;  %vm1050_vm1 = vweird.f32 %v1525_v2  ;;  %v715_v55 = vmul.f32 %v1527_v34, %v2374_v63 }
 0x208   : > { %v1529_v26 = vpop.eup %1528  ;;  %1171 = vst [vmem:[%s2183_s17 + $0xa0] sm:$0xff] %v1139_v21  ;;  %v938_v30 = vmul.f32 %v2101_v29, %v937_v58  ;;  %vm2425_vm2 = vcmp.eq.f32.partialorder %v1053_v13, 8.507059e+37  ;;  %v1056_v49 = vor.u32 1.1754944e-38, %v1055_v17  ;;  %v725_v6 = vand.u32 2147483648, %v2374_v63  ;;  %vm1051_vm4 = vmor %vm1049_vm0, %vm1050_vm1  ;;  %v2460_v13 = vpop.xlane.xlu1 %603 }
 0x209   : > { %v1048_v9 = vadd.f32 %v1525_v2, %v1047_v48  ;;  %v716_v4 = vsub.f32 1.0, %v715_v55  ;;  %vm719_vm3 = vweird.f32 %v2374_v63  ;;  %v700_v37 = vmul.f32 %v1529_v26, %v2376_v24 }
 0x20a   : > { %v1138_v35 = vmul.f32 %v1564_v23, %v938_v30  ;;  %vm2436_vm5 = vcmp.eq.f32.partialorder %v723_v14, 8.507059e+37  ;;  %v708_v16 = vand.u32 2147483647, %v2376_v24  ;;  %1532 = vrcp.f32 %v2421_v45  ;;  %v2477_v14 = vpop.xlane.xlu0 %601 }
 0x20b   : > { %v1052_v33 = vsel %vm1051_vm4, %v1525_v2, %v1048_v9  ;;  %v717_v54 = vmul.f32 %v1527_v34, %v716_v4  ;;  %vm720_vm6 = vweird.f32 %v1527_v34  ;;  %v701_v11 = vsub.f32 1.0, %v700_v37 }
 0x20c   : > { %v1531_v52 = vpop.eup %1530  ;;  %1170 = vst [vmem:[%s2183_s17 + $0x98] sm:$0xff] %v1138_v35  ;;  %v1057_v51 = vsel %vm2425_vm2, %v1056_v49, %v1052_v33  ;;  %v726_v57 = vor.u32 1.1754944e-38, %v725_v6  ;;  %vm705_vm7 = vweird.f32 %v1529_v26  ;;  %v710_v3 = vand.u32 2147483648, %v2376_v24  ;;  %vm721_vm8 = vmor %vm719_vm3, %vm720_vm6  ;;  %v1567_v49 = vld [vmem:[%s1841_s25 + $0x20] sm:$0xff] }
 0x20d   : > { %v1058_v56 = vmul.f32 %v2103_v19, %v1057_v51  ;;  %v718_v12 = vadd.f32 %v1527_v34, %v717_v54  ;;  %v702_v39 = vmul.f32 %v1529_v26, %v701_v11  ;;  %v820_v2 = vmul.f32 %v1531_v52, %v2392_v20  ;;  %v2495_v29 = vpop.xlane.xlu2 %587  ;;  %v1568_v51 = vld [vmem:[%s1841_s25 + $0x60] sm:$0xff] }
 0x20e   : > { %vm704_vm9 = vweird.f32 %v2376_v24  ;;  %vm2453_vm10 = vcmp.eq.f32.partialorder %v708_v16, 8.507059e+37  ;;  %v828_v0 = vand.u32 2147483647, %v2392_v20  ;;  %1534 = vrcp.f32 %v2442_v27 }
 0x20f   : > { %v1146_v19 = vmul.f32 %v1565_v46, %v1058_v56  ;;  %v722_v62 = vsel %vm721_vm8, %v1527_v34, %v718_v12  ;;  %v703_v1 = vadd.f32 %v1529_v26, %v702_v39  ;;  %v821_v36 = vsub.f32 1.0, %v820_v2  ;;  %vm706_vm11 = vmor %vm704_vm9, %vm705_vm7 }
 0x210   : > { %v1533_v63 = vpop.eup %1532  ;;  %v727_v24 = vsel %vm2436_vm5, %v726_v57, %v722_v62  ;;  %v711_v17 = vor.u32 1.1754944e-38, %v710_v3  ;;  %vm825_vm12 = vweird.f32 %v1531_v52  ;;  %v830_v10 = vand.u32 2147483648, %v2392_v20 }
 0x211   : > { %1178 = vst [vmem:[%s2183_s17 + $0xd8] sm:$0xff] %v1146_v19  ;;  %v728_v28 = vmul.f32 %v2110_v59, %v727_v24  ;;  %v707_v15 = vsel %vm706_vm11, %v1529_v26, %v703_v1  ;;  %v822_v5 = vmul.f32 %v1531_v52, %v821_v36  ;;  %v1060_v34 = vmul.f32 %v1533_v63, %v2421_v45  ;;  %v1566_v59 = vld [vmem:[%s1841_s25 + $0x28] sm:$0xff]  ;;  %v1569_v24 = vld [vmem:[%s1841_s25 + $0xe0] sm:$0xff] }
 0x212   : > { %v712_v8 = vsel %vm2453_vm10, %v711_v17, %v707_v15  ;;  %vm824_vm13 = vweird.f32 %v2392_v20  ;;  %vm2472_vm14 = vcmp.eq.f32.partialorder %v828_v0, 8.507059e+37  ;;  %v1068_v32 = vand.u32 2147483647, %v2421_v45  ;;  %v2523_v36 = vpop.xlane.xlu0 %619 }
 0x213   : > { %v1124_v58 = vmul.f32 %v1566_v59, %v728_v28  ;;  %v713_v48 = vmul.f32 %v2112_v40, %v712_v8  ;;  %v823_v55 = vadd.f32 %v1531_v52, %v822_v5  ;;  %v1061_v26 = vsub.f32 1.0, %v1060_v34  ;;  %vm826_vm15 = vmor %vm824_vm13, %vm825_vm12  ;;  %v1573_v28 = vld [vmem:[%s1841_s25 + $0x30] sm:$0xff] }
 0x214   : > { %v1535_v30 = vpop.eup %1534  ;;  %v831_v20 = vor.u32 1.1754944e-38, %v830_v10  ;;  %vm1065_vm0 = vweird.f32 %v1533_v63  ;;  %v1070_v31 = vand.u32 2147483648, %v2421_v45  ;;  %1536 = vrcp.f32 %v2460_v13 }
 0x215   : > { %1156 = vst [vmem:[%s2183_s17 + $0x28] sm:$0xff] %v1124_v58  ;;  %v1123_v6 = vmul.f32 %v1567_v49, %v713_v48  ;;  %v827_v9 = vsel %vm826_vm15, %v1531_v52, %v823_v55  ;;  %v1062_v4 = vmul.f32 %v1533_v63, %v1061_v26  ;;  %v955_v37 = vmul.f32 %v1535_v30, %v2442_v27  ;;  %v1570_v26 = vld [vmem:[%s1841_s25 + $0xa8] sm:$0xff] }
 0x216   : > { %v832_v40 = vsel %vm2472_vm14, %v831_v20, %v827_v9  ;;  %vm1064_vm1 = vweird.f32 %v2421_v45  ;;  %vm2490_vm2 = vcmp.eq.f32.partialorder %v1068_v32, 8.507059e+37  ;;  %v963_v35 = vand.u32 2147483647, %v2442_v27 }
 0x217   : > { %1155 = vst [vmem:[%s2183_s17 + $0x20] sm:$0xff] %v1123_v6  ;;  %v833_v16 = vmul.f32 %v2114_v44, %v832_v40  ;;  %v1063_v33 = vadd.f32 %v1533_v63, %v1062_v4  ;;  %v956_v54 = vsub.f32 1.0, %v955_v37  ;;  %1538 = vrcp.f32 %v2477_v14  ;;  %vm1066_vm3 = vmor %vm1064_vm1, %vm1065_vm0  ;;  %v2505_v44 = vpop.xlane.xlu1 %621  ;;  %v2548_v4 = vpop.xlane.xlu2 %605 }
 0x218   : > { %v1071_v11 = vor.u32 1.1754944e-38, %v1070_v31  ;;  %vm960_vm4 = vweird.f32 %v1535_v30  ;;  %v965_v45 = vand.u32 2147483648, %v2442_v27  ;;  %v858_v52 = vand.u32 2147483647, %v2460_v13 }
 0x219   : > { %v1131_v57 = vmul.f32 %v1568_v51, %v833_v16  ;;  %v1067_v3 = vsel %vm1066_vm3, %v1533_v63, %v1063_v33  ;;  %v957_v56 = vmul.f32 %v1535_v30, %v956_v54  ;;  %1540 = vrcp.f32 %v2495_v29 }
 0x21a   : > { %v1537_v12 = vpop.eup %1536  ;;  %v1072_v39 = vsel %vm2490_vm2, %v1071_v11, %v1067_v3  ;;  %vm959_vm5 = vweird.f32 %v2442_v27  ;;  %vm2510_vm6 = vcmp.eq.f32.partialorder %v963_v35, 8.507059e+37  ;;  %v860_v50 = vand.u32 2147483648, %v2460_v13  ;;  %v2565_v3 = vpop.xlane.xlu0 %589 }
 0x21b   : > { %1163 = vst [vmem:[%s2183_s17 + $0x60] sm:$0xff] %v1131_v57  ;;  %v1073_v0 = vmul.f32 %v2122_v7, %v1072_v39  ;;  %v958_v46 = vadd.f32 %v1535_v30, %v957_v56  ;;  %v850_v19 = vmul.f32 %v1537_v12, %v2460_v13  ;;  %v843_v62 = vand.u32 2147483647, %v2477_v14  ;;  %vm961_vm7 = vmor %vm959_vm5, %vm960_vm4 }
 0x21c   : > { %v966_v1 = vor.u32 1.1754944e-38, %v965_v45  ;;  %vm854_vm8 = vweird.f32 %v2460_v13  ;;  %v845_v27 = vand.u32 2147483648, %v2477_v14  ;;  %1542 = vrcp.f32 %v2505_v44 }
 0x21d   : > { %v1539_v63 = vpop.eup %1538  ;;  %v1147_v7 = vmul.f32 %v1569_v24, %v1073_v0  ;;  %v962_v17 = vsel %vm961_vm7, %v1535_v30, %v958_v46  ;;  %v851_v10 = vsub.f32 1.0, %v850_v19  ;;  %vm2526_vm9 = vcmp.eq.f32.partialorder %v858_v52, 8.507059e+37 }
 0x21e   : > { %v967_v15 = vsel %vm2510_vm6, %v966_v1, %v962_v17  ;;  %v861_v5 = vor.u32 1.1754944e-38, %v860_v50  ;;  %v835_v34 = vmul.f32 %v1539_v63, %v2477_v14  ;;  %vm839_vm10 = vweird.f32 %v2477_v14 }
 0x21f   : > { %v1541_v8 = vpop.eup %1540  ;;  %1179 = vst [vmem:[%s2183_s17 + $0xe0] sm:$0xff] %v1147_v7  ;;  %v968_v21 = vmul.f32 %v2124_v61, %v967_v15  ;;  %v852_v32 = vmul.f32 %v1537_v12, %v851_v10  ;;  %vm855_vm11 = vweird.f32 %v1537_v12  ;;  %vm2536_vm12 = vcmp.eq.f32.partialorder %v843_v62, 8.507059e+37  ;;  %v2573_v2 = vpop.xlane.xlu1 %633 }
 0x220   : > { %v836_v58 = vsub.f32 1.0, %v835_v34  ;;  %v846_v48 = vor.u32 1.1754944e-38, %v845_v27  ;;  %v730_v55 = vmul.f32 %v1541_v8, %v2495_v29  ;;  %vm734_vm13 = vweird.f32 %v2495_v29  ;;  %vm856_vm14 = vmor %vm854_vm8, %vm855_vm11 }
 0x221   : > { %v1140_v30 = vmul.f32 %v1570_v26, %v968_v21  ;;  %v853_v20 = vadd.f32 %v1537_v12, %v852_v32  ;;  %v738_v31 = vand.u32 2147483647, %v2495_v29  ;;  %1544 = vrcp.f32 %v2523_v36 }
 0x222   : > { %v1543_v61 = vpop.eup %1542  ;;  %v837_v49 = vmul.f32 %v1539_v63, %v836_v58  ;;  %vm840_vm15 = vweird.f32 %v1539_v63  ;;  %v731_v6 = vsub.f32 1.0, %v730_v55  ;;  %v740_v9 = vand.u32 2147483648, %v2495_v29 }
 0x223   : > { %1172 = vst [vmem:[%s2183_s17 + $0xa8] sm:$0xff] %v1140_v30  ;;  %v857_v37 = vsel %vm856_vm14, %v1537_v12, %v853_v20  ;;  %vm735_vm0 = vweird.f32 %v1541_v8  ;;  %v985_v40 = vmul.f32 %v1543_v61, %v2505_v44  ;;  %vm989_vm1 = vweird.f32 %v2505_v44  ;;  %vm841_vm2 = vmor %vm839_vm10, %vm840_vm15 }
 0x224   : > { %v862_v23 = vsel %vm2526_vm9, %v861_v5, %v857_v37  ;;  %v838_v13 = vadd.f32 %v1539_v63, %v837_v49  ;;  %v732_v35 = vmul.f32 %v1541_v8, %v731_v6  ;;  %v995_v16 = vand.u32 2147483648, %v2505_v44  ;;  %vm736_vm4 = vmor %vm734_vm13, %vm735_vm0 }
 0x225   : > { %v863_v33 = vmul.f32 %v2131_v18, %v862_v23  ;;  %v986_v54 = vsub.f32 1.0, %v985_v40  ;;  %v993_v11 = vand.u32 2147483647, %v2505_v44  ;;  %1546 = vrcp.f32 %v2548_v4  ;;  %v1571_v18 = vld [vmem:[%s1841_s25 + $0x70] sm:$0xff] }
 0x226   : > { %v842_v45 = vsel %vm841_vm2, %v1539_v63, %v838_v13  ;;  %v733_v52 = vadd.f32 %v1541_v8, %v732_v35  ;;  %vm2561_vm3 = vcmp.eq.f32.partialorder %v738_v31, 8.507059e+37  ;;  %v741_v57 = vor.u32 1.1754944e-38, %v740_v9  ;;  %v1572_v63 = vld [vmem:[%s1841_s25 + $0x68] sm:$0xff] }
 0x227   : > { %v1545_v56 = vpop.eup %1544  ;;  %v1133_v14 = vmul.f32 %v1571_v18, %v863_v33  ;;  %v847_v12 = vsel %vm2536_vm12, %v846_v48, %v842_v45  ;;  %v987_v39 = vmul.f32 %v1543_v61, %v986_v54  ;;  %vm990_vm5 = vweird.f32 %v1543_v61  ;;  %v1574_v48 = vld [vmem:[%s1841_s25 + $0xb8] sm:$0xff] }
 0x228   : > { %v848_v50 = vmul.f32 %v2133_v22, %v847_v12  ;;  %v737_v0 = vsel %vm736_vm4, %v1541_v8, %v733_v52  ;;  %v996_v46 = vor.u32 1.1754944e-38, %v995_v16  ;;  %v970_v19 = vmul.f32 %v1545_v56, %v2523_v36  ;;  %vm991_vm6 = vmor %vm989_vm1, %vm990_vm5  ;;  %v1575_v16 = vld [vmem:[%s1841_s25 + $0xb0] sm:$0xff] }
 0x229   : > { %1165 = vst [vmem:[%s2183_s17 + $0x70] sm:$0xff] %v1133_v14  ;;  %v742_v62 = vsel %vm2561_vm3, %v741_v57, %v737_v0  ;;  %v988_v1 = vadd.f32 %v1543_v61, %v987_v39  ;;  %v978_v29 = vand.u32 2147483647, %v2523_v36  ;;  %v980_v27 = vand.u32 2147483648, %v2523_v36 }
 0x22a   : > { %v1132_v24 = vmul.f32 %v1572_v63, %v848_v50  ;;  %v743_v7 = vmul.f32 %v2136_v53, %v742_v62  ;;  %v971_v22 = vsub.f32 1.0, %v970_v19  ;;  %1548 = vrcp.f32 %v2573_v2  ;;  %v2590_v53 = vpop.xlane.xlu2 %635  ;;  %v1576_v50 = vld [vmem:[%s1841_s25 + $0x78] sm:$0xff] }
 0x22b   : > { %v1547_v17 = vpop.eup %1546  ;;  %v992_v10 = vsel %vm991_vm6, %v1543_v61, %v988_v1  ;;  %vm994_vm7 = vcmp.eq.f32.partialorder %v993_v11, 8.507059e+37  ;;  %vm975_vm8 = vweird.f32 %v1545_v56  ;;  %vm974_vm9 = vweird.f32 %v2523_v36  ;;  %v2606_v61 = vpop.xlane.xlu0 %637 }
 0x22c   : > { %1164 = vst [vmem:[%s2183_s17 + $0x68] sm:$0xff] %v1132_v24  ;;  %v1125_v15 = vmul.f32 %v1573_v28, %v743_v7  ;;  %v997_v5 = vsel %vm994_vm7, %v996_v46, %v992_v10  ;;  %v972_v34 = vmul.f32 %v1545_v56, %v971_v22  ;;  %v865_v8 = vmul.f32 %v1547_v17, %v2548_v4  ;;  %vm976_vm11 = vmor %vm974_vm9, %vm975_vm8 }
 0x22d   : > { %v998_v44 = vmul.f32 %v2143_v38, %v997_v5  ;;  %vm2594_vm10 = vcmp.eq.f32.partialorder %v978_v29, 8.507059e+37  ;;  %v981_v59 = vor.u32 1.1754944e-38, %v980_v27  ;;  %1550 = vrcp.f32 %v2565_v3  ;;  %v1577_v5 = vld [vmem:[%s1841_s25 + $0xe8] sm:$0xff] }
 0x22e   : > { %1157 = vst [vmem:[%s2183_s17 + $0x30] sm:$0xff] %v1125_v15  ;;  %v973_v32 = vadd.f32 %v1545_v56, %v972_v34  ;;  %v866_v58 = vsub.f32 1.0, %v865_v8  ;;  %v873_v26 = vand.u32 2147483647, %v2548_v4  ;;  %v875_v38 = vand.u32 2147483648, %v2548_v4 }
 0x22f   : > { %v1142_v55 = vmul.f32 %v1574_v48, %v998_v44  ;;  %1552 = vrcp.f32 %v2590_v53  ;;  %vm870_vm12 = vweird.f32 %v1547_v17  ;;  %v1083_v31 = vand.u32 2147483647, %v2573_v2 }
 0x230   : > { %v1549_v36 = vpop.eup %1548  ;;  %v977_v30 = vsel %vm976_vm11, %v1545_v56, %v973_v32  ;;  %v867_v20 = vmul.f32 %v1547_v17, %v866_v58  ;;  %vm869_vm13 = vweird.f32 %v2548_v4  ;;  %v1085_v40 = vand.u32 2147483648, %v2573_v2 }
 0x231   : > { %1174 = vst [vmem:[%s2183_s17 + $0xb8] sm:$0xff] %v1142_v55  ;;  %v982_v49 = vsel %vm2594_vm10, %v981_v59, %v977_v30  ;;  %v1075_v6 = vmul.f32 %v1549_v36, %v2573_v2  ;;  %vm871_vm14 = vmor %vm869_vm13, %vm870_vm12  ;;  %vm874_vm15 = vcmp.eq.f32.partialorder %v873_v26, 8.507059e+37  ;;  %v876_v23 = vor.u32 1.1754944e-38, %v875_v38  ;;  %v1578_v55 = vld [vmem:[%s1841_s25 + $0x38] sm:$0xff]  ;;  %v1579_v38 = vld [vmem:[%s1841_s25 + $0xf0] sm:$0xff] }
 0x232   : > { %v983_v9 = vmul.f32 %v2145_v60, %v982_v49  ;;  %v868_v37 = vadd.f32 %v1547_v17, %v867_v20  ;;  %1554 = vrcp.f32 %v2606_v61  ;;  %vm1079_vm0 = vweird.f32 %v2573_v2 }
 0x233   : > { %v1076_v13 = vsub.f32 1.0, %v1075_v6  ;;  %v1551_v35 = vpop.eup %1550  ;;  %vm2618_vm1 = vcmp.eq.f32.partialorder %v1083_v31, 8.507059e+37  ;;  %vm1080_vm2 = vweird.f32 %v1549_v36  ;;  %v1086_v57 = vor.u32 1.1754944e-38, %v1085_v40  ;;  %v1580_v31 = vld [vmem:[%s1841_s25 + $0xf8] sm:$0xff] }
 0x234   : > { %v1141_v33 = vmul.f32 %v1575_v16, %v983_v9  ;;  %v872_v54 = vsel %vm871_vm14, %v1547_v17, %v868_v37  ;;  %v745_v52 = vmul.f32 %v1551_v35, %v2565_v3  ;;  %vm749_vm3 = vweird.f32 %v2565_v3  ;;  %vm1081_vm4 = vmor %vm1079_vm0, %vm1080_vm2 }
 0x235   : > { %v1553_v4 = vpop.eup %1552  ;;  %v877_v11 = vsel %vm874_vm15, %v876_v23, %v872_v54  ;;  %v1077_v45 = vmul.f32 %v1549_v36, %v1076_v13  ;;  %v753_v12 = vand.u32 2147483647, %v2565_v3  ;;  %v755_v39 = vand.u32 2147483648, %v2565_v3 }
 0x236   : > { %1173 = vst [vmem:[%s2183_s17 + $0xb0] sm:$0xff] %v1141_v33  ;;  %v878_v51 = vmul.f32 %v2148_v47, %v877_v11  ;;  %v1090_v56 = vmul.f32 %v1553_v4, %v2590_v53  ;;  %v746_v14 = vsub.f32 1.0, %v745_v52  ;;  %vm1094_vm5 = vweird.f32 %v2590_v53 }
 0x237   : > { %v1078_v18 = vadd.f32 %v1549_v36, %v1077_v45  ;;  %v1098_v47 = vand.u32 2147483647, %v2590_v53  ;;  %vm750_vm6 = vweird.f32 %v1551_v35  ;;  %v1100_v29 = vand.u32 2147483648, %v2590_v53 }
 0x238   : > { %v1134_v0 = vmul.f32 %v1576_v50, %v878_v51  ;;  %v1091_v46 = vsub.f32 1.0, %v1090_v56  ;;  %v1555_v19 = vpop.eup %1554  ;;  %v747_v1 = vmul.f32 %v1551_v35, %v746_v14  ;;  %vm1095_vm7 = vweird.f32 %v1553_v4  ;;  %vm751_vm9 = vmor %vm749_vm3, %vm750_vm6 }
 0x239   : > { %v1082_v62 = vsel %vm1081_vm4, %v1549_v36, %v1078_v18  ;;  %v1105_v2 = vmul.f32 %v1555_v19, %v2606_v61  ;;  %vm754_vm8 = vcmp.eq.f32.partialorder %v753_v12, 8.507059e+37  ;;  %v756_v22 = vor.u32 1.1754944e-38, %v755_v39  ;;  %vm1096_vm11 = vmor %vm1094_vm5, %vm1095_vm7 }
 0x23a   : > { %1166 = vst [vmem:[%s2183_s17 + $0x78] sm:$0xff] %v1134_v0  ;;  %v1087_v27 = vsel %vm2618_vm1, %v1086_v57, %v1082_v62  ;;  %v1092_v63 = vmul.f32 %v1553_v4, %v1091_v46  ;;  %v748_v7 = vadd.f32 %v1551_v35, %v747_v1  ;;  %vm2642_vm10 = vcmp.eq.f32.partialorder %v1098_v47, 8.507059e+37 }
 0x23b   : > { %v1088_v24 = vmul.f32 %v2153_v42, %v1087_v27  ;;  %v1106_v28 = vsub.f32 1.0, %v1105_v2  ;;  %v1113_v15 = vand.u32 2147483647, %v2606_v61  ;;  %v1101_v3 = vor.u32 1.1754944e-38, %v1100_v29 }
 0x23c   : > { %v1093_v17 = vadd.f32 %v1553_v4, %v1092_v63  ;;  %v752_v42 = vsel %vm751_vm9, %v1551_v35, %v748_v7  ;;  %v1115_v8 = vand.u32 2147483648, %v2606_v61  ;;  %vm1110_vm12 = vweird.f32 %v1555_v19 }
 0x23d   : > { %v1148_v34 = vmul.f32 %v1577_v5, %v1088_v24  ;;  %v757_v44 = vsel %vm754_vm8, %v756_v22, %v752_v42  ;;  %v1107_v32 = vmul.f32 %v1555_v19, %v1106_v28  ;;  %vm1109_vm13 = vweird.f32 %v2606_v61 }
 0x23e   : > { %v1097_v21 = vsel %vm1096_vm11, %v1553_v4, %v1093_v17  ;;  %v758_v59 = vmul.f32 %v2155_v41, %v757_v44  ;;  %vm1111_vm14 = vmor %vm1109_vm13, %vm1110_vm12  ;;  %v1116_v41 = vor.u32 1.1754944e-38, %v1115_v8  ;;  %vm1114_vm15 = vcmp.eq.f32.partialorder %v1113_v15, 8.507059e+37 }
 0x23f   : > { %1180 = vst [vmem:[%s2183_s17 + $0xe8] sm:$0xff] %v1148_v34  ;;  %v1102_v58 = vsel %vm2642_vm10, %v1101_v3, %v1097_v21  ;;  %v1108_v48 = vadd.f32 %v1555_v19, %v1107_v32 }
 0x240   : > { %v1103_v53 = vmul.f32 %v2158_v43, %v1102_v58  ;;  %v1126_v26 = vmul.f32 %v1578_v55, %v758_v59 }
 0x241   : > { %v1112_v30 = vsel %vm1111_vm14, %v1555_v19, %v1108_v48 }
 0x242   : > { %v1149_v36 = vmul.f32 %v1579_v38, %v1103_v53  ;;  %1158 = vst [vmem:[%s2183_s17 + $0x38] sm:$0xff] %v1126_v26  ;;  %v1117_v20 = vsel %vm1114_vm15, %v1116_v41, %v1112_v30 }
 0x243   : > { %v1118_v43 = vmul.f32 %v2162_v25, %v1117_v20 }
 0x244   : > { %1181 = vst [vmem:[%s2183_s17 + $0xf0] sm:$0xff] %v1149_v36 }
 0x245   : > { %v1150_v61 = vmul.f32 %v1580_v31, %v1118_v43 }
 0x247   : > { %1182 = vst [vmem:[%s2183_s17 + $0xf8] sm:$0xff] %v1150_v61 }
 0x248   : > { %1668 = shalt.err (!%p1665_p10)
}
 0x249   : > { %s1718_s10 = smov 128   ;;  %s1719_s25 = smov 8  }
 0x24a   : > { %1370 = dma.vmem_to_hbm [thread:$0]  (%p1807_p7), %s1197_s27, 4096, %s1199_s28, %s1184_s29, %s1718_s10, %s1718_s10, %s1719_s25  }
 0x24b PF: > { %s1213_s18 = sand.u32 1, %s1699_s12   ;;  %p2756_p12 = scmp.ge.s32.totalorder %s1711_s15, 2 }
 0x24c   : > { %s1214_s23 = scalar_lea.sflag [#allocation4], %s1213_s18 }
 0x24d   : > { %p1381_p13 = pnand %p2756_p12, %p1775_p6 }
 0x24f   : > { %p1382_p0 = pneg %p1381_p13 }
 0x251   : > { %1694 = dma.done.wait (%p1382_p0), %s1214_s23, 4096  }
 0x252   : > { %1696 = vsyncadd (%p1382_p0), %s1214_s23, 4294963200  ;;  %p17_p3 = scmp.ge.s32.totalorder %s1793_s26, 4   ;;  %s2757_s12 = smov %s1703_s13 }
 0x253   : > { %s2758_s13 = smov %s1707_s14  ;;  %s2759_s14 = smov %s1803_s4 }
 0x254   : > { %s2760_s15 = smov %s1793_s26  ;;  %19 = sbr.rel (!%p17_p3) target bundleno = 6 (0x6), region = 81 }
 0x259   :  { %1220 = vsyncpa [#allocation3], 1 }
 0x25a   :  { %1222 = vsyncpa [#allocation3 + $0x1], 1 }
 0x25b   :  { %1223 = vsyncpa [#allocation6], 1 }
 0x25c   :  { %1224 = vsyncpa [#allocation4], 1 }
 0x25d   :  { %1226 = vsyncpa [#allocation4 + $0x1], 1 }

</bundles_post_ra>
